<compile_context>
chip_gen: v5e
topology: v5e:2x2
jax: 0.10.0
libtpu: 0.0.40
codegen_flags: <defaults>
</compile_context>

<pallas_src>
import functools

import jax
import jax.numpy as jnp
from jax import lax
from jax.experimental import pallas as pl
from jax.experimental.pallas import tpu as pltpu

_BN_EPS = 1e-5
_VMEM_LIMIT = 48 * 1024 * 1024    # explicit scoped-VMEM limit (< 64 MiB v7x/TC)
_MXU_BUDGET = 30 * 1024 * 1024    # target working set for the matmul kernel
_ELEM_BUDGET = 8 * 1024 * 1024    # per-block target for elementwise kernels
_RESIDENT_W = 24 * 1024 * 1024    # keep weights K-resident below this (dbuf'd)


def _rup(x, m):
    return (x + m - 1) // m * m


def _pad_to(x, rows, cols):
    r, c = x.shape
    if r == rows and c == cols:
        return x
    return jnp.pad(x, ((0, rows - r), (0, cols - c)))


# ----------------------------------------------------------------------------
# Pallas kernel 1: bf16 matmul (+ optional bias) + optional fused BN-stats
# ----------------------------------------------------------------------------
def _make_matmul_kernel(with_bias, with_stats):
    """Grid is (j over N tiles, i over M tiles, k over K tiles).  j and i are
    'parallel' (stats are per-row-tile partials, no cross-i accumulation); the
    reduction axis k is innermost and 'arbitrary'."""

    def kernel(*refs):
        if with_bias and with_stats:
            a_ref, b_ref, bias_ref, o_ref, sum_ref, ssq_ref, acc_ref = refs
        elif with_bias:
            a_ref, b_ref, bias_ref, o_ref, acc_ref = refs
        elif with_stats:
            a_ref, b_ref, o_ref, sum_ref, ssq_ref, acc_ref = refs
        else:
            a_ref, b_ref, o_ref, acc_ref = refs

        k = pl.program_id(2)

        @pl.when(k == 0)
        def _():
            acc_ref[...] = jnp.zeros_like(acc_ref)

        acc_ref[...] += jnp.dot(a_ref[...], b_ref[...],
                                preferred_element_type=jnp.float32)

        @pl.when(k == pl.num_programs(2) - 1)
        def _():
            yf = acc_ref[...]
            if with_bias:
                yf = yf + bias_ref[...]
            o_ref[...] = yf.astype(o_ref.dtype)
            if with_stats:
                # No bias on this path and zero-padded A rows => padded rows
                # contribute exactly zero to the statistics (no masking).
                sum_ref[...] = jnp.sum(yf, axis=0, keepdims=True)[None]
                ssq_ref[...] = jnp.sum(yf * yf, axis=0, keepdims=True)[None]

    return kernel


def _pick_tiles(M, K, N):
    """Choose (tm, tk, tn, Mp, Kp, Np) against the VMEM budget, keeping the
    full K dimension (the weight matrix) resident whenever it fits."""
    Kp = _rup(K, 128)
    Np = _rup(N, 128)
    tn = min(Np, 512)

    if 2 * Kp * tn * 2 <= _RESIDENT_W:
        tk = Kp                        # weight block DMA'd once per j tile
    else:                              # fallback K tiling (unused by this net)
        tk = 128
        for cand in (8192, 4096, 2048, 1024, 512, 256):
            if Kp % cand == 0 and 2 * cand * tn * 2 <= _RESIDENT_W // 2:
                tk = cand
                break

    per_row = 2 * tk * 2 + tn * 4 + 2 * tn * 2   # A dbuf + f32 acc + out dbuf
    tm_budget = max(128, (_MXU_BUDGET - 2 * tk * tn * 2) // per_row)
    if M <= min(tm_budget, 2048):
        tm = _rup(M, 8)                # single row tile
    else:
        tm = 128
        for cand in (2048, 1024, 512, 256):
            if cand <= tm_budget:
                tm = cand
                break
    Mp = _rup(M, tm)
    return tm, tk, tn, Mp, Kp, Np


@functools.partial(jax.jit, static_argnames=("out_dtype", "stats"))
def matmul_fused(a, w, bias=None, *, out_dtype=jnp.bfloat16, stats=False):
    """(M,K) @ (K,N) [+ bias[N]] -> padded (Mp, Np) out_dtype.  With stats=True
    also returns f32 per-column sum and sum-of-squares over the rows (fused
    BatchNorm statistics; padded rows contribute exactly zero)."""
    M, K = a.shape
    _, N = w.shape
    tm, tk, tn, Mp, Kp, Np = _pick_tiles(M, K, N)

    ap = _pad_to(a.astype(jnp.bfloat16), Mp, Kp)
    wp = _pad_to(w.astype(jnp.bfloat16), Kp, Np)
    gi, nj, nk = Mp // tm, Np // tn, Kp // tk

    inputs = [ap, wp]
    in_specs = [
        pl.BlockSpec((tm, tk), lambda j, i, k: (i, k)),
        pl.BlockSpec((tk, tn), lambda j, i, k: (k, j)),
    ]
    if bias is not None:
        bp = jnp.pad(bias.astype(jnp.float32), (0, Np - N)).reshape(1, Np)
        inputs.append(bp)
        in_specs.append(pl.BlockSpec((1, tn), lambda j, i, k: (0, j)))

    y_shape = jax.ShapeDtypeStruct((Mp, Np), out_dtype)
    y_spec = pl.BlockSpec((tm, tn), lambda j, i, k: (i, j))
    if stats:
        s_shape = jax.ShapeDtypeStruct((gi, 1, Np), jnp.float32)
        s_spec = pl.BlockSpec((1, 1, tn), lambda j, i, k: (i, 0, j))
        out_shape = (y_shape, s_shape, s_shape)
        out_specs = (y_spec, s_spec, s_spec)
    else:
        out_shape = y_shape
        out_specs = y_spec

    outs = pl.pallas_call(
        _make_matmul_kernel(bias is not None, stats),
        out_shape=out_shape,
        grid=(nj, gi, nk),
        in_specs=in_specs,
        out_specs=out_specs,
        scratch_shapes=[pltpu.VMEM((tm, tn), jnp.float32)],
        compiler_params=pltpu.CompilerParams(
            dimension_semantics=("parallel", "parallel", "arbitrary"),
            vmem_limit_bytes=_VMEM_LIMIT),
    )(*inputs)

    if not stats:
        return outs
    yp, s3, q3 = outs
    # Reduce the per-row-tile partial statistics (tiny: (gi, Np) f32).
    s = jnp.sum(s3, axis=(0, 1)).reshape(1, Np)
    q = jnp.sum(q3, axis=(0, 1)).reshape(1, Np)
    return yp, s, q


# ----------------------------------------------------------------------------
# Pallas kernel 2: BN normalize (+ optional ReLU, + optional fused residual)
# ----------------------------------------------------------------------------
def _make_bn_norm_kernel(count, eps, relu, has_res):
    inv_count = 1.0 / float(count)

    def body(y_ref, s_ref, q_ref, g_ref, b_ref, r_ref, o_ref):
        mean = s_ref[...] * inv_count
        var = jnp.maximum(q_ref[...] * inv_count - mean * mean, 0.0)
        scale = lax.rsqrt(var + eps) * g_ref[...]
        shift = b_ref[...] - mean * scale
        out = y_ref[...].astype(jnp.float32) * scale + shift
        if relu:
            out = jnp.maximum(out, 0.0)
        if r_ref is not None:
            out = out + r_ref[...].astype(jnp.float32)
        o_ref[...] = out.astype(o_ref.dtype)

    if has_res:
        def kernel(y_ref, s_ref, q_ref, g_ref, b_ref, r_ref, o_ref):
            body(y_ref, s_ref, q_ref, g_ref, b_ref, r_ref, o_ref)
    else:
        def kernel(y_ref, s_ref, q_ref, g_ref, b_ref, o_ref):
            body(y_ref, s_ref, q_ref, g_ref, b_ref, None, o_ref)
    return kernel


def _row_tile(Mp, per_row_bytes, budget):
    if Mp * per_row_bytes <= budget:
        return Mp
    for t in (4096, 2048, 1024, 512, 256, 128, 64, 32, 16, 8):
        if Mp % t == 0 and t * per_row_bytes <= budget:
            return t
    return 8


@functools.partial(jax.jit, static_argnames=("count", "relu"))
def bn_norm(yp, s, q, gamma, beta, res, *, count, relu):
    """Normalize the padded (Mp, Np) conv output with its fused batch stats.
    `res` (optional, padded, bf16) is added after normalization / ReLU."""
    Mp, Np = yp.shape
    C = gamma.shape[0]
    gp = jnp.pad(gamma.astype(jnp.float32), (0, Np - C),
                 constant_values=1.0).reshape(1, Np)
    bp = jnp.pad(beta.astype(jnp.float32), (0, Np - C)).reshape(1, Np)
    has_res = res is not None
    if has_res and res.shape[0] != Mp:        # row padding may differ per branch
        res = res[:Mp] if res.shape[0] > Mp else jnp.pad(
            res, ((0, Mp - res.shape[0]), (0, 0)))

    per_row = (6 if has_res else 4) * Np * 2  # dbuf'd bf16 y / out (+ res)
    tbn = _row_tile(Mp, per_row, _ELEM_BUDGET)

    inputs = [yp, s, q, gp, bp]
    in_specs = [
        pl.BlockSpec((tbn, Np), lambda m: (m, 0)),
        pl.BlockSpec((1, Np), lambda m: (0, 0)),
        pl.BlockSpec((1, Np), lambda m: (0, 0)),
        pl.BlockSpec((1, Np), lambda m: (0, 0)),
        pl.BlockSpec((1, Np), lambda m: (0, 0)),
    ]
    if has_res:
        inputs.append(res)
        in_specs.append(pl.BlockSpec((tbn, Np), lambda m: (m, 0)))

    return pl.pallas_call(
        _make_bn_norm_kernel(count, _BN_EPS, relu, has_res),
        out_shape=jax.ShapeDtypeStruct((Mp, Np), jnp.bfloat16),
        grid=(Mp // tbn,),
        in_specs=in_specs,
        out_specs=pl.BlockSpec((tbn, Np), lambda m: (m, 0)),
        compiler_params=pltpu.CompilerParams(
            dimension_semantics=("parallel",),
            vmem_limit_bytes=_VMEM_LIMIT),
    )(*inputs)


# ----------------------------------------------------------------------------
# Pallas kernel 3: pooling window reduction (max / mean over tap axis)
# ----------------------------------------------------------------------------
def _make_reduce_kernel(op, scale):
    def kernel(x_ref, o_ref):
        x = x_ref[...]                       # (Kwin, tmr, Cp)
        if op == "max":
            o_ref[...] = jnp.max(x, axis=0)
        else:                                # mean
            o_ref[...] = (jnp.sum(x.astype(jnp.float32), axis=0)
                          * scale).astype(o_ref.dtype)
    return kernel


@functools.partial(jax.jit, static_argnames=("op",))
def window_reduce(stacked, *, op):
    """Reduce a (Kwin, M, C) bf16 stack of pooling-window taps over axis 0."""
    # TODO(synk): the tap stack is still materialized by XLA; reading the padded
    # NHWC activation directly per tap would avoid the extra HBM round trip.
    Kw, M, C = stacked.shape
    Cp = _rup(C, 128)
    per_row = 2 * (Kw + 1) * Cp * 2          # dbuf'd bf16 tap stack + output
    tmr_budget = max(8, _ELEM_BUDGET // per_row)
    if M <= min(tmr_budget, 2048):
        tmr = _rup(M, 8)
    else:
        tmr = 128
        for cand in (2048, 1024, 512, 256):
            if cand <= tmr_budget:
                tmr = cand
                break
    Mp = _rup(M, tmr)
    xp = jnp.pad(stacked, ((0, 0), (0, Mp - M), (0, Cp - C)))
    out = pl.pallas_call(
        _make_reduce_kernel(op, 1.0 / Kw),
        out_shape=jax.ShapeDtypeStruct((Mp, Cp), jnp.bfloat16),
        grid=(Mp // tmr,),
        in_specs=[pl.BlockSpec((Kw, tmr, Cp), lambda m: (0, m, 0))],
        out_specs=pl.BlockSpec((tmr, Cp), lambda m: (m, 0)),
        compiler_params=pltpu.CompilerParams(
            dimension_semantics=("parallel",),
            vmem_limit_bytes=_VMEM_LIMIT),
    )(xp)
    return out[:M, :C]


# ----------------------------------------------------------------------------
# Layer wrappers (glue: im2col / padding / reshape only)
# ----------------------------------------------------------------------------
def conv2d_matmul(x, w, stride, padding):
    """x: (N,H,W,Cin) NHWC bf16; w: torch layout (Cout,Cin,kh,kw).
    Returns (padded bf16 conv output, sum, sumsq, M, Cout, Ho, Wo).
    The conv bias is intentionally omitted: a per-channel constant added before
    training-mode BatchNorm cancels exactly in (y - mean)."""
    N, H, W, Cin = x.shape
    Cout, _, kh, kw = w.shape
    Ho = (H + 2 * padding - kh) // stride + 1
    Wo = (W + 2 * padding - kw) // stride + 1
    if kh == 1 and kw == 1 and padding == 0:
        xs = x[:, ::stride, ::stride, :] if stride > 1 else x
        a = xs.reshape(N * Ho * Wo, Cin)
    else:
        # TODO(synk): im2col slab is still materialized by XLA (in bf16); a
        # manual-DMA tap-axis matmul would avoid the extra HBM round trip.
        xp = jnp.pad(x, ((0, 0), (padding, padding), (padding, padding), (0, 0)))
        cols = [xp[:, dy:dy + stride * Ho:stride, dx:dx + stride * Wo:stride, :]
                for dy in range(kh) for dx in range(kw)]
        a = jnp.concatenate(cols, axis=-1).reshape(N * Ho * Wo, kh * kw * Cin)
    wm = jnp.transpose(w, (2, 3, 1, 0)).reshape(kh * kw * Cin, Cout)
    yp, s, q = matmul_fused(a, wm, stats=True)
    return yp, s, q, N * Ho * Wo, Cout, Ho, Wo


def conv_bn(x, cp, bnp, *, stride, padding, relu, res_p=None):
    """Conv (matmul + fused BN stats) followed by a single normalize pass that
    also applies ReLU and, for the identity branch, the residual add."""
    yp, s, q, M, Cout, Ho, Wo = conv2d_matmul(x, cp["w"], stride, padding)
    outp = bn_norm(yp, s, q, bnp["g"], bnp["b"], res_p, count=M, relu=relu)
    return outp, (x.shape[0], Ho, Wo, Cout)


def _unpad_nhwc(yp, shape):
    N, H, W, C = shape
    return yp[:N * H * W, :C].reshape(N, H, W, C)


def maxpool2d(x, k, stride, padding):
    N, H, W, C = x.shape
    Ho = (H + 2 * padding - k) // stride + 1
    Wo = (W + 2 * padding - k) // stride + 1
    xp = jnp.pad(x, ((0, 0), (padding, padding), (padding, padding), (0, 0)),
                 constant_values=-jnp.inf)
    slabs = [xp[:, dy:dy + stride * Ho:stride, dx:dx + stride * Wo:stride, :]
             .reshape(1, N * Ho * Wo, C)
             for dy in range(k) for dx in range(k)]
    out = window_reduce(jnp.concatenate(slabs, axis=0), op="max")
    return out.reshape(N, Ho, Wo, C)


def avgpool2d(x, k):
    N, H, W, C = x.shape
    Ho, Wo = (H - k) // k + 1, (W - k) // k + 1
    slabs = [x[:, dy:dy + k * Ho:k, dx:dx + k * Wo:k, :]
             .reshape(1, N * Ho * Wo, C)
             for dy in range(k) for dx in range(k)]
    out = window_reduce(jnp.concatenate(slabs, axis=0), op="mean")
    return out.reshape(N, Ho, Wo, C)


def residual_block_forward(x, p, stride):
    # Bottleneck: conv1x1+BN+ReLU -> conv3x3(stride)+BN+ReLU -> conv1x1+BN+ReLU
    y1p, s1 = conv_bn(x, p["c1"], p["bn1"], stride=1, padding=0, relu=True)
    y2p, s2 = conv_bn(_unpad_nhwc(y1p, s1), p["c2"], p["bn2"],
                      stride=stride, padding=1, relu=True)
    y3p, s3 = conv_bn(_unpad_nhwc(y2p, s2), p["c3"], p["bn3"],
                      stride=1, padding=0, relu=True)
    # identity branch: conv1x1(stride)+BN, with the bottleneck output fused as
    # the residual add (output = iden(x) + Bottleneck(x), no ReLU afterwards).
    outp, so = conv_bn(x, p["ci"], p["bni"], stride=stride, padding=0,
                       relu=False, res_p=y3p)
    return _unpad_nhwc(outp, so)


# ----------------------------------------------------------------------------
# Deterministic parameter initialization (matches torch module shapes)
# ----------------------------------------------------------------------------
_BLOCK_CFG = {
    "layer2": [(64, 64, 256, 1), (256, 64, 256, 2), (256, 64, 256, 1)],
    "layer3": [(256, 128, 512, 2)] + [(512, 128, 512, 1)] * 3,
    "layer4": [(512, 256, 1024, 2), (1024, 256, 1024, 1),
               (1024, 256, 1024, 2), (1024, 256, 1024, 1),
               (1024, 256, 1024, 2), (1024, 256, 1024, 1)],
    "layer5": [(1024, 512, 2048, 2), (2048, 1024, 2048, 1),
               (2048, 1024, 2048, 1)],
}


def _init_conv(key, cin, cout, k):
    kw_, kb_ = jax.random.split(key)
    fan_in = cin * k * k
    return {"w": jax.random.normal(kw_, (cout, cin, k, k), jnp.float32)
                 * (2.0 / fan_in) ** 0.5,
            # Conv biases exist to match the torch parameter set but are unused
            # on conv+BN paths (they cancel in training-mode BatchNorm).
            "b": 0.01 * jax.random.normal(kb_, (cout,), jnp.float32)}


def _init_bn(key, c):
    kg, kb = jax.random.split(key)
    return {"g": 1.0 + 0.1 * jax.random.normal(kg, (c,), jnp.float32),
            "b": 0.1 * jax.random.normal(kb, (c,), jnp.float32)}


def init_params(key):
    keys = iter(jax.random.split(key, 256))
    nk = lambda: next(keys)
    params = {"conv1": _init_conv(nk(), 3, 64, 7), "bn1": _init_bn(nk(), 64)}
    for name, cfg in _BLOCK_CFG.items():
        blocks = []
        for indim, middim, outdim, _ in cfg:
            blocks.append({
                "c1": _init_conv(nk(), indim, middim, 1), "bn1": _init_bn(nk(), middim),
                "c2": _init_conv(nk(), middim, middim, 3), "bn2": _init_bn(nk(), middim),
                "c3": _init_conv(nk(), middim, outdim, 1), "bn3": _init_bn(nk(), outdim),
                "ci": _init_conv(nk(), indim, outdim, 1), "bni": _init_bn(nk(), outdim),
            })
        params[name] = blocks
    params["fc_w"] = jax.random.normal(nk(), (5, 2048), jnp.float32) * (1.0 / 2048) ** 0.5
    params["fc_b"] = 0.01 * jax.random.normal(nk(), (5,), jnp.float32)
    return params


# ----------------------------------------------------------------------------
# Full forward pass (torch: NCHW input -> (N, 5) logits)
# ----------------------------------------------------------------------------
def resnet_forward(x_nchw, params):
    x = jnp.transpose(x_nchw, (0, 2, 3, 1)).astype(jnp.bfloat16)   # NCHW->NHWC
    # layer1: Conv2d(3,64,7,2,3) + BN + ReLU + MaxPool2d(3,2,1)
    yp, shp = conv_bn(x, params["conv1"], params["bn1"],
                      stride=2, padding=3, relu=True)
    x = _unpad_nhwc(yp, shp)
    x = maxpool2d(x, k=3, stride=2, padding=1)
    # layer2..layer5: bottleneck residual blocks
    for name in ("layer2", "layer3", "layer4", "layer5"):
        for p, (_, _, _, stride) in zip(params[name], _BLOCK_CFG[name]):
            x = residual_block_forward(x, p, stride)
    # AvgPool2d((2,2)) -> flatten -> Linear(2048, 5)
    x = avgpool2d(x, k=2)
    n = x.shape[0]
    flat = x.reshape(n, -1)                                        # (N, 2048)
    logits_p = matmul_fused(flat, params["fc_w"].T, params["fc_b"],
                            out_dtype=jnp.float32, stats=False)
    return logits_p[:n, :5]                                        # (N, 5)


if __name__ == "__main__":
    key = jax.random.PRNGKey(0)
    kx, kp = jax.random.split(key)
    # 257 is the smallest spatial size for which the module is shape-consistent:
    # 8 stride-2 stages + the final 2x2 avgpool must collapse spatial to 1x1 so
    # that flatten gives exactly 2048 features for fc(2048, 5).
    x = jax.random.normal(kx, (2, 3, 257, 257), jnp.float32)
    params = init_params(kp)
    out = resnet_forward(x, params)
    out = jax.block_until_ready(out)
    assert out.shape == (2, 5), out.shape
    assert bool(jnp.all(jnp.isfinite(out.astype(jnp.float32))))
    print("KERNEL_OK")
</pallas_src>

<mosaic_0001>
module attributes {stable_mosaic.version = 11 : i64} {
  func.func @kernel(%arg0: i32, %arg1: i32, %arg2: i32, %arg3: memref<2048x256xbf16, #tpu.memory_space<vmem>>, %arg4: memref<256x128xbf16, #tpu.memory_space<vmem>>, %arg5: memref<2048x128xbf16, #tpu.memory_space<vmem>>, %arg6: memref<1x1x128xf32, #tpu.memory_space<vmem>>, %arg7: memref<1x1x128xf32, #tpu.memory_space<vmem>>, %arg8: memref<2048x128xf32, #tpu.memory_space<vmem>>) attributes {dimension_semantics = [#tpu.dimension_semantics<parallel>, #tpu.dimension_semantics<parallel>, #tpu.dimension_semantics<arbitrary>], iteration_bounds = array<i64: 1, 17, 1>, scalar_prefetch = 0 : i64, scratch_operands = 1 : i64, tpu.core_type = #tpu.core_type<tc>, window_params = [{transform_indices = @transform_0, window_bounds = array<i64: 2048, 256>}, {transform_indices = @transform_1, window_bounds = array<i64: 256, 128>}, {transform_indices = @transform_2, window_bounds = array<i64: 2048, 128>}, {transform_indices = @transform_3, window_bounds = array<i64: 1, 1, 128>}, {transform_indices = @transform_4, window_bounds = array<i64: 1, 1, 128>}]} {
    %c0_i32 = arith.constant 0 : i32
    %0 = arith.cmpi eq, %arg2, %c0_i32 : i32
    %1 = arith.extui %0 : i1 to i32
    %c0_i32_0 = arith.constant 0 : i32
    %2 = arith.cmpi ne, %1, %c0_i32_0 : i32
    scf.if %2 {
      %cst_10 = arith.constant 0.000000e+00 : f32
      %12 = vector.broadcast %cst_10 : f32 to vector<2048x128xf32>
      %c0_11 = arith.constant 0 : index
      %c0_12 = arith.constant 0 : index
      %13 = vector.load %arg8[%c0_11, %c0_12] : memref<2048x128xf32, #tpu.memory_space<vmem>>, vector<2048x128xf32>
      tpu.vector_store %arg8[%c0_11, %c0_12], %12 {strides = array<i32>} : memref<2048x128xf32, #tpu.memory_space<vmem>>, vector<2048x128xf32>,
    } else {
    }
    %c0 = arith.constant 0 : index
    %c0_1 = arith.constant 0 : index
    %3 = vector.load %arg8[%c0, %c0_1] : memref<2048x128xf32, #tpu.memory_space<vmem>>, vector<2048x128xf32>
    %c0_2 = arith.constant 0 : index
    %c0_3 = arith.constant 0 : index
    %4 = vector.load %arg3[%c0_2, %c0_3] : memref<2048x256xbf16, #tpu.memory_space<vmem>>, vector<2048x256xbf16>
    %c0_4 = arith.constant 0 : index
    %c0_5 = arith.constant 0 : index
    %5 = vector.load %arg4[%c0_4, %c0_5] : memref<256x128xbf16, #tpu.memory_space<vmem>>, vector<256x128xbf16>
    %cst = arith.constant dense<0.000000e+00> : vector<2048x128xf32>
    %6 = tpu.matmul %4, %5, %cst {dimension_numbers = #tpu.dot_dimension_numbers<[1], [0], [0], [1], [0, 0, 1, 1], [], []>} : vector<2048x256xbf16>, vector<256x128xbf16>, vector<2048x128xf32> -> vector<2048x128xf32>
    %7 = arith.addf %3, %6 : vector<2048x128xf32>
    %c0_6 = arith.constant 0 : index
    %c0_7 = arith.constant 0 : index
    %8 = vector.load %arg8[%c0_6, %c0_7] : memref<2048x128xf32, #tpu.memory_space<vmem>>, vector<2048x128xf32>
    tpu.vector_store %arg8[%c0_6, %c0_7], %7 {strides = array<i32>} : memref<2048x128xf32, #tpu.memory_space<vmem>>, vector<2048x128xf32>,
    %c0_i32_8 = arith.constant 0 : i32
    %9 = arith.cmpi eq, %arg2, %c0_i32_8 : i32
    %10 = arith.extui %9 : i1 to i32
    %c0_i32_9 = arith.constant 0 : i32
    %11 = arith.cmpi ne, %10, %c0_i32_9 : i32
    scf.if %11 {
      %c0_10 = arith.constant 0 : index
      %c0_11 = arith.constant 0 : index
      %12 = vector.load %arg8[%c0_10, %c0_11] : memref<2048x128xf32, #tpu.memory_space<vmem>>, vector<2048x128xf32>
      %13 = arith.truncf %12 : vector<2048x128xf32> to vector<2048x128xbf16>
      %c0_12 = arith.constant 0 : index
      %c0_13 = arith.constant 0 : index
      %14 = vector.load %arg5[%c0_12, %c0_13] : memref<2048x128xbf16, #tpu.memory_space<vmem>>, vector<2048x128xbf16>
      tpu.vector_store %arg5[%c0_12, %c0_13], %13 {strides = array<i32>} : memref<2048x128xbf16, #tpu.memory_space<vmem>>, vector<2048x128xbf16>,
      %cst_14 = arith.constant dense<0.000000e+00> : vector<128xf32>
      %15 = vector.multi_reduction <add>, %12, %cst_14 [0] : vector<2048x128xf32> to vector<128xf32>
      %16 = vector.shape_cast %15 : vector<128xf32> to vector<1x128xf32>
      %17 = vector.shape_cast %16 : vector<1x128xf32> to vector<1x1x128xf32>
      %c0_15 = arith.constant 0 : index
      %c0_16 = arith.constant 0 : index
      %c0_17 = arith.constant 0 : index
      %18 = vector.load %arg6[%c0_15, %c0_16, %c0_17] : memref<1x1x128xf32, #tpu.memory_space<vmem>>, vector<1x1x128xf32>
      tpu.vector_store %arg6[%c0_15, %c0_16, %c0_17], %17 {strides = array<i32>} : memref<1x1x128xf32, #tpu.memory_space<vmem>>, vector<1x1x128xf32>,
      %19 = arith.mulf %12, %12 : vector<2048x128xf32>
      %cst_18 = arith.constant dense<0.000000e+00> : vector<128xf32>
      %20 = vector.multi_reduction <add>, %19, %cst_18 [0] : vector<2048x128xf32> to vector<128xf32>
      %21 = vector.shape_cast %20 : vector<128xf32> to vector<1x128xf32>
      %22 = vector.shape_cast %21 : vector<1x128xf32> to vector<1x1x128xf32>
      %c0_19 = arith.constant 0 : index
      %c0_20 = arith.constant 0 : index
      %c0_21 = arith.constant 0 : index
      %23 = vector.load %arg7[%c0_19, %c0_20, %c0_21] : memref<1x1x128xf32, #tpu.memory_space<vmem>>, vector<1x1x128xf32>
      tpu.vector_store %arg7[%c0_19, %c0_20, %c0_21], %22 {strides = array<i32>} : memref<1x1x128xf32, #tpu.memory_space<vmem>>, vector<1x1x128xf32>,
    } else {
    }
    return
  }
  func.func @transform_0(%arg0: i32, %arg1: i32, %arg2: i32) -> (i32, i32) {
    %c0_i32 = arith.constant 0 : i32
    return %arg1, %arg2 : i32, i32
  }
  func.func @transform_1(%arg0: i32, %arg1: i32, %arg2: i32) -> (i32, i32) {
    %c0_i32 = arith.constant 0 : i32
    return %arg2, %arg0 : i32, i32
  }
  func.func @transform_2(%arg0: i32, %arg1: i32, %arg2: i32) -> (i32, i32) {
    %c0_i32 = arith.constant 0 : i32
    return %arg1, %arg0 : i32, i32
  }
  func.func @transform_3(%arg0: i32, %arg1: i32, %arg2: i32) -> (i32, i32, i32) {
    %c0_i32 = arith.constant 0 : i32
    %c0_i32_0 = arith.constant 0 : i32
    return %arg1, %c0_i32, %arg0 : i32, i32, i32
  }
  func.func @transform_4(%arg0: i32, %arg1: i32, %arg2: i32) -> (i32, i32, i32) {
    %c0_i32 = arith.constant 0 : i32
    %c0_i32_0 = arith.constant 0 : i32
    return %arg1, %c0_i32, %arg0 : i32, i32, i32
  }
}

</mosaic_0001>

<bundles_post_ra>
// kernel: matmul_fused.1
= control target key start
LH: loop header
LB: loop body
LE: loop exit
PB: predicated region body
PF: predicated region fallthrough
CT: control target
= control target key end

     0   :  { %10 = vsyncpa [#allocation4], 0  ;;  %s9970_s0 = inlined_call_operand.vmem [shape: bf16[34816,256], index: 0, kind: input, shape index: {}]   ;;  %s9971_s1 = inlined_call_operand.vmem [shape: bf16[256,128], index: 1, kind: input, shape index: {}]   ;;  %s9972_s2 = inlined_call_operand.hbm [shape: bf16[34816,128], index: 2, kind: output, shape index: {0}]   ;;  %s9973_s3 = inlined_call_operand.vmem [shape: f32[17,1,128], index: 3, kind: output, shape index: {1}]   ;;  %s9974_s4 = inlined_call_operand.vmem [shape: f32[17,1,128], index: 4, kind: output, shape index: {2}]  }
   0x1   :  { %12 = vsyncpa [#allocation4 + $0x1], 0  ;;  %s8356_s15 = smov 0   ;;  %s8358_s16 = smov 0  }
   0x2   :  { %s8360_s17 = smov 0   ;;  %s8362_s18 = smov 0  }
   0x3   :  { %s8364_s19 = smov 0   ;;  %s8366_s20 = smov 0  }
   0x4 LB: > { %s6032_s21 = sadd.s32 4294967295, %s8327_s20   ;;  %s6033_s22 = sadd.s32 4294967294, %s8327_s20   ;;  %s8327_s20 = sphi %s8366_s20, %s18_s20   ;;  %s8323_s19 = sphi %s8364_s19, %s10233_s19   ;;  %s8319_s18 = sphi %s8362_s18, %s10232_s18   ;;  %s8315_s17 = sphi %s8360_s17, %s10231_s17   ;;  %s8311_s16 = sphi %s8358_s16, %s10230_s16   ;;  %s8307_s15 = sphi %s8356_s15, %s10229_s15  }
   0x5   : > { %s33_s23 = sadd.s32 1, %s8323_s19  ;;  %s102_s24 = sadd.s32 1, %s8315_s17 }
   0x6   : > { %p35_p0 = scmp.ge.s32.totalorder %s33_s23, 17  ;;  %p112_p1 = scmp.ne.s32.totalorder %s8315_s17, %s8311_s16 }
   0x7   : > { %p113_p2 = scmp.eq.s32.totalorder %s6032_s21, 16  ;;  %p118_p3 = scmp.ne.s32.totalorder %s8311_s16, %s8307_s15 }
   0x8   : > { %s10235_s23 = smov (%p35_p0, %s33_s23), 0  ;;  %p119_p5 = scmp.eq.s32.totalorder %s6033_s22, 16 }
   0x9   : > { %p8396_p4 = por %p113_p2, %p112_p1  ;;  %s97_s26 = ssub.s32 %s8323_s19, %s10235_s23 }
   0xa   : > { %p6037_p6 = scmp.ge.s32.totalorder %s8327_s20, 1  ;;  %p100_p7 = scmp.eq.s32.totalorder %s97_s26, 0 }
   0xb   : > { %p8403_p8 = por %p119_p5, %p118_p3  ;;  %p220_p9 = scmp.lt.s32.totalorder %s8327_s20, 18 }
   0xc   : > { %s8409_s28 = scalar_select %p100_p7, %s8315_s17, %s102_s24  }
   0xd   : > { %p221_p10 = pnand %p6037_p6, %p220_p9 }
   0xf   : > { %224 = sbr.rel (%p221_p10) target bundleno = 1470 (0x5be), region = 28 }
  0x14   : > { %v7399_v0 = vld [vmem:[%s9971_s1 + $0x38] sm:$0xff]  ;;  %v7398_v2 = vld [vmem:[%s9971_s1 + $0x30] sm:$0xff]  ;;  %v7397_v4 = vld [vmem:[%s9971_s1 + $0x28] sm:$0xff]  ;;  %s6039_s21 = sshll.u32 %s8319_s18, 8  ;;  %s252_s8 = sand.u32 1, %s8311_s16  }
  0x15   : > { %v7407_v1 = vld [vmem:[%s9971_s1 + $0x78] sm:$0xff]  ;;  %2485 = vmatpush.bf16.msra.mxu0 %v7399_v0  ;;  %v7406_v3 = vld [vmem:[%s9971_s1 + $0x70] sm:$0xff]  ;;  %8176 = vmatpush.bf16.msra.mxu2 %v7399_v0  ;;  %v7405_v5 = vld [vmem:[%s9971_s1 + $0x68] sm:$0xff]  ;;  %p273_p11 = scmp.lt.s32.totalorder %s6039_s21, 4351  ;;  %s6038_s9 = sshll.u32 %s252_s8, 10 }
  0x16   : > { %3134 = vmatpush.bf16.msra.mxu1 %v7407_v1  ;;  %8184 = vmatpush.bf16.msra.mxu3 %v7407_v1  ;;  %v7396_v6 = vld [vmem:[%s9971_s1 + $0x20] sm:$0xff]  ;;  %v7395_v8 = vld [vmem:[%s9971_s1 + $0x18] sm:$0xff]  ;;  %v7394_v10 = vld [vmem:[%s9971_s1 + $0x10] sm:$0xff]  ;;  %s8508_s10 = scalar_lea.vmem [#allocation3], %s6038_s9  ;;  %s7408_s11 = sshll.u32 %s8319_s18, 10 }
  0x17   : > { %v7404_v7 = vld [vmem:[%s9971_s1 + $0x60] sm:$0xff]  ;;  %v7403_v9 = vld [vmem:[%s9971_s1 + $0x58] sm:$0xff]  ;;  %s10237_s21 = smov (!%p273_p11, %s6039_s21), 4351  ;;  %v7402_v11 = vld [vmem:[%s9971_s1 + $0x50] sm:$0xff]  ;;  %s5871_s14 = scalar_lea.hbm %s9972_s2, %s7408_s11 }
  0x18   : > { %s7135_s12 = sshll.u32 %s10237_s21, 3  ;;  %v7393_v12 = vld [vmem:[%s9971_s1 + $0x8] sm:$0xff]  ;;  %v7392_v14 = vld [vmem:[%s9971_s1] sm:$0xff]  ;;  %s5872_s22 = sshll.u32 %s8508_s10, 4  ;;  %s9862_s22 = int_to_ptr.vmem [resolvable:$true] %s5872_s22 }
  0x19   : > { %2486 = vmatpush.bf16.msra.mxu0 %v7398_v2  ;;  %8177 = vmatpush.bf16.msra.mxu2 %v7398_v2  ;;  %v7401_v13 = vld [vmem:[%s9971_s1 + $0x48] sm:$0xff]  ;;  %s8457_s30 = scalar_lea.vmem %s9970_s0, %s7135_s12  ;;  %v7400_v15 = vld [vmem:[%s9971_s1 + $0x40] sm:$0xff]  ;;  %s5874_s24 = sshll.u32 %s5871_s14, 4  ;;  %s5875_s24 = int_to_ptr.hbm [resolvable:$true] %s5874_s24 }
  0x1a   : > { %3135 = vmatpush.bf16.msra.mxu1 %v7406_v3  ;;  %8185 = vmatpush.bf16.msra.mxu3 %v7406_v3  ;;  %v6044_v16 = vld [vmem:[%s8457_s30] sm:$0xf]  ;;  %v7137_v17 = vld [vmem:[%s8457_s30 + $0x4] sm:$0xf0]  ;;  %v7136_v18 = vld [vmem:[%s8457_s30 + $0x4] sm:$0xf] }
  0x1b   : > { %v6046_v19 = vld [vmem:[%s8457_s30 + $0x8] sm:$0xf0]  ;;  %v6045_v20 = vor.u32 %v7137_v17, %v6044_v16  ;;  %v6052_v22 = vld [vmem:[%s8457_s30 + $0x10] sm:$0xf]  ;;  %v7139_v23 = vld [vmem:[%s8457_s30 + $0x14] sm:$0xf0] }
  0x1c   : > { %v6049_v21 = vor.u32 %v7136_v18, %v6046_v19  ;;  %v7138_v24 = vld [vmem:[%s8457_s30 + $0x14] sm:$0xf]  ;;  %v6054_v25 = vld [vmem:[%s8457_s30 + $0x18] sm:$0xf0]  ;;  %v6053_v26 = vor.u32 %v7139_v23, %v6052_v22  ;;  %v6060_v28 = vld [vmem:[%s8457_s30 + $0x20] sm:$0xf] }
  0x1d   : > { %2487 = vmatpush.bf16.msra.mxu0 %v7397_v4  ;;  %8178 = vmatpush.bf16.msra.mxu2 %v7397_v4  ;;  %v6057_v27 = vor.u32 %v7138_v24, %v6054_v25  ;;  %v7141_v29 = vld [vmem:[%s8457_s30 + $0x24] sm:$0xf0]  ;;  %v7140_v30 = vld [vmem:[%s8457_s30 + $0x24] sm:$0xf]  ;;  %v6062_v31 = vld [vmem:[%s8457_s30 + $0x28] sm:$0xf0] }
  0x1e   : > { %3136 = vmatpush.bf16.msra.mxu1 %v7405_v5  ;;  %8186 = vmatpush.bf16.msra.mxu3 %v7405_v5  ;;  %v6061_v32 = vor.u32 %v7141_v29, %v6060_v28  ;;  %v6065_v33 = vor.u32 %v7140_v30, %v6062_v31  ;;  %v6068_v34 = vld [vmem:[%s8457_s30 + $0x30] sm:$0xf]  ;;  %v7143_v35 = vld [vmem:[%s8457_s30 + $0x34] sm:$0xf0]  ;;  %v7142_v36 = vld [vmem:[%s8457_s30 + $0x34] sm:$0xf] }
  0x1f   : > { %v6070_v37 = vld [vmem:[%s8457_s30 + $0x38] sm:$0xf0]  ;;  %v6069_v38 = vor.u32 %v7143_v35, %v6068_v34  ;;  %v6076_v40 = vld [vmem:[%s8457_s30 + $0x40] sm:$0xf]  ;;  %v7145_v41 = vld [vmem:[%s8457_s30 + $0x44] sm:$0xf0] }
  0x20   : > { %v6073_v39 = vor.u32 %v7142_v36, %v6070_v37  ;;  %v7144_v42 = vld [vmem:[%s8457_s30 + $0x44] sm:$0xf]  ;;  %v6078_v43 = vld [vmem:[%s8457_s30 + $0x48] sm:$0xf0]  ;;  %v6077_v44 = vor.u32 %v7145_v41, %v6076_v40  ;;  %v6084_v46 = vld [vmem:[%s8457_s30 + $0x50] sm:$0xf] }
  0x21   : > { %2488 = vmatpush.bf16.msra.mxu0 %v7396_v6  ;;  %8179 = vmatpush.bf16.msra.mxu2 %v7396_v6  ;;  %v6081_v45 = vor.u32 %v7144_v42, %v6078_v43  ;;  %v7147_v47 = vld [vmem:[%s8457_s30 + $0x54] sm:$0xf0]  ;;  %v7146_v48 = vld [vmem:[%s8457_s30 + $0x54] sm:$0xf]  ;;  %v6086_v49 = vld [vmem:[%s8457_s30 + $0x58] sm:$0xf0] }
  0x22   : > { %3137 = vmatpush.bf16.msra.mxu1 %v7404_v7  ;;  %8187 = vmatpush.bf16.msra.mxu3 %v7404_v7  ;;  %v6085_v50 = vor.u32 %v7147_v47, %v6084_v46  ;;  %v6089_v51 = vor.u32 %v7146_v48, %v6086_v49  ;;  %v6092_v52 = vld [vmem:[%s8457_s30 + $0x60] sm:$0xf]  ;;  %v7149_v53 = vld [vmem:[%s8457_s30 + $0x64] sm:$0xf0]  ;;  %v7148_v54 = vld [vmem:[%s8457_s30 + $0x64] sm:$0xf] }
  0x23   : > { %v6094_v55 = vld [vmem:[%s8457_s30 + $0x68] sm:$0xf0]  ;;  %v6093_v56 = vor.u32 %v7149_v53, %v6092_v52  ;;  %v6100_v58 = vld [vmem:[%s8457_s30 + $0x70] sm:$0xf]  ;;  %v7151_v59 = vld [vmem:[%s8457_s30 + $0x74] sm:$0xf0] }
  0x24   : > { %v6097_v57 = vor.u32 %v7148_v54, %v6094_v55  ;;  %v7150_v60 = vld [vmem:[%s8457_s30 + $0x74] sm:$0xf]  ;;  %v6102_v61 = vld [vmem:[%s8457_s30 + $0x78] sm:$0xf0]  ;;  %v6101_v62 = vor.u32 %v7151_v59, %v6100_v58  ;;  %v6108_v0 = vld [vmem:[%s8457_s30 + $0x80] sm:$0xf] }
  0x25   : > { %2489 = vmatpush.bf16.msra.mxu0 %v7395_v8  ;;  %8180 = vmatpush.bf16.msra.mxu2 %v7395_v8  ;;  %v6105_v63 = vor.u32 %v7150_v60, %v6102_v61  ;;  %v7153_v1 = vld [vmem:[%s8457_s30 + $0x84] sm:$0xf0]  ;;  %v7152_v2 = vld [vmem:[%s8457_s30 + $0x84] sm:$0xf]  ;;  %v6110_v3 = vld [vmem:[%s8457_s30 + $0x88] sm:$0xf0] }
  0x26   : > { %3138 = vmatpush.bf16.msra.mxu1 %v7403_v9  ;;  %8188 = vmatpush.bf16.msra.mxu3 %v7403_v9  ;;  %v6109_v4 = vor.u32 %v7153_v1, %v6108_v0  ;;  %v6113_v5 = vor.u32 %v7152_v2, %v6110_v3  ;;  %v6116_v16 = vld [vmem:[%s8457_s30 + $0x90] sm:$0xf]  ;;  %v7155_v17 = vld [vmem:[%s8457_s30 + $0x94] sm:$0xf0]  ;;  %v7154_v18 = vld [vmem:[%s8457_s30 + $0x94] sm:$0xf] }
  0x27   : > { %v6118_v19 = vld [vmem:[%s8457_s30 + $0x98] sm:$0xf0]  ;;  %v6124_v35 = vld [vmem:[%s8457_s30 + $0xa0] sm:$0xf]  ;;  %v7157_v36 = vld [vmem:[%s8457_s30 + $0xa4] sm:$0xf0] }
  0x28   : > { %v6121_v22 = vor.u32 %v7154_v18, %v6118_v19  ;;  %v7156_v37 = vld [vmem:[%s8457_s30 + $0xa4] sm:$0xf]  ;;  %v6125_v40 = vor.u32 %v7157_v36, %v6124_v35  ;;  %v6132_v54 = vld [vmem:[%s8457_s30 + $0xb0] sm:$0xf]  ;;  %v7159_v55 = vld [vmem:[%s8457_s30 + $0xb4] sm:$0xf0] }
  0x29   : > { %2490 = vmatpush.bf16.msra.mxu0 %v7394_v10  ;;  %8181 = vmatpush.bf16.msra.mxu2 %v7394_v10  ;;  %v6133_v59 = vor.u32 %v7159_v55, %v6132_v54  ;;  %v7165_v54 = vld [vmem:[%s8457_s30 + $0xe4] sm:$0xf0]  ;;  %v7164_v55 = vld [vmem:[%s8457_s30 + $0xe4] sm:$0xf]  ;;  %s5847_s26 = scalar_lea.sflag [#allocation4], %s252_s8  ;;  %s8263_s29 = sshra.s32 %s5875_s24, 4  ;;  %s8264_s29 = int_to_ptr.hbm [resolvable:$true] %s8263_s29 }
  0x2a   : > { %3139 = vmatpush.bf16.msra.mxu1 %v7402_v11  ;;  %8189 = vmatpush.bf16.msra.mxu3 %v7402_v11  ;;  %s8269_s6 = scalar_lea.hbm %s9972_s2, 17408  ;;  %p8270_p1 = scmp.lt.s32.totalorder %s8264_s29, %s9972_s2 }
  0x2d   : > { %2491 = vmatpush.bf16.msra.mxu0 %v7393_v12  ;;  %8182 = vmatpush.bf16.msra.mxu2 %v7393_v12 }
  0x2e   : > { %3140 = vmatpush.bf16.msra.mxu1 %v7401_v13  ;;  %8190 = vmatpush.bf16.msra.mxu3 %v7401_v13 }
  0x31   : > { %2492 = vmatpush.bf16.msra.mxu0 %v7392_v14  ;;  %8183 = vmatpush.bf16.msra.mxu2 %v7392_v14 }
  0x32   : > { %3141 = vmatpush.bf16.msra.mxu1 %v7400_v15  ;;  %8191 = vmatpush.bf16.msra.mxu3 %v7400_v15 }
  0x34   : > { %2493 = vmatmul.bf16.vlgmr.msra.gmra.mxu0 %v6045_v20 }
  0x35   : > { %3142 = vmatmul.bf16.vlgmr.msra.gmra.mxu1 %v6049_v21  ;;  %v6117_v21 = vor.u32 %v7155_v17, %v6116_v16 }
  0x44   : > { %2498 = vmatmul.bf16.gmra.mxu0 %v6053_v26 }
  0x45   : > { %3147 = vmatmul.bf16.gmra.mxu1 %v6057_v27 }
  0x54   : > { %2503 = vmatmul.bf16.gmra.mxu0 %v6061_v32 }
  0x55   : > { %3152 = vmatmul.bf16.gmra.mxu1 %v6065_v33 }
  0x64   : > { %2508 = vmatmul.bf16.gmra.mxu0 %v6069_v38  ;;  %v6126_v38 = vld [vmem:[%s8457_s30 + $0xa8] sm:$0xf0] }
  0x65   : > { %3157 = vmatmul.bf16.gmra.mxu1 %v6073_v39  ;;  %v6129_v41 = vor.u32 %v7156_v37, %v6126_v38  ;;  %v6556_v38 = vld [vmem:[%s8457_s30 + $0x400] sm:$0xf] }
  0x74   : > { %2513 = vmatmul.bf16.gmra.mxu0 %v6077_v44 }
  0x75   : > { %3162 = vmatmul.bf16.gmra.mxu1 %v6081_v45 }
  0x84   : > { %2518 = vmatmul.bf16.gmra.mxu0 %v6085_v50 }
  0x85   : > { %3167 = vmatmul.bf16.gmra.mxu1 %v6089_v51 }
  0x94   : > { %2523 = vmatmul.bf16.gmra.mxu0 %v6093_v56  ;;  %v7158_v56 = vld [vmem:[%s8457_s30 + $0xb4] sm:$0xf] }
  0x95   : > { %3172 = vmatmul.bf16.gmra.mxu1 %v6097_v57  ;;  %v6134_v57 = vld [vmem:[%s8457_s30 + $0xb8] sm:$0xf0] }
  0x96   : > { %v6137_v60 = vor.u32 %v7158_v56, %v6134_v57  ;;  %v6158_v56 = vld [vmem:[%s8457_s30 + $0xe8] sm:$0xf0] }
  0xa4   : > { %2528 = vmatmul.bf16.gmra.mxu0 %v6101_v62 }
  0xa5   : > { %3177 = vmatmul.bf16.gmra.mxu1 %v6105_v63 }
  0xb1   : > { %v2494_v6 = vpop.f32.mrf.mxu0 }
  0xb2   : > { %v3143_v7 = vpop.f32.mrf.mxu1 }
  0xb3   : > { %v3144_v8 = vadd.f32 %v3143_v7, %v2494_v6 }
  0xb4   : > { %2533 = vmatmul.bf16.gmra.mxu0 %v6109_v4 }
  0xb5   : > { %3182 = vmatmul.bf16.gmra.mxu1 %v6113_v5  ;;  %v5328_v12 = vmul.f32 %v3144_v8, %v3144_v8 }
  0xb9   : > { %v2496_v9 = vpop.f32.mrf.mxu0 }
  0xba   : > { %v3145_v10 = vpop.f32.mrf.mxu1 }
  0xbb   : > { %v3146_v11 = vadd.f32 %v3145_v10, %v2496_v9  ;;  %v6140_v9 = vld [vmem:[%s8457_s30 + $0xc0] sm:$0xf]  ;;  %v7161_v10 = vld [vmem:[%s8457_s30 + $0xc4] sm:$0xf0] }
  0xbd   : > { %v7412_v13 = vpack.c.bf16 %v3146_v11, %v3144_v8  ;;  %v5066_v14 = vadd.f32 %v3146_v11, %v3144_v8  ;;  %v5329_v15 = vmul.f32 %v3146_v11, %v3146_v11  ;;  %v7160_v11 = vld [vmem:[%s8457_s30 + $0xc4] sm:$0xf] }
  0xbf   : > { %7413 = vst [vmem:[%s8508_s10] sm:$0xff] %v7412_v13   ;;  %v5584_v20 = vadd.f32 %v5329_v15, %v5328_v12  ;;  %v6142_v12 = vld [vmem:[%s8457_s30 + $0xc8] sm:$0xf0] }
  0xc0   : > { %v6145_v15 = vor.u32 %v7160_v11, %v6142_v12 }
  0xc1   : > { %v2499_v23 = vpop.f32.mrf.mxu0 }
  0xc2   : > { %v3148_v24 = vpop.f32.mrf.mxu1 }
  0xc3   : > { %v3149_v25 = vadd.f32 %v3148_v24, %v2499_v23 }
  0xc4   : > { %2538 = vmatmul.bf16.gmra.mxu0 %v6117_v21 }
  0xc5   : > { %v5067_v26 = vadd.f32 %v5066_v14, %v3149_v25  ;;  %v5330_v27 = vmul.f32 %v3149_v25, %v3149_v25  ;;  %3187 = vmatmul.bf16.gmra.mxu1 %v6121_v22  ;;  %v6141_v14 = vor.u32 %v7161_v10, %v6140_v9 }
  0xc7   : > { %v5585_v28 = vadd.f32 %v5584_v20, %v5330_v27 }
  0xc9   : > { %v2501_v29 = vpop.f32.mrf.mxu0 }
  0xca   : > { %v3150_v30 = vpop.f32.mrf.mxu1 }
  0xcb   : > { %v3151_v31 = vadd.f32 %v3150_v30, %v2501_v29  ;;  %v7163_v29 = vld [vmem:[%s8457_s30 + $0xd4] sm:$0xf0]  ;;  %v7162_v30 = vld [vmem:[%s8457_s30 + $0xd4] sm:$0xf] }
  0xcd   : > { %v7417_v32 = vpack.c.bf16 %v3151_v31, %v3149_v25  ;;  %v5068_v33 = vadd.f32 %v5067_v26, %v3151_v31  ;;  %v5331_v34 = vmul.f32 %v3151_v31, %v3151_v31  ;;  %v6150_v31 = vld [vmem:[%s8457_s30 + $0xd8] sm:$0xf0] }
  0xcf   : > { %8049 = vst [vmem:[%s8508_s10 + $0x8] sm:$0xff] %v7417_v32   ;;  %v5586_v39 = vadd.f32 %v5585_v28, %v5331_v34  ;;  %v6148_v28 = vld [vmem:[%s8457_s30 + $0xd0] sm:$0xf]  ;;  %v6153_v34 = vor.u32 %v7162_v30, %v6150_v31  ;;  %v6574_v30 = vld [vmem:[%s8457_s30 + $0x428] sm:$0xf0] }
  0xd1   : > { %v2504_v42 = vpop.f32.mrf.mxu0 }
  0xd2   : > { %v3153_v43 = vpop.f32.mrf.mxu1 }
  0xd3   : > { %v3154_v44 = vadd.f32 %v3153_v43, %v2504_v42 }
  0xd4   : > { %2543 = vmatmul.bf16.gmra.mxu0 %v6125_v40  ;;  %v7264_v40 = vld [vmem:[%s8457_s30 + $0x404] sm:$0xf] }
  0xd5   : > { %v5069_v45 = vadd.f32 %v5068_v33, %v3154_v44  ;;  %v5332_v46 = vmul.f32 %v3154_v44, %v3154_v44  ;;  %3192 = vmatmul.bf16.gmra.mxu1 %v6129_v41  ;;  %v6149_v33 = vor.u32 %v7163_v29, %v6148_v28 }
  0xd7   : > { %v5587_v47 = vadd.f32 %v5586_v39, %v5332_v46  ;;  %v7265_v39 = vld [vmem:[%s8457_s30 + $0x404] sm:$0xf0] }
  0xd8   : > { %v6557_v43 = vor.u32 %v7265_v39, %v6556_v38  ;;  %v6172_v39 = vld [vmem:[%s8457_s30 + $0x100] sm:$0xf] }
  0xd9   : > { %v2506_v48 = vpop.f32.mrf.mxu0 }
  0xda   : > { %v3155_v49 = vpop.f32.mrf.mxu1  ;;  %2813 = vmatmul.bf16.vlgmr.msra.gmra.mxu2 %v6557_v43 }
  0xdb   : > { %v3156_v50 = vadd.f32 %v3155_v49, %v2506_v48 }
  0xdd   : > { %v7422_v51 = vpack.c.bf16 %v3156_v50, %v3154_v44  ;;  %v5070_v52 = vadd.f32 %v5069_v45, %v3156_v50  ;;  %v5333_v53 = vmul.f32 %v3156_v50, %v3156_v50  ;;  %v6558_v44 = vld [vmem:[%s8457_s30 + $0x408] sm:$0xf0] }
  0xde   : > { %v6561_v45 = vor.u32 %v7264_v40, %v6558_v44  ;;  %v7169_v40 = vld [vmem:[%s8457_s30 + $0x104] sm:$0xf0] }
  0xdf   : > { %8050 = vst [vmem:[%s8508_s10 + $0x10] sm:$0xff] %v7422_v51   ;;  %v5588_v58 = vadd.f32 %v5587_v47, %v5333_v53  ;;  %v6156_v53 = vld [vmem:[%s8457_s30 + $0xe0] sm:$0xf]  ;;  %v6173_v44 = vor.u32 %v7169_v40, %v6172_v39 }
  0xe0   : > { %3462 = vmatmul.bf16.vlgmr.msra.gmra.mxu3 %v6561_v45 }
  0xe1   : > { %v2509_v61 = vpop.f32.mrf.mxu0 }
  0xe2   : > { %v3158_v62 = vpop.f32.mrf.mxu1 }
  0xe3   : > { %v3159_v63 = vadd.f32 %v3158_v62, %v2509_v61 }
  0xe4   : > { %2548 = vmatmul.bf16.gmra.mxu0 %v6133_v59  ;;  %v6161_v59 = vor.u32 %v7164_v55, %v6158_v56  ;;  %v6582_v55 = vld [vmem:[%s8457_s30 + $0x438] sm:$0xf0] }
  0xe5   : > { %v5071_v0 = vadd.f32 %v5070_v52, %v3159_v63  ;;  %v5334_v1 = vmul.f32 %v3159_v63, %v3159_v63  ;;  %3197 = vmatmul.bf16.gmra.mxu1 %v6137_v60 }
  0xe7   : > { %v5589_v2 = vadd.f32 %v5588_v58, %v5334_v1  ;;  %v6157_v58 = vor.u32 %v7165_v54, %v6156_v53  ;;  %v7266_v1 = vld [vmem:[%s8457_s30 + $0x414] sm:$0xf] }
  0xe9   : > { %v2511_v3 = vpop.f32.mrf.mxu0 }
  0xea   : > { %v3160_v4 = vpop.f32.mrf.mxu1 }
  0xeb   : > { %v3161_v5 = vadd.f32 %v3160_v4, %v2511_v3 }
  0xed   : > { %v7427_v6 = vpack.c.bf16 %v3161_v5, %v3159_v63  ;;  %v5072_v7 = vadd.f32 %v5071_v0, %v3161_v5  ;;  %v5335_v8 = vmul.f32 %v3161_v5, %v3161_v5  ;;  %v6564_v63 = vld [vmem:[%s8457_s30 + $0x410] sm:$0xf]  ;;  %v7267_v0 = vld [vmem:[%s8457_s30 + $0x414] sm:$0xf0]  ;;  %v6566_v5 = vld [vmem:[%s8457_s30 + $0x418] sm:$0xf0] }
  0xee   : > { %v6565_v4 = vor.u32 %v7267_v0, %v6564_v63  ;;  %v6180_v0 = vld [vmem:[%s8457_s30 + $0x110] sm:$0xf] }
  0xef   : > { %8051 = vst [vmem:[%s8508_s10 + $0x18] sm:$0xff] %v7427_v6   ;;  %v5590_v13 = vadd.f32 %v5589_v2, %v5335_v8  ;;  %v6569_v6 = vor.u32 %v7266_v1, %v6566_v5  ;;  %v7171_v1 = vld [vmem:[%s8457_s30 + $0x114] sm:$0xf0] }
  0xf0   : > { %2818 = vmatmul.bf16.gmra.mxu2 %v6565_v4  ;;  %v6181_v5 = vor.u32 %v7171_v1, %v6180_v0 }
  0xf1   : > { %v2514_v16 = vpop.f32.mrf.mxu0  ;;  %3467 = vmatmul.bf16.gmra.mxu3 %v6569_v6 }
  0xf2   : > { %v3163_v17 = vpop.f32.mrf.mxu1 }
  0xf3   : > { %v3164_v18 = vadd.f32 %v3163_v17, %v2514_v16  ;;  %v7166_v16 = vld [vmem:[%s8457_s30 + $0xf4] sm:$0xf]  ;;  %v6166_v17 = vld [vmem:[%s8457_s30 + $0xf8] sm:$0xf0] }
  0xf4   : > { %2553 = vmatmul.bf16.gmra.mxu0 %v6141_v14  ;;  %v6164_v14 = vld [vmem:[%s8457_s30 + $0xf0] sm:$0xf] }
  0xf5   : > { %v5073_v19 = vadd.f32 %v5072_v7, %v3164_v18  ;;  %v5336_v20 = vmul.f32 %v3164_v18, %v3164_v18  ;;  %3202 = vmatmul.bf16.gmra.mxu1 %v6145_v15  ;;  %v7167_v15 = vld [vmem:[%s8457_s30 + $0xf4] sm:$0xf0] }
  0xf7   : > { %v5591_v21 = vadd.f32 %v5590_v13, %v5336_v20  ;;  %v6169_v20 = vor.u32 %v7166_v16, %v6166_v17  ;;  %v6590_v16 = vld [vmem:[%s8457_s30 + $0x448] sm:$0xf0] }
  0xf9   : > { %v2516_v22 = vpop.f32.mrf.mxu0 }
  0xfa   : > { %v3165_v23 = vpop.f32.mrf.mxu1 }
  0xfb   : > { %v3166_v24 = vadd.f32 %v3165_v23, %v2516_v22 }
  0xfd   : > { %v7432_v25 = vpack.c.bf16 %v3166_v24, %v3164_v18  ;;  %v5074_v26 = vadd.f32 %v5073_v19, %v3166_v24  ;;  %v5337_v27 = vmul.f32 %v3166_v24, %v3166_v24  ;;  %v6165_v19 = vor.u32 %v7167_v15, %v6164_v14  ;;  %v6572_v24 = vld [vmem:[%s8457_s30 + $0x420] sm:$0xf] }
  0xff   : > { %8052 = vst [vmem:[%s8508_s10 + $0x20] sm:$0xff] %v7432_v25   ;;  %v5592_v32 = vadd.f32 %v5591_v21, %v5337_v27  ;;  %v7269_v25 = vld [vmem:[%s8457_s30 + $0x424] sm:$0xf0] }
 0x100   : > { %v6573_v29 = vor.u32 %v7269_v25, %v6572_v24  ;;  %v6188_v25 = vld [vmem:[%s8457_s30 + $0x120] sm:$0xf] }
 0x101   : > { %v2519_v35 = vpop.f32.mrf.mxu0 }
 0x102   : > { %v3168_v36 = vpop.f32.mrf.mxu1  ;;  %2823 = vmatmul.bf16.gmra.mxu2 %v6573_v29 }
 0x103   : > { %v3169_v37 = vadd.f32 %v3168_v36, %v2519_v35 }
 0x104   : > { %2558 = vmatmul.bf16.gmra.mxu0 %v6149_v33 }
 0x105   : > { %v5075_v41 = vadd.f32 %v5074_v26, %v3169_v37  ;;  %v5338_v42 = vmul.f32 %v3169_v37, %v3169_v37  ;;  %3207 = vmatmul.bf16.gmra.mxu1 %v6153_v34  ;;  %v7268_v26 = vld [vmem:[%s8457_s30 + $0x424] sm:$0xf] }
 0x106   : > { %v6577_v31 = vor.u32 %v7268_v26, %v6574_v30  ;;  %v7173_v26 = vld [vmem:[%s8457_s30 + $0x124] sm:$0xf0] }
 0x107   : > { %v5593_v46 = vadd.f32 %v5592_v32, %v5338_v42  ;;  %v6174_v42 = vld [vmem:[%s8457_s30 + $0x108] sm:$0xf0]  ;;  %v6189_v30 = vor.u32 %v7173_v26, %v6188_v25 }
 0x108   : > { %3472 = vmatmul.bf16.gmra.mxu3 %v6577_v31 }
 0x109   : > { %v2521_v47 = vpop.f32.mrf.mxu0 }
 0x10a   : > { %v3170_v48 = vpop.f32.mrf.mxu1 }
 0x10b   : > { %v3171_v49 = vadd.f32 %v3170_v48, %v2521_v47 }
 0x10d   : > { %v7437_v50 = vpack.c.bf16 %v3171_v49, %v3169_v37  ;;  %v5076_v51 = vadd.f32 %v5075_v41, %v3171_v49  ;;  %v5339_v52 = vmul.f32 %v3171_v49, %v3171_v49  ;;  %v7168_v41 = vld [vmem:[%s8457_s30 + $0x104] sm:$0xf]  ;;  %v6580_v49 = vld [vmem:[%s8457_s30 + $0x430] sm:$0xf] }
 0x10e   : > { %v6177_v45 = vor.u32 %v7168_v41, %v6174_v42  ;;  %v6598_v41 = vld [vmem:[%s8457_s30 + $0x458] sm:$0xf0] }
 0x10f   : > { %8053 = vst [vmem:[%s8508_s10 + $0x28] sm:$0xff] %v7437_v50   ;;  %v5594_v57 = vadd.f32 %v5593_v46, %v5339_v52  ;;  %v7271_v50 = vld [vmem:[%s8457_s30 + $0x434] sm:$0xf0] }
 0x110   : > { %v6581_v54 = vor.u32 %v7271_v50, %v6580_v49  ;;  %v6196_v50 = vld [vmem:[%s8457_s30 + $0x130] sm:$0xf] }
 0x111   : > { %v2524_v60 = vpop.f32.mrf.mxu0 }
 0x112   : > { %v3173_v61 = vpop.f32.mrf.mxu1  ;;  %2828 = vmatmul.bf16.gmra.mxu2 %v6581_v54 }
 0x113   : > { %v3174_v62 = vadd.f32 %v3173_v61, %v2524_v60 }
 0x114   : > { %2563 = vmatmul.bf16.gmra.mxu0 %v6157_v58 }
 0x115   : > { %v5077_v2 = vadd.f32 %v5076_v51, %v3174_v62  ;;  %v5340_v3 = vmul.f32 %v3174_v62, %v3174_v62  ;;  %3212 = vmatmul.bf16.gmra.mxu1 %v6161_v59  ;;  %v7270_v51 = vld [vmem:[%s8457_s30 + $0x434] sm:$0xf] }
 0x116   : > { %v6585_v56 = vor.u32 %v7270_v51, %v6582_v55  ;;  %v7175_v51 = vld [vmem:[%s8457_s30 + $0x134] sm:$0xf0] }
 0x117   : > { %v5595_v7 = vadd.f32 %v5594_v57, %v5340_v3  ;;  %v6182_v3 = vld [vmem:[%s8457_s30 + $0x118] sm:$0xf0]  ;;  %v6197_v55 = vor.u32 %v7175_v51, %v6196_v50 }
 0x118   : > { %3477 = vmatmul.bf16.gmra.mxu3 %v6585_v56 }
 0x119   : > { %v2526_v8 = vpop.f32.mrf.mxu0 }
 0x11a   : > { %v3175_v9 = vpop.f32.mrf.mxu1 }
 0x11b   : > { %v3176_v10 = vadd.f32 %v3175_v9, %v2526_v8 }
 0x11d   : > { %v7442_v11 = vpack.c.bf16 %v3176_v10, %v3174_v62  ;;  %v5078_v12 = vadd.f32 %v5077_v2, %v3176_v10  ;;  %v5341_v13 = vmul.f32 %v3176_v10, %v3176_v10  ;;  %v7170_v2 = vld [vmem:[%s8457_s30 + $0x114] sm:$0xf]  ;;  %v6588_v10 = vld [vmem:[%s8457_s30 + $0x440] sm:$0xf] }
 0x11e   : > { %v6185_v6 = vor.u32 %v7170_v2, %v6182_v3  ;;  %v6606_v2 = vld [vmem:[%s8457_s30 + $0x468] sm:$0xf0] }
 0x11f   : > { %8054 = vst [vmem:[%s8508_s10 + $0x30] sm:$0xff] %v7442_v11   ;;  %v5596_v18 = vadd.f32 %v5595_v7, %v5341_v13  ;;  %v7273_v11 = vld [vmem:[%s8457_s30 + $0x444] sm:$0xf0] }
 0x120   : > { %v6589_v15 = vor.u32 %v7273_v11, %v6588_v10  ;;  %v6204_v11 = vld [vmem:[%s8457_s30 + $0x140] sm:$0xf] }
 0x121   : > { %v2529_v21 = vpop.f32.mrf.mxu0 }
 0x122   : > { %v3178_v22 = vpop.f32.mrf.mxu1  ;;  %2833 = vmatmul.bf16.gmra.mxu2 %v6589_v15 }
 0x123   : > { %v3179_v23 = vadd.f32 %v3178_v22, %v2529_v21 }
 0x124   : > { %2568 = vmatmul.bf16.gmra.mxu0 %v6165_v19 }
 0x125   : > { %v5079_v27 = vadd.f32 %v5078_v12, %v3179_v23  ;;  %v5342_v28 = vmul.f32 %v3179_v23, %v3179_v23  ;;  %3217 = vmatmul.bf16.gmra.mxu1 %v6169_v20  ;;  %v7272_v12 = vld [vmem:[%s8457_s30 + $0x444] sm:$0xf] }
 0x126   : > { %v6593_v17 = vor.u32 %v7272_v12, %v6590_v16  ;;  %v7177_v12 = vld [vmem:[%s8457_s30 + $0x144] sm:$0xf0] }
 0x127   : > { %v5597_v32 = vadd.f32 %v5596_v18, %v5342_v28  ;;  %v6190_v28 = vld [vmem:[%s8457_s30 + $0x128] sm:$0xf0]  ;;  %v6205_v16 = vor.u32 %v7177_v12, %v6204_v11 }
 0x128   : > { %3482 = vmatmul.bf16.gmra.mxu3 %v6593_v17 }
 0x129   : > { %v2531_v33 = vpop.f32.mrf.mxu0 }
 0x12a   : > { %v3180_v34 = vpop.f32.mrf.mxu1 }
 0x12b   : > { %v3181_v35 = vadd.f32 %v3180_v34, %v2531_v33 }
 0x12d   : > { %v7447_v36 = vpack.c.bf16 %v3181_v35, %v3179_v23  ;;  %v5080_v37 = vadd.f32 %v5079_v27, %v3181_v35  ;;  %v5343_v38 = vmul.f32 %v3181_v35, %v3181_v35  ;;  %v7172_v27 = vld [vmem:[%s8457_s30 + $0x124] sm:$0xf]  ;;  %v6596_v35 = vld [vmem:[%s8457_s30 + $0x450] sm:$0xf] }
 0x12e   : > { %v6193_v31 = vor.u32 %v7172_v27, %v6190_v28  ;;  %v6614_v27 = vld [vmem:[%s8457_s30 + $0x478] sm:$0xf0] }
 0x12f   : > { %8055 = vst [vmem:[%s8508_s10 + $0x38] sm:$0xff] %v7447_v36   ;;  %v5598_v43 = vadd.f32 %v5597_v32, %v5343_v38  ;;  %v7275_v36 = vld [vmem:[%s8457_s30 + $0x454] sm:$0xf0] }
 0x130   : > { %v6597_v40 = vor.u32 %v7275_v36, %v6596_v35  ;;  %v6212_v36 = vld [vmem:[%s8457_s30 + $0x150] sm:$0xf] }
 0x131   : > { %v2534_v46 = vpop.f32.mrf.mxu0 }
 0x132   : > { %v3183_v47 = vpop.f32.mrf.mxu1  ;;  %2838 = vmatmul.bf16.gmra.mxu2 %v6597_v40 }
 0x133   : > { %v3184_v48 = vadd.f32 %v3183_v47, %v2534_v46 }
 0x134   : > { %2573 = vmatmul.bf16.gmra.mxu0 %v6173_v44 }
 0x135   : > { %v5081_v52 = vadd.f32 %v5080_v37, %v3184_v48  ;;  %v5344_v53 = vmul.f32 %v3184_v48, %v3184_v48  ;;  %3222 = vmatmul.bf16.gmra.mxu1 %v6177_v45  ;;  %v7274_v37 = vld [vmem:[%s8457_s30 + $0x454] sm:$0xf] }
 0x136   : > { %v6601_v42 = vor.u32 %v7274_v37, %v6598_v41  ;;  %v7179_v37 = vld [vmem:[%s8457_s30 + $0x154] sm:$0xf0] }
 0x137   : > { %v5599_v57 = vadd.f32 %v5598_v43, %v5344_v53  ;;  %v6198_v53 = vld [vmem:[%s8457_s30 + $0x138] sm:$0xf0]  ;;  %v6213_v41 = vor.u32 %v7179_v37, %v6212_v36 }
 0x138   : > { %3487 = vmatmul.bf16.gmra.mxu3 %v6601_v42 }
 0x139   : > { %v2536_v58 = vpop.f32.mrf.mxu0 }
 0x13a   : > { %v3185_v59 = vpop.f32.mrf.mxu1 }
 0x13b   : > { %v3186_v60 = vadd.f32 %v3185_v59, %v2536_v58 }
 0x13d   : > { %v7452_v61 = vpack.c.bf16 %v3186_v60, %v3184_v48  ;;  %v5082_v62 = vadd.f32 %v5081_v52, %v3186_v60  ;;  %v5345_v63 = vmul.f32 %v3186_v60, %v3186_v60  ;;  %v7174_v52 = vld [vmem:[%s8457_s30 + $0x134] sm:$0xf]  ;;  %v6604_v60 = vld [vmem:[%s8457_s30 + $0x460] sm:$0xf] }
 0x13e   : > { %v6201_v56 = vor.u32 %v7174_v52, %v6198_v53  ;;  %v6622_v52 = vld [vmem:[%s8457_s30 + $0x488] sm:$0xf0] }
 0x13f   : > { %8056 = vst [vmem:[%s8508_s10 + $0x40] sm:$0xff] %v7452_v61   ;;  %v5600_v4 = vadd.f32 %v5599_v57, %v5345_v63  ;;  %v7277_v61 = vld [vmem:[%s8457_s30 + $0x464] sm:$0xf0] }
 0x140   : > { %v6605_v1 = vor.u32 %v7277_v61, %v6604_v60 }
 0x141   : > { %v2539_v7 = vpop.f32.mrf.mxu0 }
 0x142   : > { %v3188_v8 = vpop.f32.mrf.mxu1  ;;  %2843 = vmatmul.bf16.gmra.mxu2 %v6605_v1  ;;  %v7180_v1 = vld [vmem:[%s8457_s30 + $0x164] sm:$0xf] }
 0x143   : > { %v3189_v9 = vadd.f32 %v3188_v8, %v2539_v7 }
 0x144   : > { %2578 = vmatmul.bf16.gmra.mxu0 %v6181_v5 }
 0x145   : > { %v5083_v13 = vadd.f32 %v5082_v62, %v3189_v9  ;;  %v5346_v14 = vmul.f32 %v3189_v9, %v3189_v9  ;;  %3227 = vmatmul.bf16.gmra.mxu1 %v6185_v6  ;;  %v7276_v62 = vld [vmem:[%s8457_s30 + $0x464] sm:$0xf] }
 0x146   : > { %v6609_v3 = vor.u32 %v7276_v62, %v6606_v2  ;;  %v6222_v2 = vld [vmem:[%s8457_s30 + $0x168] sm:$0xf0] }
 0x147   : > { %v5601_v18 = vadd.f32 %v5600_v4, %v5346_v14  ;;  %v6206_v14 = vld [vmem:[%s8457_s30 + $0x148] sm:$0xf0] }
 0x148   : > { %3492 = vmatmul.bf16.gmra.mxu3 %v6609_v3 }
 0x149   : > { %v2541_v19 = vpop.f32.mrf.mxu0 }
 0x14a   : > { %v3190_v20 = vpop.f32.mrf.mxu1 }
 0x14b   : > { %v3191_v21 = vadd.f32 %v3190_v20, %v2541_v19 }
 0x14d   : > { %v7457_v22 = vpack.c.bf16 %v3191_v21, %v3189_v9  ;;  %v5084_v23 = vadd.f32 %v5083_v13, %v3191_v21  ;;  %v5347_v24 = vmul.f32 %v3191_v21, %v3191_v21  ;;  %v7176_v13 = vld [vmem:[%s8457_s30 + $0x144] sm:$0xf]  ;;  %v6612_v21 = vld [vmem:[%s8457_s30 + $0x470] sm:$0xf] }
 0x14e   : > { %v6209_v17 = vor.u32 %v7176_v13, %v6206_v14  ;;  %v6628_v13 = vld [vmem:[%s8457_s30 + $0x490] sm:$0xf]  ;;  %v7283_v14 = vld [vmem:[%s8457_s30 + $0x494] sm:$0xf0] }
 0x14f   : > { %8057 = vst [vmem:[%s8508_s10 + $0x48] sm:$0xff] %v7457_v22   ;;  %v5602_v29 = vadd.f32 %v5601_v18, %v5347_v24  ;;  %v7279_v22 = vld [vmem:[%s8457_s30 + $0x474] sm:$0xf0] }
 0x150   : > { %v6613_v26 = vor.u32 %v7279_v22, %v6612_v21 }
 0x151   : > { %v2544_v32 = vpop.f32.mrf.mxu0 }
 0x152   : > { %v3193_v33 = vpop.f32.mrf.mxu1  ;;  %2848 = vmatmul.bf16.gmra.mxu2 %v6613_v26 }
 0x153   : > { %v3194_v34 = vadd.f32 %v3193_v33, %v2544_v32 }
 0x154   : > { %2583 = vmatmul.bf16.gmra.mxu0 %v6189_v30 }
 0x155   : > { %v5085_v38 = vadd.f32 %v5084_v23, %v3194_v34  ;;  %v5348_v39 = vmul.f32 %v3194_v34, %v3194_v34  ;;  %3232 = vmatmul.bf16.gmra.mxu1 %v6193_v31  ;;  %v7278_v23 = vld [vmem:[%s8457_s30 + $0x474] sm:$0xf] }
 0x156   : > { %v6617_v28 = vor.u32 %v7278_v23, %v6614_v27 }
 0x157   : > { %v5603_v43 = vadd.f32 %v5602_v29, %v5348_v39  ;;  %v6214_v39 = vld [vmem:[%s8457_s30 + $0x158] sm:$0xf0] }
 0x158   : > { %3497 = vmatmul.bf16.gmra.mxu3 %v6617_v28 }
 0x159   : > { %v2546_v44 = vpop.f32.mrf.mxu0 }
 0x15a   : > { %v3195_v45 = vpop.f32.mrf.mxu1 }
 0x15b   : > { %v3196_v46 = vadd.f32 %v3195_v45, %v2546_v44 }
 0x15d   : > { %v7462_v47 = vpack.c.bf16 %v3196_v46, %v3194_v34  ;;  %v5086_v48 = vadd.f32 %v5085_v38, %v3196_v46  ;;  %v5349_v49 = vmul.f32 %v3196_v46, %v3196_v46  ;;  %v7178_v38 = vld [vmem:[%s8457_s30 + $0x154] sm:$0xf]  ;;  %v6620_v46 = vld [vmem:[%s8457_s30 + $0x480] sm:$0xf] }
 0x15e   : > { %v6217_v42 = vor.u32 %v7178_v38, %v6214_v39 }
 0x15f   : > { %8058 = vst [vmem:[%s8508_s10 + $0x50] sm:$0xff] %v7462_v47   ;;  %v5604_v54 = vadd.f32 %v5603_v43, %v5349_v49  ;;  %v7281_v47 = vld [vmem:[%s8457_s30 + $0x484] sm:$0xf0] }
 0x160   : > { %v6621_v51 = vor.u32 %v7281_v47, %v6620_v46  ;;  %v7285_v46 = vld [vmem:[%s8457_s30 + $0x4a4] sm:$0xf0]  ;;  %v7284_v47 = vld [vmem:[%s8457_s30 + $0x4a4] sm:$0xf] }
 0x161   : > { %v2549_v57 = vpop.f32.mrf.mxu0 }
 0x162   : > { %v3198_v58 = vpop.f32.mrf.mxu1  ;;  %2853 = vmatmul.bf16.gmra.mxu2 %v6621_v51  ;;  %v6638_v51 = vld [vmem:[%s8457_s30 + $0x4a8] sm:$0xf0] }
 0x163   : > { %v3199_v59 = vadd.f32 %v3198_v58, %v2549_v57  ;;  %v2814_v58 = vpop.f32.mrf.mxu2 }
 0x164   : > { %2588 = vmatmul.bf16.gmra.mxu0 %v6197_v55 }
 0x165   : > { %v5087_v63 = vadd.f32 %v5086_v48, %v3199_v59  ;;  %v5350_v0 = vmul.f32 %v3199_v59, %v3199_v59  ;;  %3237 = vmatmul.bf16.gmra.mxu1 %v6201_v56  ;;  %v7280_v48 = vld [vmem:[%s8457_s30 + $0x484] sm:$0xf] }
 0x166   : > { %v6625_v53 = vor.u32 %v7280_v48, %v6622_v52 }
 0x167   : > { %v5605_v4 = vadd.f32 %v5604_v54, %v5350_v0  ;;  %v7181_v0 = vld [vmem:[%s8457_s30 + $0x164] sm:$0xf0] }
 0x168   : > { %3502 = vmatmul.bf16.gmra.mxu3 %v6625_v53  ;;  %v6641_v53 = vor.u32 %v7284_v47, %v6638_v51  ;;  %v7288_v51 = vld [vmem:[%s8457_s30 + $0x4c4] sm:$0xf] }
 0x169   : > { %v2551_v5 = vpop.f32.mrf.mxu0 }
 0x16a   : > { %v3200_v6 = vpop.f32.mrf.mxu1 }
 0x16b   : > { %v3201_v7 = vadd.f32 %v3200_v6, %v2551_v5  ;;  %v6225_v5 = vor.u32 %v7180_v1, %v6222_v2  ;;  %v7184_v1 = vld [vmem:[%s8457_s30 + $0x184] sm:$0xf]  ;;  %v6238_v2 = vld [vmem:[%s8457_s30 + $0x188] sm:$0xf0] }
 0x16d   : > { %v7467_v8 = vpack.c.bf16 %v3201_v7, %v3199_v59  ;;  %v5088_v9 = vadd.f32 %v5087_v63, %v3201_v7  ;;  %v5351_v10 = vmul.f32 %v3201_v7, %v3201_v7  ;;  %v3463_v59 = vpop.f32.mrf.mxu3  ;;  %v6220_v63 = vld [vmem:[%s8457_s30 + $0x160] sm:$0xf] }
 0x16f   : > { %8059 = vst [vmem:[%s8508_s10 + $0x58] sm:$0xff] %v7467_v8   ;;  %v5606_v15 = vadd.f32 %v5605_v4, %v5351_v10  ;;  %v6221_v4 = vor.u32 %v7181_v0, %v6220_v63  ;;  %v8612_v8 = vadd.f32 %v3463_v59, %v2814_v58  ;;  %v2816_v10 = vpop.f32.mrf.mxu2  ;;  %v6236_v63 = vld [vmem:[%s8457_s30 + $0x180] sm:$0xf]  ;;  %v7185_v0 = vld [vmem:[%s8457_s30 + $0x184] sm:$0xf0] }
 0x171   : > { %v2554_v18 = vpop.f32.mrf.mxu0 }
 0x172   : > { %v3203_v19 = vpop.f32.mrf.mxu1 }
 0x173   : > { %v3204_v20 = vadd.f32 %v3203_v19, %v2554_v18  ;;  %v6629_v18 = vor.u32 %v7283_v14, %v6628_v13  ;;  %v6630_v19 = vld [vmem:[%s8457_s30 + $0x498] sm:$0xf0] }
 0x174   : > { %2593 = vmatmul.bf16.gmra.mxu0 %v6205_v16 }
 0x175   : > { %v5089_v24 = vadd.f32 %v5088_v9, %v3204_v20  ;;  %v5352_v25 = vmul.f32 %v3204_v20, %v3204_v20  ;;  %3242 = vmatmul.bf16.gmra.mxu1 %v6209_v17  ;;  %v3465_v11 = vpop.f32.mrf.mxu3  ;;  %2858 = vmatmul.bf16.gmra.mxu2 %v6629_v18 }
 0x176   : > { %v8614_v12 = vadd.f32 %v3465_v11, %v2816_v10 }
 0x177   : > { %v5607_v29 = vadd.f32 %v5606_v15, %v5352_v25  ;;  %v7282_v15 = vld [vmem:[%s8457_s30 + $0x494] sm:$0xf]  ;;  %v2819_v26 = vpop.f32.mrf.mxu2 }
 0x178   : > { %v6633_v21 = vor.u32 %v7282_v15, %v6630_v19  ;;  %v6644_v15 = vld [vmem:[%s8457_s30 + $0x4b0] sm:$0xf] }
 0x179   : > { %v2556_v30 = vpop.f32.mrf.mxu0 }
 0x17a   : > { %v3205_v31 = vpop.f32.mrf.mxu1  ;;  %3507 = vmatmul.bf16.gmra.mxu3 %v6633_v21  ;;  %v6646_v21 = vld [vmem:[%s8457_s30 + $0x4b8] sm:$0xf0] }
 0x17b   : > { %v3206_v32 = vadd.f32 %v3205_v31, %v2556_v30  ;;  %v6228_v31 = vld [vmem:[%s8457_s30 + $0x170] sm:$0xf] }
 0x17d   : > { %v7472_v33 = vpack.c.bf16 %v3206_v32, %v3204_v20  ;;  %v5090_v34 = vadd.f32 %v5089_v24, %v3206_v32  ;;  %v5353_v35 = vmul.f32 %v3206_v32, %v3206_v32  ;;  %v7732_v20 = vpack.c.bf16 %v8614_v12, %v8612_v8  ;;  %v3468_v27 = vpop.f32.mrf.mxu3  ;;  %v7183_v32 = vld [vmem:[%s8457_s30 + $0x174] sm:$0xf0] }
 0x17e   : > { %v6229_v36 = vor.u32 %v7183_v32, %v6228_v31 }
 0x17f   : > { %8060 = vst [vmem:[%s8508_s10 + $0x60] sm:$0xff] %v7472_v33   ;;  %v5608_v40 = vadd.f32 %v5607_v29, %v5353_v35  ;;  %v7182_v33 = vld [vmem:[%s8457_s30 + $0x174] sm:$0xf] }
 0x180   : > { %8112 = vst [vmem:[%s8508_s10 + $0x200] sm:$0xff] %v7732_v20  }
 0x181   : > { %v2559_v43 = vpop.f32.mrf.mxu0 }
 0x182   : > { %v3208_v44 = vpop.f32.mrf.mxu1 }
 0x183   : > { %v3209_v45 = vadd.f32 %v3208_v44, %v2559_v43 }
 0x184   : > { %2598 = vmatmul.bf16.gmra.mxu0 %v6213_v41 }
 0x185   : > { %v5091_v49 = vadd.f32 %v5090_v34, %v3209_v45  ;;  %v5354_v50 = vmul.f32 %v3209_v45, %v3209_v45  ;;  %3247 = vmatmul.bf16.gmra.mxu1 %v6217_v42  ;;  %v6230_v34 = vld [vmem:[%s8457_s30 + $0x178] sm:$0xf0]  ;;  %v2821_v42 = vpop.f32.mrf.mxu2  ;;  %v3470_v43 = vpop.f32.mrf.mxu3 }
 0x186   : > { %v6233_v37 = vor.u32 %v7182_v33, %v6230_v34  ;;  %v8630_v44 = vadd.f32 %v3470_v43, %v2821_v42  ;;  %v6244_v33 = vld [vmem:[%s8457_s30 + $0x190] sm:$0xf]  ;;  %v7187_v34 = vld [vmem:[%s8457_s30 + $0x194] sm:$0xf0] }
 0x187   : > { %v5609_v54 = vadd.f32 %v5608_v40, %v5354_v50  ;;  %v8628_v40 = vadd.f32 %v3468_v27, %v2819_v26 }
 0x189   : > { %v2561_v55 = vpop.f32.mrf.mxu0  ;;  %v7737_v52 = vpack.c.bf16 %v8630_v44, %v8628_v40 }
 0x18a   : > { %v3210_v56 = vpop.f32.mrf.mxu1  ;;  %3512 = vmatmul.bf16.gmra.mxu3 %v6641_v53 }
 0x18b   : > { %v3211_v57 = vadd.f32 %v3210_v56, %v2561_v55  ;;  %8113 = vst [vmem:[%s8508_s10 + $0x208] sm:$0xff] %v7737_v52  }
 0x18d   : > { %v7477_v60 = vpack.c.bf16 %v3211_v57, %v3209_v45  ;;  %v5092_v61 = vadd.f32 %v5091_v49, %v3211_v57  ;;  %v5355_v62 = vmul.f32 %v3211_v57, %v3211_v57  ;;  %v6636_v45 = vld [vmem:[%s8457_s30 + $0x4a0] sm:$0xf]  ;;  %v2824_v58 = vpop.f32.mrf.mxu2  ;;  %v3473_v59 = vpop.f32.mrf.mxu3 }
 0x18e   : > { %v6637_v50 = vor.u32 %v7285_v46, %v6636_v45 }
 0x18f   : > { %8061 = vst [vmem:[%s8508_s10 + $0x68] sm:$0xff] %v7477_v60   ;;  %v5610_v3 = vadd.f32 %v5609_v54, %v5355_v62 }
 0x190   : > { %2863 = vmatmul.bf16.gmra.mxu2 %v6637_v50  ;;  %v7289_v50 = vld [vmem:[%s8457_s30 + $0x4c4] sm:$0xf0] }
 0x191   : > { %v2564_v6 = vpop.f32.mrf.mxu0 }
 0x192   : > { %v3213_v7 = vpop.f32.mrf.mxu1 }
 0x193   : > { %v3214_v9 = vadd.f32 %v3213_v7, %v2564_v6 }
 0x194   : > { %2603 = vmatmul.bf16.gmra.mxu0 %v6221_v4  ;;  %v6237_v4 = vor.u32 %v7185_v0, %v6236_v63 }
 0x195   : > { %v5093_v16 = vadd.f32 %v5092_v61, %v3214_v9  ;;  %v5356_v17 = vmul.f32 %v3214_v9, %v3214_v9  ;;  %3252 = vmatmul.bf16.gmra.mxu1 %v6225_v5  ;;  %v6241_v5 = vor.u32 %v7184_v1, %v6238_v2  ;;  %v2826_v11 = vpop.f32.mrf.mxu2  ;;  %v3475_v13 = vpop.f32.mrf.mxu3 }
 0x196   : > { %v8646_v14 = vadd.f32 %v3475_v13, %v2826_v11 }
 0x197   : > { %v5611_v22 = vadd.f32 %v5610_v3, %v5356_v17  ;;  %v7286_v17 = vld [vmem:[%s8457_s30 + $0x4b4] sm:$0xf] }
 0x199   : > { %v2566_v23 = vpop.f32.mrf.mxu0 }
 0x19a   : > { %v3215_v24 = vpop.f32.mrf.mxu1 }
 0x19b   : > { %v3216_v25 = vadd.f32 %v3215_v24, %v2566_v23  ;;  %v6649_v23 = vor.u32 %v7286_v17, %v6646_v21  ;;  %v6660_v21 = vld [vmem:[%s8457_s30 + $0x4d0] sm:$0xf] }
 0x19d   : > { %v7482_v28 = vpack.c.bf16 %v3216_v25, %v3214_v9  ;;  %v5094_v29 = vadd.f32 %v5093_v16, %v3216_v25  ;;  %v5357_v30 = vmul.f32 %v3216_v25, %v3216_v25  ;;  %v8644_v9 = vadd.f32 %v3473_v59, %v2824_v58  ;;  %v7287_v16 = vld [vmem:[%s8457_s30 + $0x4b4] sm:$0xf0]  ;;  %3517 = vmatmul.bf16.gmra.mxu3 %v6649_v23  ;;  %v7290_v23 = vld [vmem:[%s8457_s30 + $0x4d4] sm:$0xf] }
 0x19e   : > { %v6645_v20 = vor.u32 %v7287_v16, %v6644_v15 }
 0x19f   : > { %8062 = vst [vmem:[%s8508_s10 + $0x70] sm:$0xff] %v7482_v28   ;;  %v5612_v35 = vadd.f32 %v5611_v22, %v5357_v30  ;;  %v7742_v22 = vpack.c.bf16 %v8646_v14, %v8644_v9  ;;  %v2829_v28 = vpop.f32.mrf.mxu2 }
 0x1a0   : > { %2868 = vmatmul.bf16.gmra.mxu2 %v6645_v20 }
 0x1a1   : > { %v2569_v38 = vpop.f32.mrf.mxu0  ;;  %8114 = vst [vmem:[%s8508_s10 + $0x210] sm:$0xff] %v7742_v22   ;;  %v7291_v22 = vld [vmem:[%s8457_s30 + $0x4d4] sm:$0xf0] }
 0x1a2   : > { %v3218_v39 = vpop.f32.mrf.mxu1 }
 0x1a3   : > { %v3219_v41 = vadd.f32 %v3218_v39, %v2569_v38  ;;  %v6245_v38 = vor.u32 %v7187_v34, %v6244_v33 }
 0x1a4   : > { %2608 = vmatmul.bf16.gmra.mxu0 %v6229_v36  ;;  %v6246_v36 = vld [vmem:[%s8457_s30 + $0x198] sm:$0xf0] }
 0x1a5   : > { %v5095_v48 = vadd.f32 %v5094_v29, %v3219_v41  ;;  %v5358_v49 = vmul.f32 %v3219_v41, %v3219_v41  ;;  %3257 = vmatmul.bf16.gmra.mxu1 %v6233_v37  ;;  %v3478_v29 = vpop.f32.mrf.mxu3 }
 0x1a6   : > { %v8660_v43 = vadd.f32 %v3478_v29, %v2829_v28 }
 0x1a7   : > { %v5613_v54 = vadd.f32 %v5612_v35, %v5358_v49  ;;  %v7186_v35 = vld [vmem:[%s8457_s30 + $0x194] sm:$0xf]  ;;  %v2831_v46 = vpop.f32.mrf.mxu2  ;;  %v6652_v49 = vld [vmem:[%s8457_s30 + $0x4c0] sm:$0xf] }
 0x1a8   : > { %v6249_v39 = vor.u32 %v7186_v35, %v6246_v36 }
 0x1a9   : > { %v2571_v55 = vpop.f32.mrf.mxu0 }
 0x1aa   : > { %v3220_v56 = vpop.f32.mrf.mxu1 }
 0x1ab   : > { %v3221_v57 = vadd.f32 %v3220_v56, %v2571_v55  ;;  %v6654_v55 = vld [vmem:[%s8457_s30 + $0x4c8] sm:$0xf0] }
 0x1ad   : > { %v7487_v60 = vpack.c.bf16 %v3221_v57, %v3219_v41  ;;  %v5096_v61 = vadd.f32 %v5095_v48, %v3221_v57  ;;  %v5359_v62 = vmul.f32 %v3221_v57, %v3221_v57  ;;  %v3480_v47 = vpop.f32.mrf.mxu3  ;;  %v6657_v57 = vor.u32 %v7288_v51, %v6654_v55 }
 0x1ae   : > { %v8662_v48 = vadd.f32 %v3480_v47, %v2831_v46 }
 0x1af   : > { %8063 = vst [vmem:[%s8508_s10 + $0x78] sm:$0xff] %v7487_v60   ;;  %v5614_v3 = vadd.f32 %v5613_v54, %v5359_v62  ;;  %v6653_v54 = vor.u32 %v7289_v50, %v6652_v49  ;;  %3522 = vmatmul.bf16.gmra.mxu3 %v6657_v57  ;;  %v2834_v62 = vpop.f32.mrf.mxu2  ;;  %v6668_v57 = vld [vmem:[%s8457_s30 + $0x4e0] sm:$0xf] }
 0x1b0   : > { %v7747_v56 = vpack.c.bf16 %v8662_v48, %v8660_v43 }
 0x1b1   : > { %v2574_v6 = vpop.f32.mrf.mxu0  ;;  %2873 = vmatmul.bf16.gmra.mxu2 %v6653_v54 }
 0x1b2   : > { %v3223_v7 = vpop.f32.mrf.mxu1  ;;  %8115 = vst [vmem:[%s8508_s10 + $0x218] sm:$0xff] %v7747_v56  }
 0x1b3   : > { %v3224_v10 = vadd.f32 %v3223_v7, %v2574_v6  ;;  %v6254_v6 = vld [vmem:[%s8457_s30 + $0x1a8] sm:$0xf0] }
 0x1b4   : > { %2613 = vmatmul.bf16.gmra.mxu0 %v6237_v4  ;;  %v7189_v4 = vld [vmem:[%s8457_s30 + $0x1a4] sm:$0xf0] }
 0x1b5   : > { %v5097_v18 = vadd.f32 %v5096_v61, %v3224_v10  ;;  %v5360_v19 = vmul.f32 %v3224_v10, %v3224_v10  ;;  %3262 = vmatmul.bf16.gmra.mxu1 %v6241_v5  ;;  %v3483_v63 = vpop.f32.mrf.mxu3  ;;  %v7188_v5 = vld [vmem:[%s8457_s30 + $0x1a4] sm:$0xf] }
 0x1b6   : > { %v6257_v11 = vor.u32 %v7188_v5, %v6254_v6  ;;  %v8676_v16 = vadd.f32 %v3483_v63, %v2834_v62  ;;  %v6670_v63 = vld [vmem:[%s8457_s30 + $0x4e8] sm:$0xf0] }
 0x1b7   : > { %v5615_v24 = vadd.f32 %v5614_v3, %v5360_v19  ;;  %v6252_v3 = vld [vmem:[%s8457_s30 + $0x1a0] sm:$0xf] }
 0x1b9   : > { %v2576_v25 = vpop.f32.mrf.mxu0 }
 0x1ba   : > { %v3225_v26 = vpop.f32.mrf.mxu1 }
 0x1bb   : > { %v3226_v27 = vadd.f32 %v3225_v26, %v2576_v25  ;;  %v6661_v26 = vor.u32 %v7291_v22, %v6660_v21 }
 0x1bd   : > { %v7492_v30 = vpack.c.bf16 %v3226_v27, %v3224_v10  ;;  %v5098_v31 = vadd.f32 %v5097_v18, %v3226_v27  ;;  %v5361_v32 = vmul.f32 %v3226_v27, %v3226_v27  ;;  %v6253_v10 = vor.u32 %v7189_v4, %v6252_v3  ;;  %v2836_v18 = vpop.f32.mrf.mxu2  ;;  %v3485_v19 = vpop.f32.mrf.mxu3  ;;  %v6662_v27 = vld [vmem:[%s8457_s30 + $0x4d8] sm:$0xf0] }
 0x1be   : > { %v8678_v20 = vadd.f32 %v3485_v19, %v2836_v18  ;;  %v6665_v29 = vor.u32 %v7290_v23, %v6662_v27  ;;  %v7192_v18 = vld [vmem:[%s8457_s30 + $0x1c4] sm:$0xf]  ;;  %v6270_v19 = vld [vmem:[%s8457_s30 + $0x1c8] sm:$0xf0] }
 0x1bf   : > { %8064 = vst [vmem:[%s8508_s10 + $0x80] sm:$0xff] %v7492_v30   ;;  %v5616_v37 = vadd.f32 %v5615_v24, %v5361_v32  ;;  %v6273_v23 = vor.u32 %v7192_v18, %v6270_v19 }
 0x1c0   : > { %v7752_v28 = vpack.c.bf16 %v8678_v20, %v8676_v16  ;;  %3527 = vmatmul.bf16.gmra.mxu3 %v6665_v29 }
 0x1c1   : > { %v2579_v41 = vpop.f32.mrf.mxu0  ;;  %2878 = vmatmul.bf16.gmra.mxu2 %v6661_v26 }
 0x1c2   : > { %v3228_v42 = vpop.f32.mrf.mxu1  ;;  %8116 = vst [vmem:[%s8508_s10 + $0x220] sm:$0xff] %v7752_v28  }
 0x1c3   : > { %v3229_v45 = vadd.f32 %v3228_v42, %v2579_v41  ;;  %v7191_v41 = vld [vmem:[%s8457_s30 + $0x1b4] sm:$0xf0]  ;;  %v7190_v42 = vld [vmem:[%s8457_s30 + $0x1b4] sm:$0xf] }
 0x1c4   : > { %2618 = vmatmul.bf16.gmra.mxu0 %v6245_v38 }
 0x1c5   : > { %v5099_v52 = vadd.f32 %v5098_v31, %v3229_v45  ;;  %v5362_v53 = vmul.f32 %v3229_v45, %v3229_v45  ;;  %3267 = vmatmul.bf16.gmra.mxu1 %v6249_v39  ;;  %v2839_v34 = vpop.f32.mrf.mxu2  ;;  %v3488_v35 = vpop.f32.mrf.mxu3  ;;  %v6260_v39 = vld [vmem:[%s8457_s30 + $0x1b0] sm:$0xf] }
 0x1c6   : > { %v6261_v47 = vor.u32 %v7191_v41, %v6260_v39 }
 0x1c7   : > { %v5617_v58 = vadd.f32 %v5616_v37, %v5362_v53 }
 0x1c9   : > { %v2581_v59 = vpop.f32.mrf.mxu0 }
 0x1ca   : > { %v3230_v60 = vpop.f32.mrf.mxu1 }
 0x1cb   : > { %v3231_v61 = vadd.f32 %v3230_v60, %v2581_v59  ;;  %v7292_v59 = vld [vmem:[%s8457_s30 + $0x4e4] sm:$0xf] }
 0x1cd   : > { %v7497_v0 = vpack.c.bf16 %v3231_v61, %v3229_v45  ;;  %v5100_v1 = vadd.f32 %v5099_v52, %v3231_v61  ;;  %v5363_v2 = vmul.f32 %v3231_v61, %v3231_v61  ;;  %v6262_v45 = vld [vmem:[%s8457_s30 + $0x1b8] sm:$0xf0]  ;;  %v8692_v52 = vadd.f32 %v3488_v35, %v2839_v34  ;;  %v2841_v54 = vpop.f32.mrf.mxu2  ;;  %v3490_v55 = vpop.f32.mrf.mxu3 }
 0x1ce   : > { %v6265_v49 = vor.u32 %v7190_v42, %v6262_v45  ;;  %v8694_v56 = vadd.f32 %v3490_v55, %v2841_v54  ;;  %v6276_v54 = vld [vmem:[%s8457_s30 + $0x1d0] sm:$0xf]  ;;  %v7195_v55 = vld [vmem:[%s8457_s30 + $0x1d4] sm:$0xf0] }
 0x1cf   : > { %8065 = vst [vmem:[%s8508_s10 + $0x88] sm:$0xff] %v7497_v0   ;;  %v5618_v7 = vadd.f32 %v5617_v58, %v5363_v2  ;;  %v7293_v58 = vld [vmem:[%s8457_s30 + $0x4e4] sm:$0xf0] }
 0x1d0   : > { %v6669_v62 = vor.u32 %v7293_v58, %v6668_v57  ;;  %v7757_v0 = vpack.c.bf16 %v8694_v56, %v8692_v52  ;;  %v7194_v57 = vld [vmem:[%s8457_s30 + $0x1d4] sm:$0xf]  ;;  %v6278_v58 = vld [vmem:[%s8457_s30 + $0x1d8] sm:$0xf0] }
 0x1d1   : > { %v2584_v13 = vpop.f32.mrf.mxu0 }
 0x1d2   : > { %v3233_v15 = vpop.f32.mrf.mxu1  ;;  %2883 = vmatmul.bf16.gmra.mxu2 %v6669_v62  ;;  %8117 = vst [vmem:[%s8508_s10 + $0x228] sm:$0xff] %v7757_v0  }
 0x1d3   : > { %v3234_v17 = vadd.f32 %v3233_v15, %v2584_v13  ;;  %v6268_v15 = vld [vmem:[%s8457_s30 + $0x1c0] sm:$0xf] }
 0x1d4   : > { %2623 = vmatmul.bf16.gmra.mxu0 %v6253_v10 }
 0x1d5   : > { %v5101_v24 = vadd.f32 %v5100_v1, %v3234_v17  ;;  %v5364_v25 = vmul.f32 %v3234_v17, %v3234_v17  ;;  %3272 = vmatmul.bf16.gmra.mxu1 %v6257_v11  ;;  %v6673_v1 = vor.u32 %v7292_v59, %v6670_v63  ;;  %v2844_v6 = vpop.f32.mrf.mxu2 }
 0x1d7   : > { %v5619_v30 = vadd.f32 %v5618_v7, %v5364_v25  ;;  %3532 = vmatmul.bf16.gmra.mxu3 %v6673_v1  ;;  %v3493_v7 = vpop.f32.mrf.mxu3 }
 0x1d8   : > { %v8708_v26 = vadd.f32 %v3493_v7, %v2844_v6  ;;  %v7297_v6 = vld [vmem:[%s8457_s30 + $0x504] sm:$0xf0]  ;;  %v7296_v7 = vld [vmem:[%s8457_s30 + $0x504] sm:$0xf] }
 0x1d9   : > { %v2586_v31 = vpop.f32.mrf.mxu0 }
 0x1da   : > { %v3235_v32 = vpop.f32.mrf.mxu1 }
 0x1db   : > { %v3236_v33 = vadd.f32 %v3235_v32, %v2586_v31  ;;  %v6676_v31 = vld [vmem:[%s8457_s30 + $0x4f0] sm:$0xf]  ;;  %v7295_v32 = vld [vmem:[%s8457_s30 + $0x4f4] sm:$0xf0] }
 0x1dd   : > { %v7502_v36 = vpack.c.bf16 %v3236_v33, %v3234_v17  ;;  %v5102_v37 = vadd.f32 %v5101_v24, %v3236_v33  ;;  %v5365_v38 = vmul.f32 %v3236_v33, %v3236_v33  ;;  %v7193_v17 = vld [vmem:[%s8457_s30 + $0x1c4] sm:$0xf0]  ;;  %v2846_v28 = vpop.f32.mrf.mxu2  ;;  %v7294_v33 = vld [vmem:[%s8457_s30 + $0x4f4] sm:$0xf] }
 0x1de   : > { %v6269_v22 = vor.u32 %v7193_v17, %v6268_v15  ;;  %v6686_v15 = vld [vmem:[%s8457_s30 + $0x508] sm:$0xf0] }
 0x1df   : > { %8066 = vst [vmem:[%s8508_s10 + $0x90] sm:$0xff] %v7502_v36   ;;  %v5620_v46 = vadd.f32 %v5619_v30, %v5365_v38  ;;  %v3495_v29 = vpop.f32.mrf.mxu3  ;;  %v6677_v36 = vor.u32 %v7295_v32, %v6676_v31  ;;  %v6689_v18 = vor.u32 %v7296_v7, %v6686_v15  ;;  %v6284_v31 = vld [vmem:[%s8457_s30 + $0x1e0] sm:$0xf]  ;;  %v7197_v32 = vld [vmem:[%s8457_s30 + $0x1e4] sm:$0xf0] }
 0x1e0   : > { %v8710_v30 = vadd.f32 %v3495_v29, %v2846_v28  ;;  %v6292_v7 = vld [vmem:[%s8457_s30 + $0x1f0] sm:$0xf] }
 0x1e1   : > { %v2589_v50 = vpop.f32.mrf.mxu0 }
 0x1e2   : > { %v3238_v51 = vpop.f32.mrf.mxu1  ;;  %v7762_v38 = vpack.c.bf16 %v8710_v30, %v8708_v26  ;;  %2888 = vmatmul.bf16.gmra.mxu2 %v6677_v36  ;;  %v6285_v36 = vor.u32 %v7197_v32, %v6284_v31  ;;  %v7300_v31 = vld [vmem:[%s8457_s30 + $0x524] sm:$0xf] }
 0x1e3   : > { %v3239_v53 = vadd.f32 %v3238_v51, %v2589_v50 }
 0x1e4   : > { %2628 = vmatmul.bf16.gmra.mxu0 %v6261_v47  ;;  %8118 = vst [vmem:[%s8508_s10 + $0x230] sm:$0xff] %v7762_v38  }
 0x1e5   : > { %v5103_v60 = vadd.f32 %v5102_v37, %v3239_v53  ;;  %v5366_v61 = vmul.f32 %v3239_v53, %v3239_v53  ;;  %3277 = vmatmul.bf16.gmra.mxu1 %v6265_v49  ;;  %v6678_v37 = vld [vmem:[%s8457_s30 + $0x4f8] sm:$0xf0]  ;;  %v2849_v47 = vpop.f32.mrf.mxu2 }
 0x1e6   : > { %v6681_v39 = vor.u32 %v7294_v33, %v6678_v37  ;;  %v7196_v33 = vld [vmem:[%s8457_s30 + $0x1e4] sm:$0xf] }
 0x1e7   : > { %v5621_v2 = vadd.f32 %v5620_v46, %v5366_v61  ;;  %v3498_v49 = vpop.f32.mrf.mxu3  ;;  %v6281_v61 = vor.u32 %v7194_v57, %v6278_v58  ;;  %v6694_v57 = vld [vmem:[%s8457_s30 + $0x518] sm:$0xf0] }
 0x1e8   : > { %3537 = vmatmul.bf16.gmra.mxu3 %v6681_v39  ;;  %v8724_v0 = vadd.f32 %v3498_v49, %v2849_v47  ;;  %v6692_v49 = vld [vmem:[%s8457_s30 + $0x510] sm:$0xf] }
 0x1e9   : > { %v2591_v3 = vpop.f32.mrf.mxu0 }
 0x1ea   : > { %v3240_v4 = vpop.f32.mrf.mxu1 }
 0x1eb   : > { %v3241_v5 = vadd.f32 %v3240_v4, %v2591_v3 }
 0x1ed   : > { %v7507_v10 = vpack.c.bf16 %v3241_v5, %v3239_v53  ;;  %v5104_v11 = vadd.f32 %v5103_v60, %v3241_v5  ;;  %v5367_v13 = vmul.f32 %v3241_v5, %v3241_v5  ;;  %v6277_v60 = vor.u32 %v7195_v55, %v6276_v54  ;;  %v6684_v5 = vld [vmem:[%s8457_s30 + $0x500] sm:$0xf] }
 0x1ef   : > { %8067 = vst [vmem:[%s8508_s10 + $0x98] sm:$0xff] %v7507_v10   ;;  %v5622_v21 = vadd.f32 %v5621_v2, %v5367_v13  ;;  %v2851_v2 = vpop.f32.mrf.mxu2  ;;  %v3500_v3 = vpop.f32.mrf.mxu3  ;;  %v6685_v13 = vor.u32 %v7297_v6, %v6684_v5 }
 0x1f0   : > { %v8726_v4 = vadd.f32 %v3500_v3, %v2851_v2 }
 0x1f1   : > { %v2594_v24 = vpop.f32.mrf.mxu0 }
 0x1f2   : > { %v3243_v25 = vpop.f32.mrf.mxu1  ;;  %v7767_v17 = vpack.c.bf16 %v8726_v4, %v8724_v0  ;;  %2893 = vmatmul.bf16.gmra.mxu2 %v6685_v13  ;;  %v6294_v13 = vld [vmem:[%s8457_s30 + $0x1f8] sm:$0xf0] }
 0x1f3   : > { %v3244_v27 = vadd.f32 %v3243_v25, %v2594_v24 }
 0x1f4   : > { %2633 = vmatmul.bf16.gmra.mxu0 %v6269_v22  ;;  %8119 = vst [vmem:[%s8508_s10 + $0x238] sm:$0xff] %v7767_v17  }
 0x1f5   : > { %v5105_v34 = vadd.f32 %v5104_v11, %v3244_v27  ;;  %v5368_v35 = vmul.f32 %v3244_v27, %v3244_v27  ;;  %3282 = vmatmul.bf16.gmra.mxu1 %v6273_v23 }
 0x1f7   : > { %v5623_v41 = vadd.f32 %v5622_v21, %v5368_v35  ;;  %v2854_v24 = vpop.f32.mrf.mxu2  ;;  %v3503_v25 = vpop.f32.mrf.mxu3 }
 0x1f8   : > { %3542 = vmatmul.bf16.gmra.mxu3 %v6689_v18 }
 0x1f9   : > { %v2596_v42 = vpop.f32.mrf.mxu0 }
 0x1fa   : > { %v3245_v45 = vpop.f32.mrf.mxu1 }
 0x1fb   : > { %v3246_v46 = vadd.f32 %v3245_v45, %v2596_v42 }
 0x1fd   : > { %v7512_v50 = vpack.c.bf16 %v3246_v46, %v3244_v27  ;;  %v5106_v51 = vadd.f32 %v5105_v34, %v3246_v46  ;;  %v5369_v53 = vmul.f32 %v3246_v46, %v3246_v46  ;;  %v6286_v34 = vld [vmem:[%s8457_s30 + $0x1e8] sm:$0xf0] }
 0x1fe   : > { %v6289_v37 = vor.u32 %v7196_v33, %v6286_v34 }
 0x1ff   : > { %8068 = vst [vmem:[%s8508_s10 + $0xa0] sm:$0xff] %v7512_v50   ;;  %v5624_v59 = vadd.f32 %v5623_v41, %v5369_v53  ;;  %v8740_v41 = vadd.f32 %v3503_v25, %v2854_v24  ;;  %v2856_v45 = vpop.f32.mrf.mxu2  ;;  %v3505_v46 = vpop.f32.mrf.mxu3  ;;  %v7299_v50 = vld [vmem:[%s8457_s30 + $0x514] sm:$0xf0] }
 0x200   : > { %v8742_v47 = vadd.f32 %v3505_v46, %v2856_v45  ;;  %v6693_v55 = vor.u32 %v7299_v50, %v6692_v49 }
 0x201   : > { %v2599_v62 = vpop.f32.mrf.mxu0 }
 0x202   : > { %v3248_v63 = vpop.f32.mrf.mxu1  ;;  %v7772_v58 = vpack.c.bf16 %v8742_v47, %v8740_v41  ;;  %2898 = vmatmul.bf16.gmra.mxu2 %v6693_v55  ;;  %v7201_v55 = vld [vmem:[%s8457_s30 + $0x204] sm:$0xf0] }
 0x203   : > { %v3249_v1 = vadd.f32 %v3248_v63, %v2599_v62 }
 0x204   : > { %2638 = vmatmul.bf16.gmra.mxu0 %v6277_v60  ;;  %8120 = vst [vmem:[%s8508_s10 + $0x240] sm:$0xff] %v7772_v58   ;;  %v6302_v58 = vld [vmem:[%s8457_s30 + $0x208] sm:$0xf0] }
 0x205   : > { %v5107_v10 = vadd.f32 %v5106_v51, %v3249_v1  ;;  %v5370_v11 = vmul.f32 %v3249_v1, %v3249_v1  ;;  %3287 = vmatmul.bf16.gmra.mxu1 %v6281_v61  ;;  %v7298_v51 = vld [vmem:[%s8457_s30 + $0x514] sm:$0xf] }
 0x207   : > { %v5625_v19 = vadd.f32 %v5624_v59, %v5370_v11  ;;  %v6697_v59 = vor.u32 %v7298_v51, %v6694_v57  ;;  %v3508_v2 = vpop.f32.mrf.mxu3  ;;  %v7198_v11 = vld [vmem:[%s8457_s30 + $0x1f4] sm:$0xf]  ;;  %v7200_v57 = vld [vmem:[%s8457_s30 + $0x204] sm:$0xf] }
 0x208   : > { %v6297_v18 = vor.u32 %v7198_v11, %v6294_v13  ;;  %v7302_v11 = vld [vmem:[%s8457_s30 + $0x534] sm:$0xf] }
 0x209   : > { %v2601_v21 = vpop.f32.mrf.mxu0  ;;  %3547 = vmatmul.bf16.gmra.mxu3 %v6697_v59 }
 0x20a   : > { %v3250_v22 = vpop.f32.mrf.mxu1 }
 0x20b   : > { %v3251_v23 = vadd.f32 %v3250_v22, %v2601_v21 }
 0x20d   : > { %v7517_v27 = vpack.c.bf16 %v3251_v23, %v3249_v1  ;;  %v5108_v28 = vadd.f32 %v5107_v10, %v3251_v23  ;;  %v5371_v29 = vmul.f32 %v3251_v23, %v3251_v23  ;;  %v2859_v1 = vpop.f32.mrf.mxu2  ;;  %v7199_v10 = vld [vmem:[%s8457_s30 + $0x1f4] sm:$0xf0] }
 0x20e   : > { %v6293_v17 = vor.u32 %v7199_v10, %v6292_v7  ;;  %v8756_v22 = vadd.f32 %v3508_v2, %v2859_v1  ;;  %v6708_v7 = vld [vmem:[%s8457_s30 + $0x530] sm:$0xf]  ;;  %v7303_v10 = vld [vmem:[%s8457_s30 + $0x534] sm:$0xf0] }
 0x20f   : > { %8069 = vst [vmem:[%s8508_s10 + $0xa8] sm:$0xff] %v7517_v27   ;;  %v5626_v35 = vadd.f32 %v5625_v19, %v5371_v29  ;;  %v3510_v25 = vpop.f32.mrf.mxu3  ;;  %v7301_v29 = vld [vmem:[%s8457_s30 + $0x524] sm:$0xf0] }
 0x211   : > { %v2604_v38 = vpop.f32.mrf.mxu0 }
 0x212   : > { %v3253_v39 = vpop.f32.mrf.mxu1 }
 0x213   : > { %v3254_v42 = vadd.f32 %v3253_v39, %v2604_v38 }
 0x214   : > { %2643 = vmatmul.bf16.gmra.mxu0 %v6285_v36 }
 0x215   : > { %v5109_v53 = vadd.f32 %v5108_v28, %v3254_v42  ;;  %v5372_v54 = vmul.f32 %v3254_v42, %v3254_v42  ;;  %3292 = vmatmul.bf16.gmra.mxu1 %v6289_v37  ;;  %v2861_v24 = vpop.f32.mrf.mxu2  ;;  %v6700_v28 = vld [vmem:[%s8457_s30 + $0x520] sm:$0xf] }
 0x216   : > { %v8758_v27 = vadd.f32 %v3510_v25, %v2861_v24  ;;  %v6701_v34 = vor.u32 %v7301_v29, %v6700_v28 }
 0x217   : > { %v5627_v60 = vadd.f32 %v5626_v35, %v5372_v54  ;;  %v6702_v35 = vld [vmem:[%s8457_s30 + $0x528] sm:$0xf0]  ;;  %v3513_v49 = vpop.f32.mrf.mxu3  ;;  %v6300_v54 = vld [vmem:[%s8457_s30 + $0x200] sm:$0xf] }
 0x218   : > { %v7777_v36 = vpack.c.bf16 %v8758_v27, %v8756_v22  ;;  %v6705_v37 = vor.u32 %v7300_v31, %v6702_v35  ;;  %2903 = vmatmul.bf16.gmra.mxu2 %v6701_v34  ;;  %v6308_v35 = vld [vmem:[%s8457_s30 + $0x210] sm:$0xf] }
 0x219   : > { %v2606_v61 = vpop.f32.mrf.mxu0 }
 0x21a   : > { %v3255_v62 = vpop.f32.mrf.mxu1  ;;  %8121 = vst [vmem:[%s8508_s10 + $0x248] sm:$0xff] %v7777_v36   ;;  %3552 = vmatmul.bf16.gmra.mxu3 %v6705_v37  ;;  %v7203_v36 = vld [vmem:[%s8457_s30 + $0x214] sm:$0xf0]  ;;  %v7202_v37 = vld [vmem:[%s8457_s30 + $0x214] sm:$0xf] }
 0x21b   : > { %v3256_v63 = vadd.f32 %v3255_v62, %v2606_v61  ;;  %v6305_v61 = vor.u32 %v7200_v57, %v6302_v58  ;;  %v6716_v57 = vld [vmem:[%s8457_s30 + $0x540] sm:$0xf]  ;;  %v7305_v58 = vld [vmem:[%s8457_s30 + $0x544] sm:$0xf0] }
 0x21d   : > { %v7522_v3 = vpack.c.bf16 %v3256_v63, %v3254_v42  ;;  %v5110_v5 = vadd.f32 %v5109_v53, %v3256_v63  ;;  %v5373_v6 = vmul.f32 %v3256_v63, %v3256_v63  ;;  %v2864_v46 = vpop.f32.mrf.mxu2 }
 0x21e   : > { %v8772_v1 = vadd.f32 %v3513_v49, %v2864_v46 }
 0x21f   : > { %8070 = vst [vmem:[%s8508_s10 + $0xb0] sm:$0xff] %v7522_v3   ;;  %v5628_v15 = vadd.f32 %v5627_v60, %v5373_v6  ;;  %v6301_v60 = vor.u32 %v7201_v55, %v6300_v54 }
 0x221   : > { %v2609_v19 = vpop.f32.mrf.mxu0 }
 0x222   : > { %v3258_v21 = vpop.f32.mrf.mxu1 }
 0x223   : > { %v3259_v23 = vadd.f32 %v3258_v21, %v2609_v19 }
 0x224   : > { %2648 = vmatmul.bf16.gmra.mxu0 %v6293_v17  ;;  %v6709_v17 = vor.u32 %v7303_v10, %v6708_v7 }
 0x225   : > { %v5111_v32 = vadd.f32 %v5110_v5, %v3259_v23  ;;  %v5374_v33 = vmul.f32 %v3259_v23, %v3259_v23  ;;  %3297 = vmatmul.bf16.gmra.mxu1 %v6297_v18  ;;  %v2866_v3 = vpop.f32.mrf.mxu2  ;;  %v3515_v5 = vpop.f32.mrf.mxu3  ;;  %v6710_v18 = vld [vmem:[%s8457_s30 + $0x538] sm:$0xf0] }
 0x226   : > { %v8774_v6 = vadd.f32 %v3515_v5, %v2866_v3  ;;  %v6713_v21 = vor.u32 %v7302_v11, %v6710_v18 }
 0x227   : > { %v5629_v38 = vadd.f32 %v5628_v15, %v5374_v33 }
 0x228   : > { %v7782_v19 = vpack.c.bf16 %v8774_v6, %v8772_v1  ;;  %2908 = vmatmul.bf16.gmra.mxu2 %v6709_v17 }
 0x229   : > { %v2611_v39 = vpop.f32.mrf.mxu0 }
 0x22a   : > { %v3260_v42 = vpop.f32.mrf.mxu1  ;;  %8122 = vst [vmem:[%s8508_s10 + $0x250] sm:$0xff] %v7782_v19   ;;  %3557 = vmatmul.bf16.gmra.mxu3 %v6713_v21  ;;  %v6316_v21 = vld [vmem:[%s8457_s30 + $0x220] sm:$0xf] }
 0x22b   : > { %v3261_v45 = vadd.f32 %v3260_v42, %v2611_v39  ;;  %v6309_v42 = vor.u32 %v7203_v36, %v6308_v35 }
 0x22d   : > { %v7527_v50 = vpack.c.bf16 %v3261_v45, %v3259_v23  ;;  %v5112_v51 = vadd.f32 %v5111_v32, %v3261_v45  ;;  %v5375_v53 = vmul.f32 %v3261_v45, %v3261_v45  ;;  %v2869_v29 = vpop.f32.mrf.mxu2  ;;  %v3518_v31 = vpop.f32.mrf.mxu3 }
 0x22f   : > { %8071 = vst [vmem:[%s8508_s10 + $0xb8] sm:$0xff] %v7527_v50   ;;  %v5630_v59 = vadd.f32 %v5629_v38, %v5375_v53  ;;  %v6310_v38 = vld [vmem:[%s8457_s30 + $0x218] sm:$0xf0]  ;;  %v8788_v50 = vadd.f32 %v3518_v31, %v2869_v29 }
 0x230   : > { %v6313_v45 = vor.u32 %v7202_v37, %v6310_v38 }
 0x231   : > { %v2614_v62 = vpop.f32.mrf.mxu0 }
 0x232   : > { %v3263_v63 = vpop.f32.mrf.mxu1 }
 0x233   : > { %v3264_v2 = vadd.f32 %v3263_v63, %v2614_v62  ;;  %v6717_v62 = vor.u32 %v7305_v58, %v6716_v57  ;;  %v6718_v63 = vld [vmem:[%s8457_s30 + $0x548] sm:$0xf0] }
 0x234   : > { %2653 = vmatmul.bf16.gmra.mxu0 %v6301_v60 }
 0x235   : > { %v5113_v13 = vadd.f32 %v5112_v51, %v3264_v2  ;;  %v5376_v15 = vmul.f32 %v3264_v2, %v3264_v2  ;;  %3302 = vmatmul.bf16.gmra.mxu1 %v6305_v61  ;;  %v2871_v53 = vpop.f32.mrf.mxu2  ;;  %v3520_v54 = vpop.f32.mrf.mxu3 }
 0x236   : > { %v8790_v55 = vadd.f32 %v3520_v54, %v2871_v53  ;;  %v6726_v53 = vld [vmem:[%s8457_s30 + $0x558] sm:$0xf0] }
 0x237   : > { %v5631_v23 = vadd.f32 %v5630_v59, %v5376_v15  ;;  %v7304_v59 = vld [vmem:[%s8457_s30 + $0x544] sm:$0xf] }
 0x238   : > { %v6721_v3 = vor.u32 %v7304_v59, %v6718_v63  ;;  %2913 = vmatmul.bf16.gmra.mxu2 %v6717_v62 }
 0x239   : > { %v2616_v24 = vpop.f32.mrf.mxu0 }
 0x23a   : > { %v3265_v25 = vpop.f32.mrf.mxu1  ;;  %3562 = vmatmul.bf16.gmra.mxu3 %v6721_v3 }
 0x23b   : > { %v3266_v28 = vadd.f32 %v3265_v25, %v2616_v24  ;;  %v7204_v24 = vld [vmem:[%s8457_s30 + $0x224] sm:$0xf]  ;;  %v6318_v25 = vld [vmem:[%s8457_s30 + $0x228] sm:$0xf0] }
 0x23c   : > { %v6321_v31 = vor.u32 %v7204_v24, %v6318_v25 }
 0x23d   : > { %v7532_v32 = vpack.c.bf16 %v3266_v28, %v3264_v2  ;;  %v5114_v33 = vadd.f32 %v5113_v13, %v3266_v28  ;;  %v5377_v34 = vmul.f32 %v3266_v28, %v3266_v28  ;;  %v7787_v2 = vpack.c.bf16 %v8790_v55, %v8788_v50  ;;  %v2874_v13 = vpop.f32.mrf.mxu2  ;;  %v3523_v15 = vpop.f32.mrf.mxu3 }
 0x23f   : > { %8072 = vst [vmem:[%s8508_s10 + $0xc0] sm:$0xff] %v7532_v32   ;;  %v5632_v39 = vadd.f32 %v5631_v23, %v5377_v34  ;;  %v7205_v23 = vld [vmem:[%s8457_s30 + $0x224] sm:$0xf0]  ;;  %v8804_v34 = vadd.f32 %v3523_v15, %v2874_v13  ;;  %v6326_v13 = vld [vmem:[%s8457_s30 + $0x238] sm:$0xf0] }
 0x240   : > { %8123 = vst [vmem:[%s8508_s10 + $0x258] sm:$0xff] %v7787_v2   ;;  %v6317_v29 = vor.u32 %v7205_v23, %v6316_v21 }
 0x241   : > { %v2619_v46 = vpop.f32.mrf.mxu0 }
 0x242   : > { %v3268_v49 = vpop.f32.mrf.mxu1 }
 0x243   : > { %v3269_v51 = vadd.f32 %v3268_v49, %v2619_v46 }
 0x244   : > { %2658 = vmatmul.bf16.gmra.mxu0 %v6309_v42  ;;  %v7307_v42 = vld [vmem:[%s8457_s30 + $0x554] sm:$0xf0] }
 0x245   : > { %v5115_v60 = vadd.f32 %v5114_v33, %v3269_v51  ;;  %v5378_v61 = vmul.f32 %v3269_v51, %v3269_v51  ;;  %3307 = vmatmul.bf16.gmra.mxu1 %v6313_v45  ;;  %v2876_v36 = vpop.f32.mrf.mxu2  ;;  %v3525_v37 = vpop.f32.mrf.mxu3  ;;  %v7306_v45 = vld [vmem:[%s8457_s30 + $0x554] sm:$0xf] }
 0x246   : > { %v8806_v38 = vadd.f32 %v3525_v37, %v2876_v36  ;;  %v6729_v57 = vor.u32 %v7306_v45, %v6726_v53 }
 0x247   : > { %v5633_v5 = vadd.f32 %v5632_v39, %v5378_v61  ;;  %v6724_v39 = vld [vmem:[%s8457_s30 + $0x550] sm:$0xf] }
 0x248   : > { %v7792_v54 = vpack.c.bf16 %v8806_v38, %v8804_v34 }
 0x249   : > { %v2621_v7 = vpop.f32.mrf.mxu0 }
 0x24a   : > { %v3270_v10 = vpop.f32.mrf.mxu1  ;;  %8124 = vst [vmem:[%s8508_s10 + $0x260] sm:$0xff] %v7792_v54   ;;  %3567 = vmatmul.bf16.gmra.mxu3 %v6729_v57 }
 0x24b   : > { %v3271_v11 = vadd.f32 %v3270_v10, %v2621_v7  ;;  %v6324_v7 = vld [vmem:[%s8457_s30 + $0x230] sm:$0xf]  ;;  %v7207_v10 = vld [vmem:[%s8457_s30 + $0x234] sm:$0xf0] }
 0x24d   : > { %v7537_v17 = vpack.c.bf16 %v3271_v11, %v3269_v51  ;;  %v5116_v18 = vadd.f32 %v5115_v60, %v3271_v11  ;;  %v5379_v19 = vmul.f32 %v3271_v11, %v3271_v11  ;;  %v6725_v51 = vor.u32 %v7307_v42, %v6724_v39  ;;  %v2879_v62 = vpop.f32.mrf.mxu2  ;;  %v3528_v63 = vpop.f32.mrf.mxu3  ;;  %v7206_v11 = vld [vmem:[%s8457_s30 + $0x234] sm:$0xf]  ;;  %v6734_v39 = vld [vmem:[%s8457_s30 + $0x568] sm:$0xf0] }
 0x24e   : > { %v8820_v23 = vadd.f32 %v3528_v63, %v2879_v62  ;;  %v7209_v62 = vld [vmem:[%s8457_s30 + $0x244] sm:$0xf0]  ;;  %v7208_v63 = vld [vmem:[%s8457_s30 + $0x244] sm:$0xf] }
 0x24f   : > { %8073 = vst [vmem:[%s8508_s10 + $0xc8] sm:$0xff] %v7537_v17   ;;  %v5634_v28 = vadd.f32 %v5633_v5, %v5379_v19  ;;  %2918 = vmatmul.bf16.gmra.mxu2 %v6725_v51  ;;  %v6325_v17 = vor.u32 %v7207_v10, %v6324_v7 }
 0x251   : > { %v2624_v32 = vpop.f32.mrf.mxu0 }
 0x252   : > { %v3273_v33 = vpop.f32.mrf.mxu1 }
 0x253   : > { %v3274_v35 = vadd.f32 %v3273_v33, %v2624_v32  ;;  %v7309_v32 = vld [vmem:[%s8457_s30 + $0x564] sm:$0xf0]  ;;  %v7308_v33 = vld [vmem:[%s8457_s30 + $0x564] sm:$0xf] }
 0x254   : > { %2663 = vmatmul.bf16.gmra.mxu0 %v6317_v29  ;;  %v6737_v45 = vor.u32 %v7308_v33, %v6734_v39  ;;  %v6742_v33 = vld [vmem:[%s8457_s30 + $0x578] sm:$0xf0] }
 0x255   : > { %v5117_v46 = vadd.f32 %v5116_v18, %v3274_v35  ;;  %v5380_v49 = vmul.f32 %v3274_v35, %v3274_v35  ;;  %3312 = vmatmul.bf16.gmra.mxu1 %v6321_v31  ;;  %v6329_v18 = vor.u32 %v7206_v11, %v6326_v13  ;;  %v2881_v25 = vpop.f32.mrf.mxu2  ;;  %v6732_v31 = vld [vmem:[%s8457_s30 + $0x560] sm:$0xf] }
 0x256   : > { %v6733_v37 = vor.u32 %v7309_v32, %v6732_v31 }
 0x257   : > { %v5635_v58 = vadd.f32 %v5634_v28, %v5380_v49  ;;  %v3530_v28 = vpop.f32.mrf.mxu3 }
 0x258   : > { %v8822_v29 = vadd.f32 %v3530_v28, %v2881_v25  ;;  %v7310_v25 = vld [vmem:[%s8457_s30 + $0x574] sm:$0xf] }
 0x259   : > { %v2626_v59 = vpop.f32.mrf.mxu0 }
 0x25a   : > { %v3275_v60 = vpop.f32.mrf.mxu1  ;;  %v7797_v42 = vpack.c.bf16 %v8822_v29, %v8820_v23  ;;  %3572 = vmatmul.bf16.gmra.mxu3 %v6737_v45 }
 0x25b   : > { %v3276_v61 = vadd.f32 %v3275_v60, %v2626_v59 }
 0x25c   : > { %8125 = vst [vmem:[%s8508_s10 + $0x268] sm:$0xff] %v7797_v42  }
 0x25d   : > { %v7542_v2 = vpack.c.bf16 %v3276_v61, %v3274_v35  ;;  %v5118_v3 = vadd.f32 %v5117_v46, %v3276_v61  ;;  %v5381_v5 = vmul.f32 %v3276_v61, %v3276_v61  ;;  %v2884_v54 = vpop.f32.mrf.mxu2  ;;  %v6332_v61 = vld [vmem:[%s8457_s30 + $0x240] sm:$0xf] }
 0x25f   : > { %8074 = vst [vmem:[%s8508_s10 + $0xd0] sm:$0xff] %v7542_v2   ;;  %v5636_v15 = vadd.f32 %v5635_v58, %v5381_v5  ;;  %2923 = vmatmul.bf16.gmra.mxu2 %v6733_v37  ;;  %v3533_v57 = vpop.f32.mrf.mxu3  ;;  %v6334_v2 = vld [vmem:[%s8457_s30 + $0x248] sm:$0xf0]  ;;  %v6333_v5 = vor.u32 %v7209_v62, %v6332_v61 }
 0x260   : > { %v6337_v7 = vor.u32 %v7208_v63, %v6334_v2  ;;  %v8836_v13 = vadd.f32 %v3533_v57, %v2884_v54  ;;  %v6340_v57 = vld [vmem:[%s8457_s30 + $0x250] sm:$0xf] }
 0x261   : > { %v2629_v19 = vpop.f32.mrf.mxu0 }
 0x262   : > { %v3278_v21 = vpop.f32.mrf.mxu1 }
 0x263   : > { %v3279_v24 = vadd.f32 %v3278_v21, %v2629_v19  ;;  %v6740_v21 = vld [vmem:[%s8457_s30 + $0x570] sm:$0xf] }
 0x264   : > { %2668 = vmatmul.bf16.gmra.mxu0 %v6325_v17 }
 0x265   : > { %v5119_v35 = vadd.f32 %v5118_v3, %v3279_v24  ;;  %v5382_v36 = vmul.f32 %v3279_v24, %v3279_v24  ;;  %3317 = vmatmul.bf16.gmra.mxu1 %v6329_v18  ;;  %v2886_v17 = vpop.f32.mrf.mxu2 }
 0x267   : > { %v5637_v46 = vadd.f32 %v5636_v15, %v5382_v36  ;;  %v3535_v18 = vpop.f32.mrf.mxu3  ;;  %v6745_v36 = vor.u32 %v7310_v25, %v6742_v33 }
 0x268   : > { %v8838_v19 = vadd.f32 %v3535_v18, %v2886_v17  ;;  %v6748_v17 = vld [vmem:[%s8457_s30 + $0x580] sm:$0xf]  ;;  %v7313_v18 = vld [vmem:[%s8457_s30 + $0x584] sm:$0xf0] }
 0x269   : > { %v2631_v49 = vpop.f32.mrf.mxu0 }
 0x26a   : > { %v3280_v51 = vpop.f32.mrf.mxu1  ;;  %3577 = vmatmul.bf16.gmra.mxu3 %v6745_v36 }
 0x26b   : > { %v3281_v53 = vadd.f32 %v3280_v51, %v2631_v49 }
 0x26d   : > { %v7547_v58 = vpack.c.bf16 %v3281_v53, %v3279_v24  ;;  %v5120_v59 = vadd.f32 %v5119_v35, %v3281_v53  ;;  %v5383_v60 = vmul.f32 %v3281_v53, %v3281_v53  ;;  %v7311_v24 = vld [vmem:[%s8457_s30 + $0x574] sm:$0xf0]  ;;  %v7802_v35 = vpack.c.bf16 %v8838_v19, %v8836_v13 }
 0x26e   : > { %v6741_v32 = vor.u32 %v7311_v24, %v6740_v21  ;;  %v7312_v21 = vld [vmem:[%s8457_s30 + $0x584] sm:$0xf] }
 0x26f   : > { %8075 = vst [vmem:[%s8508_s10 + $0xd8] sm:$0xff] %v7547_v58   ;;  %v5638_v3 = vadd.f32 %v5637_v46, %v5383_v60  ;;  %v2889_v46 = vpop.f32.mrf.mxu2  ;;  %v3538_v49 = vpop.f32.mrf.mxu3  ;;  %v7211_v58 = vld [vmem:[%s8457_s30 + $0x254] sm:$0xf0]  ;;  %v6342_v60 = vld [vmem:[%s8457_s30 + $0x258] sm:$0xf0] }
 0x270   : > { %2928 = vmatmul.bf16.gmra.mxu2 %v6741_v32  ;;  %8126 = vst [vmem:[%s8508_s10 + $0x270] sm:$0xff] %v7802_v35   ;;  %v6341_v62 = vor.u32 %v7211_v58, %v6340_v57  ;;  %v7212_v57 = vld [vmem:[%s8457_s30 + $0x264] sm:$0xf]  ;;  %v6350_v58 = vld [vmem:[%s8457_s30 + $0x268] sm:$0xf0] }
 0x271   : > { %v2634_v10 = vpop.f32.mrf.mxu0 }
 0x272   : > { %v3283_v11 = vpop.f32.mrf.mxu1 }
 0x273   : > { %v3284_v15 = vadd.f32 %v3283_v11, %v2634_v10 }
 0x274   : > { %2673 = vmatmul.bf16.gmra.mxu0 %v6333_v5  ;;  %v8852_v5 = vadd.f32 %v3538_v49, %v2889_v46 }
 0x275   : > { %v5121_v28 = vadd.f32 %v5120_v59, %v3284_v15  ;;  %v5384_v31 = vmul.f32 %v3284_v15, %v3284_v15  ;;  %3322 = vmatmul.bf16.gmra.mxu1 %v6337_v7  ;;  %v7210_v59 = vld [vmem:[%s8457_s30 + $0x254] sm:$0xf] }
 0x276   : > { %v6345_v63 = vor.u32 %v7210_v59, %v6342_v60 }
 0x277   : > { %v5639_v37 = vadd.f32 %v5638_v3, %v5384_v31  ;;  %v2891_v10 = vpop.f32.mrf.mxu2  ;;  %v3540_v11 = vpop.f32.mrf.mxu3  ;;  %v6750_v31 = vld [vmem:[%s8457_s30 + $0x588] sm:$0xf0] }
 0x278   : > { %v6753_v33 = vor.u32 %v7312_v21, %v6750_v31  ;;  %v7314_v21 = vld [vmem:[%s8457_s30 + $0x594] sm:$0xf]  ;;  %v6758_v31 = vld [vmem:[%s8457_s30 + $0x598] sm:$0xf0] }
 0x279   : > { %v2636_v39 = vpop.f32.mrf.mxu0 }
 0x27a   : > { %v3285_v42 = vpop.f32.mrf.mxu1  ;;  %3582 = vmatmul.bf16.gmra.mxu3 %v6753_v33  ;;  %v6761_v33 = vor.u32 %v7314_v21, %v6758_v31  ;;  %v6764_v21 = vld [vmem:[%s8457_s30 + $0x5a0] sm:$0xf] }
 0x27b   : > { %v3286_v45 = vadd.f32 %v3285_v42, %v2636_v39 }
 0x27d   : > { %v7552_v51 = vpack.c.bf16 %v3286_v45, %v3284_v15  ;;  %v5122_v53 = vadd.f32 %v5121_v28, %v3286_v45  ;;  %v5385_v54 = vmul.f32 %v3286_v45, %v3286_v45  ;;  %v8854_v15 = vadd.f32 %v3540_v11, %v2891_v10 }
 0x27e   : > { %v6749_v28 = vor.u32 %v7313_v18, %v6748_v17  ;;  %v6756_v17 = vld [vmem:[%s8457_s30 + $0x590] sm:$0xf]  ;;  %v7315_v18 = vld [vmem:[%s8457_s30 + $0x594] sm:$0xf0] }
 0x27f   : > { %8076 = vst [vmem:[%s8508_s10 + $0xe0] sm:$0xff] %v7552_v51   ;;  %v5640_v61 = vadd.f32 %v5639_v37, %v5385_v54  ;;  %v7807_v32 = vpack.c.bf16 %v8854_v15, %v8852_v5  ;;  %v2894_v42 = vpop.f32.mrf.mxu2  ;;  %v3543_v45 = vpop.f32.mrf.mxu3  ;;  %v7213_v54 = vld [vmem:[%s8457_s30 + $0x264] sm:$0xf0] }
 0x280   : > { %2933 = vmatmul.bf16.gmra.mxu2 %v6749_v28  ;;  %v6757_v28 = vor.u32 %v7315_v18, %v6756_v17 }
 0x281   : > { %v2639_v2 = vpop.f32.mrf.mxu0  ;;  %8127 = vst [vmem:[%s8508_s10 + $0x278] sm:$0xff] %v7807_v32  }
 0x282   : > { %v3288_v3 = vpop.f32.mrf.mxu1 }
 0x283   : > { %v3289_v7 = vadd.f32 %v3288_v3, %v2639_v2  ;;  %v8868_v2 = vadd.f32 %v3543_v45, %v2894_v42 }
 0x284   : > { %2678 = vmatmul.bf16.gmra.mxu0 %v6341_v62 }
 0x285   : > { %v5123_v24 = vadd.f32 %v5122_v53, %v3289_v7  ;;  %v5386_v25 = vmul.f32 %v3289_v7, %v3289_v7  ;;  %3327 = vmatmul.bf16.gmra.mxu1 %v6345_v63  ;;  %v6348_v53 = vld [vmem:[%s8457_s30 + $0x260] sm:$0xf] }
 0x286   : > { %v6349_v60 = vor.u32 %v7213_v54, %v6348_v53  ;;  %v6356_v53 = vld [vmem:[%s8457_s30 + $0x270] sm:$0xf]  ;;  %v7215_v54 = vld [vmem:[%s8457_s30 + $0x274] sm:$0xf0] }
 0x287   : > { %v5641_v35 = vadd.f32 %v5640_v61, %v5386_v25  ;;  %v6353_v61 = vor.u32 %v7212_v57, %v6350_v58  ;;  %v3545_v10 = vpop.f32.mrf.mxu3  ;;  %v7214_v57 = vld [vmem:[%s8457_s30 + $0x274] sm:$0xf]  ;;  %v6358_v58 = vld [vmem:[%s8457_s30 + $0x278] sm:$0xf0] }
 0x289   : > { %v2641_v36 = vpop.f32.mrf.mxu0 }
 0x28a   : > { %v3290_v37 = vpop.f32.mrf.mxu1  ;;  %3587 = vmatmul.bf16.gmra.mxu3 %v6761_v33  ;;  %v6766_v33 = vld [vmem:[%s8457_s30 + $0x5a8] sm:$0xf0] }
 0x28b   : > { %v3291_v39 = vadd.f32 %v3290_v37, %v2641_v36 }
 0x28d   : > { %v7557_v46 = vpack.c.bf16 %v3291_v39, %v3289_v7  ;;  %v5124_v49 = vadd.f32 %v5123_v24, %v3291_v39  ;;  %v5387_v51 = vmul.f32 %v3291_v39, %v3291_v39  ;;  %v2896_v7 = vpop.f32.mrf.mxu2 }
 0x28e   : > { %v8870_v11 = vadd.f32 %v3545_v10, %v2896_v7 }
 0x28f   : > { %8077 = vst [vmem:[%s8508_s10 + $0xe8] sm:$0xff] %v7557_v46   ;;  %v5642_v59 = vadd.f32 %v5641_v35, %v5387_v51  ;;  %v3548_v45 = vpop.f32.mrf.mxu3 }
 0x290   : > { %v7812_v32 = vpack.c.bf16 %v8870_v11, %v8868_v2  ;;  %2938 = vmatmul.bf16.gmra.mxu2 %v6757_v28 }
 0x291   : > { %v2644_v62 = vpop.f32.mrf.mxu0 }
 0x292   : > { %v3293_v63 = vpop.f32.mrf.mxu1  ;;  %8128 = vst [vmem:[%s8508_s10 + $0x280] sm:$0xff] %v7812_v32  }
 0x293   : > { %v3294_v3 = vadd.f32 %v3293_v63, %v2644_v62 }
 0x294   : > { %2683 = vmatmul.bf16.gmra.mxu0 %v6349_v60  ;;  %v6357_v60 = vor.u32 %v7215_v54, %v6356_v53 }
 0x295   : > { %v5125_v24 = vadd.f32 %v5124_v49, %v3294_v3  ;;  %v5388_v25 = vmul.f32 %v3294_v3, %v3294_v3  ;;  %3332 = vmatmul.bf16.gmra.mxu1 %v6353_v61  ;;  %v2899_v42 = vpop.f32.mrf.mxu2  ;;  %v6361_v61 = vor.u32 %v7214_v57, %v6358_v58  ;;  %v6364_v57 = vld [vmem:[%s8457_s30 + $0x280] sm:$0xf]  ;;  %v7217_v58 = vld [vmem:[%s8457_s30 + $0x284] sm:$0xf0] }
 0x296   : > { %v8884_v7 = vadd.f32 %v3548_v45, %v2899_v42 }
 0x297   : > { %v5643_v35 = vadd.f32 %v5642_v59, %v5388_v25  ;;  %v3550_v17 = vpop.f32.mrf.mxu3  ;;  %v7316_v25 = vld [vmem:[%s8457_s30 + $0x5a4] sm:$0xf] }
 0x299   : > { %v2646_v36 = vpop.f32.mrf.mxu0 }
 0x29a   : > { %v3295_v37 = vpop.f32.mrf.mxu1 }
 0x29b   : > { %v3296_v39 = vadd.f32 %v3295_v37, %v2646_v36  ;;  %v6769_v36 = vor.u32 %v7316_v25, %v6766_v33  ;;  %v7318_v33 = vld [vmem:[%s8457_s30 + $0x5b4] sm:$0xf] }
 0x29d   : > { %v7562_v46 = vpack.c.bf16 %v3296_v39, %v3294_v3  ;;  %v5126_v49 = vadd.f32 %v5125_v24, %v3296_v39  ;;  %v5389_v51 = vmul.f32 %v3296_v39, %v3296_v39  ;;  %v2901_v3 = vpop.f32.mrf.mxu2  ;;  %v7317_v24 = vld [vmem:[%s8457_s30 + $0x5a4] sm:$0xf0]  ;;  %3592 = vmatmul.bf16.gmra.mxu3 %v6769_v36 }
 0x29e   : > { %v8886_v18 = vadd.f32 %v3550_v17, %v2901_v3  ;;  %v6765_v32 = vor.u32 %v7317_v24, %v6764_v21 }
 0x29f   : > { %8078 = vst [vmem:[%s8508_s10 + $0xf0] sm:$0xff] %v7562_v46   ;;  %v5644_v59 = vadd.f32 %v5643_v35, %v5389_v51 }
 0x2a0   : > { %v7817_v35 = vpack.c.bf16 %v8886_v18, %v8884_v7  ;;  %2943 = vmatmul.bf16.gmra.mxu2 %v6765_v32  ;;  %v7319_v32 = vld [vmem:[%s8457_s30 + $0x5b4] sm:$0xf0] }
 0x2a1   : > { %v2649_v62 = vpop.f32.mrf.mxu0 }
 0x2a2   : > { %v3298_v63 = vpop.f32.mrf.mxu1  ;;  %8129 = vst [vmem:[%s8508_s10 + $0x288] sm:$0xff] %v7817_v35  }
 0x2a3   : > { %v3299_v10 = vadd.f32 %v3298_v63, %v2649_v62  ;;  %v6365_v62 = vor.u32 %v7217_v58, %v6364_v57 }
 0x2a4   : > { %2688 = vmatmul.bf16.gmra.mxu0 %v6357_v60  ;;  %v7216_v60 = vld [vmem:[%s8457_s30 + $0x284] sm:$0xf] }
 0x2a5   : > { %v5127_v28 = vadd.f32 %v5126_v49, %v3299_v10  ;;  %v5390_v31 = vmul.f32 %v3299_v10, %v3299_v10  ;;  %3337 = vmatmul.bf16.gmra.mxu1 %v6361_v61  ;;  %v2904_v46 = vpop.f32.mrf.mxu2  ;;  %v3553_v49 = vpop.f32.mrf.mxu3  ;;  %v6366_v61 = vld [vmem:[%s8457_s30 + $0x288] sm:$0xf0] }
 0x2a6   : > { %v6369_v63 = vor.u32 %v7216_v60, %v6366_v61  ;;  %v8900_v21 = vadd.f32 %v3553_v49, %v2904_v46 }
 0x2a7   : > { %v5645_v37 = vadd.f32 %v5644_v59, %v5390_v31  ;;  %v6772_v31 = vld [vmem:[%s8457_s30 + $0x5b0] sm:$0xf] }
 0x2a8   : > { %10103 = vst [vmem:[#allocation6_spill] sm:$0xff] %v8900_v21 }
 0x2a9   : > { %v2651_v39 = vpop.f32.mrf.mxu0 }
 0x2aa   : > { %v3300_v42 = vpop.f32.mrf.mxu1 }
 0x2ab   : > { %v3301_v45 = vadd.f32 %v3300_v42, %v2651_v39  ;;  %v6774_v39 = vld [vmem:[%s8457_s30 + $0x5b8] sm:$0xf0] }
 0x2ad   : > { %v7567_v51 = vpack.c.bf16 %v3301_v45, %v3299_v10  ;;  %v5128_v53 = vadd.f32 %v5127_v28, %v3301_v45  ;;  %v5391_v54 = vmul.f32 %v3301_v45, %v3301_v45  ;;  %v2906_v10 = vpop.f32.mrf.mxu2  ;;  %v3555_v25 = vpop.f32.mrf.mxu3  ;;  %v6777_v45 = vor.u32 %v7318_v33, %v6774_v39  ;;  %v6780_v39 = vld [vmem:[%s8457_s30 + $0x5c0] sm:$0xf] }
 0x2ae   : > { %v8902_v28 = vadd.f32 %v3555_v25, %v2906_v10 }
 0x2af   : > { %8079 = vst [vmem:[%s8508_s10 + $0xf8] sm:$0xff] %v7567_v51   ;;  %v5646_v59 = vadd.f32 %v5645_v37, %v5391_v54  ;;  %v6773_v37 = vor.u32 %v7319_v32, %v6772_v31  ;;  %3597 = vmatmul.bf16.gmra.mxu3 %v6777_v45  ;;  %v7320_v45 = vld [vmem:[%s8457_s30 + $0x5c4] sm:$0xf] }
 0x2b0   : > { %10104 = vst [vmem:[#allocation7_spill] sm:$0xff] %v8902_v28  ;;  %v7822_v42 = vpack.c.bf16 %v8902_v28, %v8900_v21 }
 0x2b1   : > { %v2654_v3 = vpop.f32.mrf.mxu0  ;;  %2948 = vmatmul.bf16.gmra.mxu2 %v6773_v37 }
 0x2b2   : > { %v3303_v17 = vpop.f32.mrf.mxu1  ;;  %8130 = vst [vmem:[%s8508_s10 + $0x290] sm:$0xff] %v7822_v42   ;;  %v7321_v42 = vld [vmem:[%s8457_s30 + $0x5c4] sm:$0xf0] }
 0x2b3   : > { %v3304_v24 = vadd.f32 %v3303_v17, %v2654_v3  ;;  %v7218_v3 = vld [vmem:[%s8457_s30 + $0x294] sm:$0xf]  ;;  %v6374_v17 = vld [vmem:[%s8457_s30 + $0x298] sm:$0xf0] }
 0x2b4   : > { %2693 = vmatmul.bf16.gmra.mxu0 %v6365_v62  ;;  %v6372_v62 = vld [vmem:[%s8457_s30 + $0x290] sm:$0xf]  ;;  %v6377_v25 = vor.u32 %v7218_v3, %v6374_v17 }
 0x2b5   : > { %v5129_v35 = vadd.f32 %v5128_v53, %v3304_v24  ;;  %v5392_v36 = vmul.f32 %v3304_v24, %v3304_v24  ;;  %3342 = vmatmul.bf16.gmra.mxu1 %v6369_v63  ;;  %v2909_v54 = vpop.f32.mrf.mxu2  ;;  %v3558_v57 = vpop.f32.mrf.mxu3  ;;  %v7219_v63 = vld [vmem:[%s8457_s30 + $0x294] sm:$0xf0] }
 0x2b6   : > { %v6373_v10 = vor.u32 %v7219_v63, %v6372_v62  ;;  %v8916_v33 = vadd.f32 %v3558_v57, %v2909_v54 }
 0x2b7   : > { %v5647_v46 = vadd.f32 %v5646_v59, %v5392_v36 }
 0x2b8   : > { %10105 = vst [vmem:[#allocation8_spill] sm:$0xff] %v8916_v33 }
 0x2b9   : > { %v2656_v49 = vpop.f32.mrf.mxu0 }
 0x2ba   : > { %v3305_v51 = vpop.f32.mrf.mxu1 }
 0x2bb   : > { %v3306_v53 = vadd.f32 %v3305_v51, %v2656_v49 }
 0x2bd   : > { %v7572_v58 = vpack.c.bf16 %v3306_v53, %v3304_v24  ;;  %v5130_v60 = vadd.f32 %v5129_v35, %v3306_v53  ;;  %v5393_v61 = vmul.f32 %v3306_v53, %v3306_v53  ;;  %v2911_v24 = vpop.f32.mrf.mxu2  ;;  %v3560_v35 = vpop.f32.mrf.mxu3  ;;  %v6782_v53 = vld [vmem:[%s8457_s30 + $0x5c8] sm:$0xf0] }
 0x2be   : > { %v8918_v37 = vadd.f32 %v3560_v35, %v2911_v24  ;;  %v6785_v57 = vor.u32 %v7320_v45, %v6782_v53  ;;  %v7220_v24 = vld [vmem:[%s8457_s30 + $0x2a4] sm:$0xf]  ;;  %v6382_v35 = vld [vmem:[%s8457_s30 + $0x2a8] sm:$0xf0] }
 0x2bf   : > { %8080 = vst [vmem:[%s8508_s10 + $0x100] sm:$0xff] %v7572_v58   ;;  %v5648_v59 = vadd.f32 %v5647_v46, %v5393_v61  ;;  %v6781_v46 = vor.u32 %v7321_v42, %v6780_v39  ;;  %v6385_v42 = vor.u32 %v7220_v24, %v6382_v35 }
 0x2c0   : > { %10106 = vst [vmem:[#allocation9_spill] sm:$0xff] %v8918_v37  ;;  %v7827_v54 = vpack.c.bf16 %v8918_v37, %v8916_v33  ;;  %3602 = vmatmul.bf16.gmra.mxu3 %v6785_v57  ;;  %v6788_v57 = vld [vmem:[%s8457_s30 + $0x5d0] sm:$0xf] }
 0x2c1   : > { %v2659_v31 = vpop.f32.mrf.mxu0  ;;  %2953 = vmatmul.bf16.gmra.mxu2 %v6781_v46 }
 0x2c2   : > { %v3308_v32 = vpop.f32.mrf.mxu1  ;;  %8131 = vst [vmem:[%s8508_s10 + $0x298] sm:$0xff] %v7827_v54  }
 0x2c3   : > { %v3309_v36 = vadd.f32 %v3308_v32, %v2659_v31  ;;  %v6380_v31 = vld [vmem:[%s8457_s30 + $0x2a0] sm:$0xf]  ;;  %v7221_v32 = vld [vmem:[%s8457_s30 + $0x2a4] sm:$0xf0] }
 0x2c4   : > { %2698 = vmatmul.bf16.gmra.mxu0 %v6373_v10  ;;  %v6381_v39 = vor.u32 %v7221_v32, %v6380_v31 }
 0x2c5   : > { %v5131_v49 = vadd.f32 %v5130_v60, %v3309_v36  ;;  %v5394_v51 = vmul.f32 %v3309_v36, %v3309_v36  ;;  %3347 = vmatmul.bf16.gmra.mxu1 %v6377_v25  ;;  %v2914_v63 = vpop.f32.mrf.mxu2  ;;  %v3563_v3 = vpop.f32.mrf.mxu3 }
 0x2c6   : > { %v8932_v46 = vadd.f32 %v3563_v3, %v2914_v63 }
 0x2c7   : > { %v5649_v58 = vadd.f32 %v5648_v59, %v5394_v51 }
 0x2c8   : > { %10107 = vst [vmem:[#allocation10_spill] sm:$0xff] %v8932_v46 }
 0x2c9   : > { %v2661_v61 = vpop.f32.mrf.mxu0 }
 0x2ca   : > { %v3310_v60 = vpop.f32.mrf.mxu1 }
 0x2cb   : > { %v3311_v62 = vadd.f32 %v3310_v60, %v2661_v61  ;;  %v7323_v61 = vld [vmem:[%s8457_s30 + $0x5d4] sm:$0xf0]  ;;  %v7322_v60 = vld [vmem:[%s8457_s30 + $0x5d4] sm:$0xf] }
 0x2cd   : > { %v7577_v17 = vpack.c.bf16 %v3311_v62, %v3309_v36  ;;  %v5132_v10 = vadd.f32 %v5131_v49, %v3311_v62  ;;  %v5395_v25 = vmul.f32 %v3311_v62, %v3311_v62  ;;  %v2916_v36 = vpop.f32.mrf.mxu2  ;;  %v3565_v49 = vpop.f32.mrf.mxu3 }
 0x2ce   : > { %v8934_v54 = vadd.f32 %v3565_v49, %v2916_v36  ;;  %v7223_v36 = vld [vmem:[%s8457_s30 + $0x2b4] sm:$0xf0]  ;;  %v7222_v49 = vld [vmem:[%s8457_s30 + $0x2b4] sm:$0xf] }
 0x2cf   : > { %8081 = vst [vmem:[%s8508_s10 + $0x108] sm:$0xff] %v7577_v17   ;;  %v5650_v59 = vadd.f32 %v5649_v58, %v5395_v25  ;;  %v6789_v58 = vor.u32 %v7323_v61, %v6788_v57  ;;  %v6790_v17 = vld [vmem:[%s8457_s30 + $0x5d8] sm:$0xf0] }
 0x2d0   : > { %10108 = vst [vmem:[#allocation11_spill] sm:$0xff] %v8934_v54  ;;  %v7832_v63 = vpack.c.bf16 %v8934_v54, %v8932_v46  ;;  %v6793_v3 = vor.u32 %v7322_v60, %v6790_v17  ;;  %v6390_v57 = vld [vmem:[%s8457_s30 + $0x2b8] sm:$0xf0] }
 0x2d1   : > { %v2664_v45 = vpop.f32.mrf.mxu0  ;;  %2958 = vmatmul.bf16.gmra.mxu2 %v6789_v58  ;;  %v6393_v61 = vor.u32 %v7222_v49, %v6390_v57 }
 0x2d2   : > { %v3313_v51 = vpop.f32.mrf.mxu1  ;;  %8132 = vst [vmem:[%s8508_s10 + $0x2a0] sm:$0xff] %v7832_v63   ;;  %3607 = vmatmul.bf16.gmra.mxu3 %v6793_v3 }
 0x2d3   : > { %v3314_v53 = vadd.f32 %v3313_v51, %v2664_v45  ;;  %v6388_v51 = vld [vmem:[%s8457_s30 + $0x2b0] sm:$0xf] }
 0x2d4   : > { %2703 = vmatmul.bf16.gmra.mxu0 %v6381_v39 }
 0x2d5   : > { %v5133_v62 = vadd.f32 %v5132_v10, %v3314_v53  ;;  %v5396_v37 = vmul.f32 %v3314_v53, %v3314_v53  ;;  %3352 = vmatmul.bf16.gmra.mxu1 %v6385_v42  ;;  %v2919_v24 = vpop.f32.mrf.mxu2  ;;  %v3568_v35 = vpop.f32.mrf.mxu3 }
 0x2d6   : > { %v8948_v17 = vadd.f32 %v3568_v35, %v2919_v24 }
 0x2d7   : > { %v5651_v25 = vadd.f32 %v5650_v59, %v5396_v37  ;;  %v6389_v59 = vor.u32 %v7223_v36, %v6388_v51 }
 0x2d8   : > { %10109 = vst [vmem:[#allocation12_spill] sm:$0xff] %v8948_v17 }
 0x2d9   : > { %v2666_v31 = vpop.f32.mrf.mxu0 }
 0x2da   : > { %v3315_v10 = vpop.f32.mrf.mxu1 }
 0x2db   : > { %v3316_v32 = vadd.f32 %v3315_v10, %v2666_v31  ;;  %v6796_v31 = vld [vmem:[%s8457_s30 + $0x5e0] sm:$0xf]  ;;  %v7325_v10 = vld [vmem:[%s8457_s30 + $0x5e4] sm:$0xf0] }
 0x2dd   : > { %v7582_v39 = vpack.c.bf16 %v3316_v32, %v3314_v53  ;;  %v5134_v42 = vadd.f32 %v5133_v62, %v3316_v32  ;;  %v5397_v45 = vmul.f32 %v3316_v32, %v3316_v32  ;;  %v2921_v53 = vpop.f32.mrf.mxu2  ;;  %v3570_v62 = vpop.f32.mrf.mxu3  ;;  %v7324_v32 = vld [vmem:[%s8457_s30 + $0x5e4] sm:$0xf] }
 0x2de   : > { %v8950_v3 = vadd.f32 %v3570_v62, %v2921_v53  ;;  %v7225_v53 = vld [vmem:[%s8457_s30 + $0x2c4] sm:$0xf0]  ;;  %v7224_v62 = vld [vmem:[%s8457_s30 + $0x2c4] sm:$0xf] }
 0x2df   : > { %8082 = vst [vmem:[%s8508_s10 + $0x110] sm:$0xff] %v7582_v39   ;;  %v5652_v37 = vadd.f32 %v5651_v25, %v5397_v45  ;;  %v6797_v25 = vor.u32 %v7325_v10, %v6796_v31  ;;  %v6798_v39 = vld [vmem:[%s8457_s30 + $0x5e8] sm:$0xf0] }
 0x2e0   : > { %10110 = vst [vmem:[#allocation13_spill] sm:$0xff] %v8950_v3  ;;  %v7837_v24 = vpack.c.bf16 %v8950_v3, %v8948_v17  ;;  %v6801_v35 = vor.u32 %v7324_v32, %v6798_v39  ;;  %v6398_v31 = vld [vmem:[%s8457_s30 + $0x2c8] sm:$0xf0] }
 0x2e1   : > { %v2669_v60 = vpop.f32.mrf.mxu0  ;;  %2963 = vmatmul.bf16.gmra.mxu2 %v6797_v25  ;;  %v6401_v10 = vor.u32 %v7224_v62, %v6398_v31 }
 0x2e2   : > { %v3318_v58 = vpop.f32.mrf.mxu1  ;;  %8133 = vst [vmem:[%s8508_s10 + $0x2a8] sm:$0xff] %v7837_v24   ;;  %3612 = vmatmul.bf16.gmra.mxu3 %v6801_v35 }
 0x2e3   : > { %v3319_v63 = vadd.f32 %v3318_v58, %v2669_v60  ;;  %v6396_v58 = vld [vmem:[%s8457_s30 + $0x2c0] sm:$0xf] }
 0x2e4   : > { %2708 = vmatmul.bf16.gmra.mxu0 %v6389_v59 }
 0x2e5   : > { %v5135_v54 = vadd.f32 %v5134_v42, %v3319_v63  ;;  %v5398_v46 = vmul.f32 %v3319_v63, %v3319_v63  ;;  %3357 = vmatmul.bf16.gmra.mxu1 %v6393_v61  ;;  %v2924_v49 = vpop.f32.mrf.mxu2  ;;  %v3573_v57 = vpop.f32.mrf.mxu3 }
 0x2e6   : > { %v8964_v39 = vadd.f32 %v3573_v57, %v2924_v49 }
 0x2e7   : > { %v5653_v45 = vadd.f32 %v5652_v37, %v5398_v46  ;;  %v6397_v37 = vor.u32 %v7225_v53, %v6396_v58 }
 0x2e8   : > { %10111 = vst [vmem:[#allocation14_spill] sm:$0xff] %v8964_v39 }
 0x2e9   : > { %v2671_v51 = vpop.f32.mrf.mxu0 }
 0x2ea   : > { %v3320_v42 = vpop.f32.mrf.mxu1 }
 0x2eb   : > { %v3321_v36 = vadd.f32 %v3320_v42, %v2671_v51  ;;  %v6804_v51 = vld [vmem:[%s8457_s30 + $0x5f0] sm:$0xf]  ;;  %v7327_v42 = vld [vmem:[%s8457_s30 + $0x5f4] sm:$0xf0] }
 0x2ed   : > { %v7587_v59 = vpack.c.bf16 %v3321_v36, %v3319_v63  ;;  %v5136_v61 = vadd.f32 %v5135_v54, %v3321_v36  ;;  %v5399_v60 = vmul.f32 %v3321_v36, %v3321_v36  ;;  %v2926_v63 = vpop.f32.mrf.mxu2  ;;  %v3575_v54 = vpop.f32.mrf.mxu3  ;;  %v7326_v36 = vld [vmem:[%s8457_s30 + $0x5f4] sm:$0xf] }
 0x2ee   : > { %v8966_v35 = vadd.f32 %v3575_v54, %v2926_v63  ;;  %v7227_v63 = vld [vmem:[%s8457_s30 + $0x2d4] sm:$0xf0]  ;;  %v7226_v54 = vld [vmem:[%s8457_s30 + $0x2d4] sm:$0xf] }
 0x2ef   : > { %8083 = vst [vmem:[%s8508_s10 + $0x118] sm:$0xff] %v7587_v59   ;;  %v5654_v46 = vadd.f32 %v5653_v45, %v5399_v60  ;;  %v6805_v45 = vor.u32 %v7327_v42, %v6804_v51  ;;  %v6806_v59 = vld [vmem:[%s8457_s30 + $0x5f8] sm:$0xf0] }
 0x2f0   : > { %10112 = vst [vmem:[#allocation15_spill] sm:$0xff] %v8966_v35  ;;  %v7842_v49 = vpack.c.bf16 %v8966_v35, %v8964_v39  ;;  %v6809_v57 = vor.u32 %v7326_v36, %v6806_v59  ;;  %v6406_v51 = vld [vmem:[%s8457_s30 + $0x2d8] sm:$0xf0] }
 0x2f1   : > { %v2674_v32 = vpop.f32.mrf.mxu0  ;;  %2968 = vmatmul.bf16.gmra.mxu2 %v6805_v45  ;;  %v6409_v42 = vor.u32 %v7226_v54, %v6406_v51 }
 0x2f2   : > { %v3323_v25 = vpop.f32.mrf.mxu1  ;;  %8134 = vst [vmem:[%s8508_s10 + $0x2b0] sm:$0xff] %v7842_v49   ;;  %3617 = vmatmul.bf16.gmra.mxu3 %v6809_v57 }
 0x2f3   : > { %v3324_v24 = vadd.f32 %v3323_v25, %v2674_v32  ;;  %v6404_v25 = vld [vmem:[%s8457_s30 + $0x2d0] sm:$0xf] }
 0x2f4   : > { %2713 = vmatmul.bf16.gmra.mxu0 %v6397_v37 }
 0x2f5   : > { %v5137_v3 = vadd.f32 %v5136_v61, %v3324_v24  ;;  %v5400_v17 = vmul.f32 %v3324_v24, %v3324_v24  ;;  %3362 = vmatmul.bf16.gmra.mxu1 %v6401_v10  ;;  %v2929_v62 = vpop.f32.mrf.mxu2  ;;  %v3578_v31 = vpop.f32.mrf.mxu3 }
 0x2f6   : > { %v8980_v59 = vadd.f32 %v3578_v31, %v2929_v62 }
 0x2f7   : > { %v5655_v60 = vadd.f32 %v5654_v46, %v5400_v17  ;;  %v6405_v46 = vor.u32 %v7227_v63, %v6404_v25 }
 0x2f8   : > { %10113 = vst [vmem:[#allocation16_spill] sm:$0xff] %v8980_v59 }
 0x2f9   : > { %v2676_v58 = vpop.f32.mrf.mxu0 }
 0x2fa   : > { %v3325_v61 = vpop.f32.mrf.mxu1 }
 0x2fb   : > { %v3326_v53 = vadd.f32 %v3325_v61, %v2676_v58  ;;  %v6812_v58 = vld [vmem:[%s8457_s30 + $0x600] sm:$0xf]  ;;  %v7329_v61 = vld [vmem:[%s8457_s30 + $0x604] sm:$0xf0] }
 0x2fd   : > { %v7592_v37 = vpack.c.bf16 %v3326_v53, %v3324_v24  ;;  %v5138_v10 = vadd.f32 %v5137_v3, %v3326_v53  ;;  %v5401_v32 = vmul.f32 %v3326_v53, %v3326_v53  ;;  %v2931_v24 = vpop.f32.mrf.mxu2  ;;  %v3580_v3 = vpop.f32.mrf.mxu3  ;;  %v7328_v53 = vld [vmem:[%s8457_s30 + $0x604] sm:$0xf] }
 0x2fe   : > { %v8982_v57 = vadd.f32 %v3580_v3, %v2931_v24  ;;  %v7229_v24 = vld [vmem:[%s8457_s30 + $0x2e4] sm:$0xf0]  ;;  %v7228_v3 = vld [vmem:[%s8457_s30 + $0x2e4] sm:$0xf] }
 0x2ff   : > { %8084 = vst [vmem:[%s8508_s10 + $0x120] sm:$0xff] %v7592_v37   ;;  %v5656_v17 = vadd.f32 %v5655_v60, %v5401_v32  ;;  %v6813_v60 = vor.u32 %v7329_v61, %v6812_v58  ;;  %v6814_v37 = vld [vmem:[%s8457_s30 + $0x608] sm:$0xf0] }
 0x300   : > { %10114 = vst [vmem:[#allocation17_spill] sm:$0xff] %v8982_v57  ;;  %v7847_v62 = vpack.c.bf16 %v8982_v57, %v8980_v59  ;;  %v6817_v31 = vor.u32 %v7328_v53, %v6814_v37  ;;  %v6414_v58 = vld [vmem:[%s8457_s30 + $0x2e8] sm:$0xf0] }
 0x301   : > { %v2679_v36 = vpop.f32.mrf.mxu0  ;;  %2973 = vmatmul.bf16.gmra.mxu2 %v6813_v60  ;;  %v6417_v61 = vor.u32 %v7228_v3, %v6414_v58 }
 0x302   : > { %v3328_v45 = vpop.f32.mrf.mxu1  ;;  %8135 = vst [vmem:[%s8508_s10 + $0x2b8] sm:$0xff] %v7847_v62   ;;  %3622 = vmatmul.bf16.gmra.mxu3 %v6817_v31 }
 0x303   : > { %v3329_v49 = vadd.f32 %v3328_v45, %v2679_v36  ;;  %v6412_v45 = vld [vmem:[%s8457_s30 + $0x2e0] sm:$0xf] }
 0x304   : > { %2718 = vmatmul.bf16.gmra.mxu0 %v6405_v46 }
 0x305   : > { %v5139_v35 = vadd.f32 %v5138_v10, %v3329_v49  ;;  %v5402_v39 = vmul.f32 %v3329_v49, %v3329_v49  ;;  %3367 = vmatmul.bf16.gmra.mxu1 %v6409_v42  ;;  %v2934_v54 = vpop.f32.mrf.mxu2  ;;  %v3583_v51 = vpop.f32.mrf.mxu3 }
 0x306   : > { %v8996_v37 = vadd.f32 %v3583_v51, %v2934_v54 }
 0x307   : > { %v5657_v32 = vadd.f32 %v5656_v17, %v5402_v39  ;;  %v6413_v17 = vor.u32 %v7229_v24, %v6412_v45 }
 0x308   : > { %10115 = vst [vmem:[#allocation18_spill] sm:$0xff] %v8996_v37 }
 0x309   : > { %v2681_v25 = vpop.f32.mrf.mxu0 }
 0x30a   : > { %v3330_v10 = vpop.f32.mrf.mxu1 }
 0x30b   : > { %v3331_v63 = vadd.f32 %v3330_v10, %v2681_v25  ;;  %v6820_v25 = vld [vmem:[%s8457_s30 + $0x610] sm:$0xf]  ;;  %v7331_v10 = vld [vmem:[%s8457_s30 + $0x614] sm:$0xf0] }
 0x30d   : > { %v7597_v46 = vpack.c.bf16 %v3331_v63, %v3329_v49  ;;  %v5140_v42 = vadd.f32 %v5139_v35, %v3331_v63  ;;  %v5403_v36 = vmul.f32 %v3331_v63, %v3331_v63  ;;  %v2936_v49 = vpop.f32.mrf.mxu2  ;;  %v3585_v35 = vpop.f32.mrf.mxu3  ;;  %v7330_v63 = vld [vmem:[%s8457_s30 + $0x614] sm:$0xf] }
 0x30e   : > { %v8998_v31 = vadd.f32 %v3585_v35, %v2936_v49  ;;  %v7231_v49 = vld [vmem:[%s8457_s30 + $0x2f4] sm:$0xf0]  ;;  %v7230_v35 = vld [vmem:[%s8457_s30 + $0x2f4] sm:$0xf] }
 0x30f   : > { %8085 = vst [vmem:[%s8508_s10 + $0x128] sm:$0xff] %v7597_v46   ;;  %v5658_v39 = vadd.f32 %v5657_v32, %v5403_v36  ;;  %v6821_v32 = vor.u32 %v7331_v10, %v6820_v25  ;;  %v6822_v46 = vld [vmem:[%s8457_s30 + $0x618] sm:$0xf0] }
 0x310   : > { %10116 = vst [vmem:[#allocation19_spill] sm:$0xff] %v8998_v31  ;;  %v7852_v54 = vpack.c.bf16 %v8998_v31, %v8996_v37  ;;  %v6825_v51 = vor.u32 %v7330_v63, %v6822_v46  ;;  %v6422_v25 = vld [vmem:[%s8457_s30 + $0x2f8] sm:$0xf0] }
 0x311   : > { %v2684_v53 = vpop.f32.mrf.mxu0  ;;  %2978 = vmatmul.bf16.gmra.mxu2 %v6821_v32  ;;  %v6425_v10 = vor.u32 %v7230_v35, %v6422_v25 }
 0x312   : > { %v3333_v60 = vpop.f32.mrf.mxu1  ;;  %8136 = vst [vmem:[%s8508_s10 + $0x2c0] sm:$0xff] %v7852_v54   ;;  %3627 = vmatmul.bf16.gmra.mxu3 %v6825_v51 }
 0x313   : > { %v3334_v62 = vadd.f32 %v3333_v60, %v2684_v53  ;;  %v6420_v60 = vld [vmem:[%s8457_s30 + $0x2f0] sm:$0xf] }
 0x314   : > { %2723 = vmatmul.bf16.gmra.mxu0 %v6413_v17 }
 0x315   : > { %v5141_v57 = vadd.f32 %v5140_v42, %v3334_v62  ;;  %v5404_v59 = vmul.f32 %v3334_v62, %v3334_v62  ;;  %3372 = vmatmul.bf16.gmra.mxu1 %v6417_v61  ;;  %v2939_v3 = vpop.f32.mrf.mxu2  ;;  %v3588_v58 = vpop.f32.mrf.mxu3 }
 0x316   : > { %v9012_v46 = vadd.f32 %v3588_v58, %v2939_v3 }
 0x317   : > { %v5659_v36 = vadd.f32 %v5658_v39, %v5404_v59  ;;  %v6421_v39 = vor.u32 %v7231_v49, %v6420_v60 }
 0x318   : > { %10117 = vst [vmem:[#allocation20_spill] sm:$0xff] %v9012_v46 }
 0x319   : > { %v2686_v45 = vpop.f32.mrf.mxu0 }
 0x31a   : > { %v3335_v42 = vpop.f32.mrf.mxu1 }
 0x31b   : > { %v3336_v24 = vadd.f32 %v3335_v42, %v2686_v45  ;;  %v6828_v45 = vld [vmem:[%s8457_s30 + $0x620] sm:$0xf]  ;;  %v7333_v42 = vld [vmem:[%s8457_s30 + $0x624] sm:$0xf0] }
 0x31d   : > { %v7602_v17 = vpack.c.bf16 %v3336_v24, %v3334_v62  ;;  %v5142_v61 = vadd.f32 %v5141_v57, %v3336_v24  ;;  %v5405_v53 = vmul.f32 %v3336_v24, %v3336_v24  ;;  %v2941_v62 = vpop.f32.mrf.mxu2  ;;  %v3590_v57 = vpop.f32.mrf.mxu3  ;;  %v7332_v24 = vld [vmem:[%s8457_s30 + $0x624] sm:$0xf] }
 0x31e   : > { %v9014_v51 = vadd.f32 %v3590_v57, %v2941_v62  ;;  %v7233_v62 = vld [vmem:[%s8457_s30 + $0x304] sm:$0xf0]  ;;  %v7232_v57 = vld [vmem:[%s8457_s30 + $0x304] sm:$0xf] }
 0x31f   : > { %8086 = vst [vmem:[%s8508_s10 + $0x130] sm:$0xff] %v7602_v17   ;;  %v5660_v59 = vadd.f32 %v5659_v36, %v5405_v53  ;;  %v6829_v36 = vor.u32 %v7333_v42, %v6828_v45  ;;  %v6830_v17 = vld [vmem:[%s8457_s30 + $0x628] sm:$0xf0] }
 0x320   : > { %10118 = vst [vmem:[#allocation21_spill] sm:$0xff] %v9014_v51  ;;  %v7857_v3 = vpack.c.bf16 %v9014_v51, %v9012_v46  ;;  %v6833_v58 = vor.u32 %v7332_v24, %v6830_v17  ;;  %v6430_v45 = vld [vmem:[%s8457_s30 + $0x308] sm:$0xf0] }
 0x321   : > { %v2689_v63 = vpop.f32.mrf.mxu0  ;;  %2983 = vmatmul.bf16.gmra.mxu2 %v6829_v36  ;;  %v6433_v42 = vor.u32 %v7232_v57, %v6430_v45 }
 0x322   : > { %v3338_v32 = vpop.f32.mrf.mxu1  ;;  %8137 = vst [vmem:[%s8508_s10 + $0x2c8] sm:$0xff] %v7857_v3   ;;  %3632 = vmatmul.bf16.gmra.mxu3 %v6833_v58 }
 0x323   : > { %v3339_v54 = vadd.f32 %v3338_v32, %v2689_v63  ;;  %v6428_v32 = vld [vmem:[%s8457_s30 + $0x300] sm:$0xf] }
 0x324   : > { %2728 = vmatmul.bf16.gmra.mxu0 %v6421_v39 }
 0x325   : > { %v5143_v31 = vadd.f32 %v5142_v61, %v3339_v54  ;;  %v5406_v37 = vmul.f32 %v3339_v54, %v3339_v54  ;;  %3377 = vmatmul.bf16.gmra.mxu1 %v6425_v10  ;;  %v2944_v35 = vpop.f32.mrf.mxu2  ;;  %v3593_v25 = vpop.f32.mrf.mxu3 }
 0x326   : > { %v9028_v17 = vadd.f32 %v3593_v25, %v2944_v35 }
 0x327   : > { %v5661_v53 = vadd.f32 %v5660_v59, %v5406_v37  ;;  %v6429_v59 = vor.u32 %v7233_v62, %v6428_v32 }
 0x328   : > { %10119 = vst [vmem:[#allocation22_spill] sm:$0xff] %v9028_v17 }
 0x329   : > { %v2691_v60 = vpop.f32.mrf.mxu0 }
 0x32a   : > { %v3340_v61 = vpop.f32.mrf.mxu1 }
 0x32b   : > { %v3341_v49 = vadd.f32 %v3340_v61, %v2691_v60  ;;  %v6836_v60 = vld [vmem:[%s8457_s30 + $0x630] sm:$0xf]  ;;  %v7335_v61 = vld [vmem:[%s8457_s30 + $0x634] sm:$0xf0] }
 0x32d   : > { %v7607_v39 = vpack.c.bf16 %v3341_v49, %v3339_v54  ;;  %v5144_v10 = vadd.f32 %v5143_v31, %v3341_v49  ;;  %v5407_v63 = vmul.f32 %v3341_v49, %v3341_v49  ;;  %v2946_v54 = vpop.f32.mrf.mxu2  ;;  %v3595_v31 = vpop.f32.mrf.mxu3  ;;  %v7334_v49 = vld [vmem:[%s8457_s30 + $0x634] sm:$0xf] }
 0x32e   : > { %v9030_v58 = vadd.f32 %v3595_v31, %v2946_v54  ;;  %v7235_v54 = vld [vmem:[%s8457_s30 + $0x314] sm:$0xf0]  ;;  %v7234_v31 = vld [vmem:[%s8457_s30 + $0x314] sm:$0xf] }
 0x32f   : > { %8087 = vst [vmem:[%s8508_s10 + $0x138] sm:$0xff] %v7607_v39   ;;  %v5662_v37 = vadd.f32 %v5661_v53, %v5407_v63  ;;  %v6837_v53 = vor.u32 %v7335_v61, %v6836_v60  ;;  %v6838_v39 = vld [vmem:[%s8457_s30 + $0x638] sm:$0xf0] }
 0x330   : > { %10120 = vst [vmem:[#allocation23_spill] sm:$0xff] %v9030_v58  ;;  %v7862_v35 = vpack.c.bf16 %v9030_v58, %v9028_v17  ;;  %v6841_v25 = vor.u32 %v7334_v49, %v6838_v39  ;;  %v6438_v60 = vld [vmem:[%s8457_s30 + $0x318] sm:$0xf0] }
 0x331   : > { %v2694_v24 = vpop.f32.mrf.mxu0  ;;  %2988 = vmatmul.bf16.gmra.mxu2 %v6837_v53  ;;  %v6441_v61 = vor.u32 %v7234_v31, %v6438_v60 }
 0x332   : > { %v3343_v36 = vpop.f32.mrf.mxu1  ;;  %8138 = vst [vmem:[%s8508_s10 + $0x2d0] sm:$0xff] %v7862_v35   ;;  %3637 = vmatmul.bf16.gmra.mxu3 %v6841_v25 }
 0x333   : > { %v3344_v3 = vadd.f32 %v3343_v36, %v2694_v24  ;;  %v6436_v36 = vld [vmem:[%s8457_s30 + $0x310] sm:$0xf] }
 0x334   : > { %2733 = vmatmul.bf16.gmra.mxu0 %v6429_v59 }
 0x335   : > { %v5145_v51 = vadd.f32 %v5144_v10, %v3344_v3  ;;  %v5408_v46 = vmul.f32 %v3344_v3, %v3344_v3  ;;  %3382 = vmatmul.bf16.gmra.mxu1 %v6433_v42  ;;  %v2949_v57 = vpop.f32.mrf.mxu2  ;;  %v3598_v45 = vpop.f32.mrf.mxu3 }
 0x336   : > { %v9044_v39 = vadd.f32 %v3598_v45, %v2949_v57 }
 0x337   : > { %v5663_v63 = vadd.f32 %v5662_v37, %v5408_v46  ;;  %v6437_v37 = vor.u32 %v7235_v54, %v6436_v36 }
 0x338   : > { %10121 = vst [vmem:[#allocation24_spill] sm:$0xff] %v9044_v39 }
 0x339   : > { %v2696_v32 = vpop.f32.mrf.mxu0 }
 0x33a   : > { %v3345_v10 = vpop.f32.mrf.mxu1 }
 0x33b   : > { %v3346_v62 = vadd.f32 %v3345_v10, %v2696_v32  ;;  %v6844_v32 = vld [vmem:[%s8457_s30 + $0x640] sm:$0xf]  ;;  %v7337_v10 = vld [vmem:[%s8457_s30 + $0x644] sm:$0xf0] }
 0x33d   : > { %v7612_v59 = vpack.c.bf16 %v3346_v62, %v3344_v3  ;;  %v5146_v42 = vadd.f32 %v5145_v51, %v3346_v62  ;;  %v5409_v24 = vmul.f32 %v3346_v62, %v3346_v62  ;;  %v2951_v3 = vpop.f32.mrf.mxu2  ;;  %v3600_v51 = vpop.f32.mrf.mxu3  ;;  %v7336_v62 = vld [vmem:[%s8457_s30 + $0x644] sm:$0xf] }
 0x33e   : > { %v9046_v25 = vadd.f32 %v3600_v51, %v2951_v3  ;;  %v7237_v3 = vld [vmem:[%s8457_s30 + $0x324] sm:$0xf0]  ;;  %v7236_v51 = vld [vmem:[%s8457_s30 + $0x324] sm:$0xf] }
 0x33f   : > { %8088 = vst [vmem:[%s8508_s10 + $0x140] sm:$0xff] %v7612_v59   ;;  %v5664_v46 = vadd.f32 %v5663_v63, %v5409_v24  ;;  %v6845_v63 = vor.u32 %v7337_v10, %v6844_v32  ;;  %v6846_v59 = vld [vmem:[%s8457_s30 + $0x648] sm:$0xf0] }
 0x340   : > { %10122 = vst [vmem:[#allocation25_spill] sm:$0xff] %v9046_v25  ;;  %v7867_v57 = vpack.c.bf16 %v9046_v25, %v9044_v39  ;;  %v6849_v45 = vor.u32 %v7336_v62, %v6846_v59  ;;  %v6446_v32 = vld [vmem:[%s8457_s30 + $0x328] sm:$0xf0] }
 0x341   : > { %v2699_v49 = vpop.f32.mrf.mxu0  ;;  %2993 = vmatmul.bf16.gmra.mxu2 %v6845_v63  ;;  %v6449_v10 = vor.u32 %v7236_v51, %v6446_v32 }
 0x342   : > { %v3348_v53 = vpop.f32.mrf.mxu1  ;;  %8139 = vst [vmem:[%s8508_s10 + $0x2d8] sm:$0xff] %v7867_v57   ;;  %3642 = vmatmul.bf16.gmra.mxu3 %v6849_v45 }
 0x343   : > { %v3349_v35 = vadd.f32 %v3348_v53, %v2699_v49  ;;  %v6444_v53 = vld [vmem:[%s8457_s30 + $0x320] sm:$0xf] }
 0x344   : > { %2738 = vmatmul.bf16.gmra.mxu0 %v6437_v37 }
 0x345   : > { %v5147_v58 = vadd.f32 %v5146_v42, %v3349_v35  ;;  %v5410_v17 = vmul.f32 %v3349_v35, %v3349_v35  ;;  %3387 = vmatmul.bf16.gmra.mxu1 %v6441_v61  ;;  %v2954_v31 = vpop.f32.mrf.mxu2  ;;  %v3603_v60 = vpop.f32.mrf.mxu3 }
 0x346   : > { %v9060_v59 = vadd.f32 %v3603_v60, %v2954_v31 }
 0x347   : > { %v5665_v24 = vadd.f32 %v5664_v46, %v5410_v17  ;;  %v6445_v46 = vor.u32 %v7237_v3, %v6444_v53 }
 0x348   : > { %10123 = vst [vmem:[#allocation26_spill] sm:$0xff] %v9060_v59 }
 0x349   : > { %v2701_v36 = vpop.f32.mrf.mxu0 }
 0x34a   : > { %v3350_v42 = vpop.f32.mrf.mxu1 }
 0x34b   : > { %v3351_v54 = vadd.f32 %v3350_v42, %v2701_v36  ;;  %v6852_v36 = vld [vmem:[%s8457_s30 + $0x650] sm:$0xf]  ;;  %v7339_v42 = vld [vmem:[%s8457_s30 + $0x654] sm:$0xf0] }
 0x34d   : > { %v7617_v37 = vpack.c.bf16 %v3351_v54, %v3349_v35  ;;  %v5148_v61 = vadd.f32 %v5147_v58, %v3351_v54  ;;  %v5411_v49 = vmul.f32 %v3351_v54, %v3351_v54  ;;  %v2956_v35 = vpop.f32.mrf.mxu2  ;;  %v3605_v58 = vpop.f32.mrf.mxu3  ;;  %v7338_v54 = vld [vmem:[%s8457_s30 + $0x654] sm:$0xf] }
 0x34e   : > { %v9062_v45 = vadd.f32 %v3605_v58, %v2956_v35  ;;  %v7239_v35 = vld [vmem:[%s8457_s30 + $0x334] sm:$0xf0]  ;;  %v7238_v58 = vld [vmem:[%s8457_s30 + $0x334] sm:$0xf] }
 0x34f   : > { %8089 = vst [vmem:[%s8508_s10 + $0x148] sm:$0xff] %v7617_v37   ;;  %v5666_v17 = vadd.f32 %v5665_v24, %v5411_v49  ;;  %v6853_v24 = vor.u32 %v7339_v42, %v6852_v36  ;;  %v6854_v37 = vld [vmem:[%s8457_s30 + $0x658] sm:$0xf0] }
 0x350   : > { %10124 = vst [vmem:[#allocation27_spill] sm:$0xff] %v9062_v45  ;;  %v7872_v31 = vpack.c.bf16 %v9062_v45, %v9060_v59  ;;  %v6857_v60 = vor.u32 %v7338_v54, %v6854_v37  ;;  %v6454_v36 = vld [vmem:[%s8457_s30 + $0x338] sm:$0xf0] }
 0x351   : > { %v2704_v62 = vpop.f32.mrf.mxu0  ;;  %2998 = vmatmul.bf16.gmra.mxu2 %v6853_v24  ;;  %v6457_v42 = vor.u32 %v7238_v58, %v6454_v36 }
 0x352   : > { %v3353_v63 = vpop.f32.mrf.mxu1  ;;  %8140 = vst [vmem:[%s8508_s10 + $0x2e0] sm:$0xff] %v7872_v31   ;;  %3647 = vmatmul.bf16.gmra.mxu3 %v6857_v60 }
 0x353   : > { %v3354_v57 = vadd.f32 %v3353_v63, %v2704_v62  ;;  %v6452_v63 = vld [vmem:[%s8457_s30 + $0x330] sm:$0xf] }
 0x354   : > { %2743 = vmatmul.bf16.gmra.mxu0 %v6445_v46 }
 0x355   : > { %v5149_v25 = vadd.f32 %v5148_v61, %v3354_v57  ;;  %v5412_v39 = vmul.f32 %v3354_v57, %v3354_v57  ;;  %3392 = vmatmul.bf16.gmra.mxu1 %v6449_v10  ;;  %v2959_v51 = vpop.f32.mrf.mxu2  ;;  %v3608_v32 = vpop.f32.mrf.mxu3 }
 0x356   : > { %v9076_v37 = vadd.f32 %v3608_v32, %v2959_v51 }
 0x357   : > { %v5667_v49 = vadd.f32 %v5666_v17, %v5412_v39  ;;  %v6453_v17 = vor.u32 %v7239_v35, %v6452_v63 }
 0x358   : > { %10125 = vst [vmem:[#allocation28_spill] sm:$0xff] %v9076_v37 }
 0x359   : > { %v2706_v53 = vpop.f32.mrf.mxu0 }
 0x35a   : > { %v3355_v61 = vpop.f32.mrf.mxu1 }
 0x35b   : > { %v3356_v3 = vadd.f32 %v3355_v61, %v2706_v53  ;;  %v6860_v53 = vld [vmem:[%s8457_s30 + $0x660] sm:$0xf]  ;;  %v7341_v61 = vld [vmem:[%s8457_s30 + $0x664] sm:$0xf0] }
 0x35d   : > { %v7622_v46 = vpack.c.bf16 %v3356_v3, %v3354_v57  ;;  %v5150_v10 = vadd.f32 %v5149_v25, %v3356_v3  ;;  %v5413_v62 = vmul.f32 %v3356_v3, %v3356_v3  ;;  %v2961_v57 = vpop.f32.mrf.mxu2  ;;  %v3610_v25 = vpop.f32.mrf.mxu3  ;;  %v7340_v3 = vld [vmem:[%s8457_s30 + $0x664] sm:$0xf] }
 0x35e   : > { %v9078_v60 = vadd.f32 %v3610_v25, %v2961_v57  ;;  %v7241_v57 = vld [vmem:[%s8457_s30 + $0x344] sm:$0xf0]  ;;  %v7240_v25 = vld [vmem:[%s8457_s30 + $0x344] sm:$0xf] }
 0x35f   : > { %8090 = vst [vmem:[%s8508_s10 + $0x150] sm:$0xff] %v7622_v46   ;;  %v5668_v39 = vadd.f32 %v5667_v49, %v5413_v62  ;;  %v6861_v49 = vor.u32 %v7341_v61, %v6860_v53  ;;  %v6862_v46 = vld [vmem:[%s8457_s30 + $0x668] sm:$0xf0] }
 0x360   : > { %10126 = vst [vmem:[#allocation29_spill] sm:$0xff] %v9078_v60  ;;  %v7877_v51 = vpack.c.bf16 %v9078_v60, %v9076_v37  ;;  %v6865_v32 = vor.u32 %v7340_v3, %v6862_v46  ;;  %v6462_v53 = vld [vmem:[%s8457_s30 + $0x348] sm:$0xf0] }
 0x361   : > { %v2709_v54 = vpop.f32.mrf.mxu0  ;;  %3003 = vmatmul.bf16.gmra.mxu2 %v6861_v49  ;;  %v6465_v61 = vor.u32 %v7240_v25, %v6462_v53 }
 0x362   : > { %v3358_v24 = vpop.f32.mrf.mxu1  ;;  %8141 = vst [vmem:[%s8508_s10 + $0x2e8] sm:$0xff] %v7877_v51   ;;  %3652 = vmatmul.bf16.gmra.mxu3 %v6865_v32 }
 0x363   : > { %v3359_v31 = vadd.f32 %v3358_v24, %v2709_v54  ;;  %v6460_v24 = vld [vmem:[%s8457_s30 + $0x340] sm:$0xf] }
 0x364   : > { %2748 = vmatmul.bf16.gmra.mxu0 %v6453_v17 }
 0x365   : > { %v5151_v45 = vadd.f32 %v5150_v10, %v3359_v31  ;;  %v5414_v59 = vmul.f32 %v3359_v31, %v3359_v31  ;;  %3397 = vmatmul.bf16.gmra.mxu1 %v6457_v42  ;;  %v2964_v58 = vpop.f32.mrf.mxu2  ;;  %v3613_v36 = vpop.f32.mrf.mxu3 }
 0x366   : > { %v9092_v46 = vadd.f32 %v3613_v36, %v2964_v58 }
 0x367   : > { %v5669_v62 = vadd.f32 %v5668_v39, %v5414_v59  ;;  %v6461_v39 = vor.u32 %v7241_v57, %v6460_v24 }
 0x368   : > { %10127 = vst [vmem:[#allocation30_spill] sm:$0xff] %v9092_v46 }
 0x369   : > { %v2711_v63 = vpop.f32.mrf.mxu0 }
 0x36a   : > { %v3360_v10 = vpop.f32.mrf.mxu1 }
 0x36b   : > { %v3361_v35 = vadd.f32 %v3360_v10, %v2711_v63  ;;  %v6868_v63 = vld [vmem:[%s8457_s30 + $0x670] sm:$0xf]  ;;  %v7343_v10 = vld [vmem:[%s8457_s30 + $0x674] sm:$0xf0] }
 0x36d   : > { %v7627_v17 = vpack.c.bf16 %v3361_v35, %v3359_v31  ;;  %v5152_v42 = vadd.f32 %v5151_v45, %v3361_v35  ;;  %v5415_v54 = vmul.f32 %v3361_v35, %v3361_v35  ;;  %v2966_v31 = vpop.f32.mrf.mxu2  ;;  %v3615_v45 = vpop.f32.mrf.mxu3  ;;  %v7342_v35 = vld [vmem:[%s8457_s30 + $0x674] sm:$0xf] }
 0x36e   : > { %v9094_v32 = vadd.f32 %v3615_v45, %v2966_v31  ;;  %v7243_v31 = vld [vmem:[%s8457_s30 + $0x354] sm:$0xf0]  ;;  %v7242_v45 = vld [vmem:[%s8457_s30 + $0x354] sm:$0xf] }
 0x36f   : > { %8091 = vst [vmem:[%s8508_s10 + $0x158] sm:$0xff] %v7627_v17   ;;  %v5670_v59 = vadd.f32 %v5669_v62, %v5415_v54  ;;  %v6869_v62 = vor.u32 %v7343_v10, %v6868_v63  ;;  %v6870_v17 = vld [vmem:[%s8457_s30 + $0x678] sm:$0xf0] }
 0x370   : > { %10128 = vst [vmem:[#allocation31_spill] sm:$0xff] %v9094_v32  ;;  %v7882_v58 = vpack.c.bf16 %v9094_v32, %v9092_v46  ;;  %v6873_v36 = vor.u32 %v7342_v35, %v6870_v17  ;;  %v6470_v63 = vld [vmem:[%s8457_s30 + $0x358] sm:$0xf0] }
 0x371   : > { %v2714_v3 = vpop.f32.mrf.mxu0  ;;  %3008 = vmatmul.bf16.gmra.mxu2 %v6869_v62  ;;  %v6473_v10 = vor.u32 %v7242_v45, %v6470_v63 }
 0x372   : > { %v3363_v49 = vpop.f32.mrf.mxu1  ;;  %8142 = vst [vmem:[%s8508_s10 + $0x2f0] sm:$0xff] %v7882_v58   ;;  %3657 = vmatmul.bf16.gmra.mxu3 %v6873_v36 }
 0x373   : > { %v3364_v51 = vadd.f32 %v3363_v49, %v2714_v3  ;;  %v6468_v49 = vld [vmem:[%s8457_s30 + $0x350] sm:$0xf] }
 0x374   : > { %2753 = vmatmul.bf16.gmra.mxu0 %v6461_v39 }
 0x375   : > { %v5153_v60 = vadd.f32 %v5152_v42, %v3364_v51  ;;  %v5416_v37 = vmul.f32 %v3364_v51, %v3364_v51  ;;  %3402 = vmatmul.bf16.gmra.mxu1 %v6465_v61  ;;  %v2969_v25 = vpop.f32.mrf.mxu2  ;;  %v3618_v53 = vpop.f32.mrf.mxu3 }
 0x376   : > { %v9108_v17 = vadd.f32 %v3618_v53, %v2969_v25 }
 0x377   : > { %v5671_v54 = vadd.f32 %v5670_v59, %v5416_v37  ;;  %v6469_v59 = vor.u32 %v7243_v31, %v6468_v49 }
 0x378   : > { %10129 = vst [vmem:[#allocation32_spill] sm:$0xff] %v9108_v17 }
 0x379   : > { %v2716_v24 = vpop.f32.mrf.mxu0 }
 0x37a   : > { %v3365_v42 = vpop.f32.mrf.mxu1 }
 0x37b   : > { %v3366_v57 = vadd.f32 %v3365_v42, %v2716_v24  ;;  %v6876_v24 = vld [vmem:[%s8457_s30 + $0x680] sm:$0xf]  ;;  %v7345_v42 = vld [vmem:[%s8457_s30 + $0x684] sm:$0xf0] }
 0x37d   : > { %v7632_v39 = vpack.c.bf16 %v3366_v57, %v3364_v51  ;;  %v5154_v61 = vadd.f32 %v5153_v60, %v3366_v57  ;;  %v5417_v3 = vmul.f32 %v3366_v57, %v3366_v57  ;;  %v2971_v51 = vpop.f32.mrf.mxu2  ;;  %v3620_v60 = vpop.f32.mrf.mxu3  ;;  %v7344_v57 = vld [vmem:[%s8457_s30 + $0x684] sm:$0xf] }
 0x37e   : > { %v9110_v36 = vadd.f32 %v3620_v60, %v2971_v51  ;;  %v7245_v51 = vld [vmem:[%s8457_s30 + $0x364] sm:$0xf0]  ;;  %v7244_v60 = vld [vmem:[%s8457_s30 + $0x364] sm:$0xf] }
 0x37f   : > { %8092 = vst [vmem:[%s8508_s10 + $0x160] sm:$0xff] %v7632_v39   ;;  %v5672_v37 = vadd.f32 %v5671_v54, %v5417_v3  ;;  %v6877_v54 = vor.u32 %v7345_v42, %v6876_v24  ;;  %v6878_v39 = vld [vmem:[%s8457_s30 + $0x688] sm:$0xf0] }
 0x380   : > { %10130 = vst [vmem:[#allocation33_spill] sm:$0xff] %v9110_v36  ;;  %v7887_v25 = vpack.c.bf16 %v9110_v36, %v9108_v17  ;;  %v6881_v53 = vor.u32 %v7344_v57, %v6878_v39  ;;  %v6478_v24 = vld [vmem:[%s8457_s30 + $0x368] sm:$0xf0] }
 0x381   : > { %v2719_v35 = vpop.f32.mrf.mxu0  ;;  %3013 = vmatmul.bf16.gmra.mxu2 %v6877_v54  ;;  %v6481_v42 = vor.u32 %v7244_v60, %v6478_v24 }
 0x382   : > { %v3368_v62 = vpop.f32.mrf.mxu1  ;;  %8143 = vst [vmem:[%s8508_s10 + $0x2f8] sm:$0xff] %v7887_v25   ;;  %3662 = vmatmul.bf16.gmra.mxu3 %v6881_v53 }
 0x383   : > { %v3369_v58 = vadd.f32 %v3368_v62, %v2719_v35  ;;  %v6476_v62 = vld [vmem:[%s8457_s30 + $0x360] sm:$0xf] }
 0x384   : > { %2758 = vmatmul.bf16.gmra.mxu0 %v6469_v59 }
 0x385   : > { %v5155_v32 = vadd.f32 %v5154_v61, %v3369_v58  ;;  %v5418_v46 = vmul.f32 %v3369_v58, %v3369_v58  ;;  %3407 = vmatmul.bf16.gmra.mxu1 %v6473_v10  ;;  %v2974_v45 = vpop.f32.mrf.mxu2  ;;  %v3623_v63 = vpop.f32.mrf.mxu3 }
 0x386   : > { %v9124_v39 = vadd.f32 %v3623_v63, %v2974_v45 }
 0x387   : > { %v5673_v3 = vadd.f32 %v5672_v37, %v5418_v46  ;;  %v6477_v37 = vor.u32 %v7245_v51, %v6476_v62 }
 0x388   : > { %10131 = vst [vmem:[#allocation34_spill] sm:$0xff] %v9124_v39 }
 0x389   : > { %v2721_v49 = vpop.f32.mrf.mxu0 }
 0x38a   : > { %v3370_v61 = vpop.f32.mrf.mxu1 }
 0x38b   : > { %v3371_v31 = vadd.f32 %v3370_v61, %v2721_v49  ;;  %v6884_v49 = vld [vmem:[%s8457_s30 + $0x690] sm:$0xf]  ;;  %v7347_v61 = vld [vmem:[%s8457_s30 + $0x694] sm:$0xf0] }
 0x38d   : > { %v7637_v59 = vpack.c.bf16 %v3371_v31, %v3369_v58  ;;  %v5156_v10 = vadd.f32 %v5155_v32, %v3371_v31  ;;  %v5419_v35 = vmul.f32 %v3371_v31, %v3371_v31  ;;  %v2976_v58 = vpop.f32.mrf.mxu2  ;;  %v3625_v32 = vpop.f32.mrf.mxu3  ;;  %v7346_v31 = vld [vmem:[%s8457_s30 + $0x694] sm:$0xf] }
 0x38e   : > { %v9126_v53 = vadd.f32 %v3625_v32, %v2976_v58  ;;  %v7247_v58 = vld [vmem:[%s8457_s30 + $0x374] sm:$0xf0]  ;;  %v7246_v32 = vld [vmem:[%s8457_s30 + $0x374] sm:$0xf] }
 0x38f   : > { %8093 = vst [vmem:[%s8508_s10 + $0x168] sm:$0xff] %v7637_v59   ;;  %v5674_v46 = vadd.f32 %v5673_v3, %v5419_v35  ;;  %v6885_v3 = vor.u32 %v7347_v61, %v6884_v49  ;;  %v6886_v59 = vld [vmem:[%s8457_s30 + $0x698] sm:$0xf0] }
 0x390   : > { %10132 = vst [vmem:[#allocation35_spill] sm:$0xff] %v9126_v53  ;;  %v7892_v45 = vpack.c.bf16 %v9126_v53, %v9124_v39  ;;  %v6889_v63 = vor.u32 %v7346_v31, %v6886_v59  ;;  %v6486_v49 = vld [vmem:[%s8457_s30 + $0x378] sm:$0xf0] }
 0x391   : > { %v2724_v57 = vpop.f32.mrf.mxu0  ;;  %3018 = vmatmul.bf16.gmra.mxu2 %v6885_v3  ;;  %v6489_v61 = vor.u32 %v7246_v32, %v6486_v49 }
 0x392   : > { %v3373_v54 = vpop.f32.mrf.mxu1  ;;  %8144 = vst [vmem:[%s8508_s10 + $0x300] sm:$0xff] %v7892_v45   ;;  %3667 = vmatmul.bf16.gmra.mxu3 %v6889_v63 }
 0x393   : > { %v3374_v25 = vadd.f32 %v3373_v54, %v2724_v57  ;;  %v6484_v54 = vld [vmem:[%s8457_s30 + $0x370] sm:$0xf] }
 0x394   : > { %2763 = vmatmul.bf16.gmra.mxu0 %v6477_v37 }
 0x395   : > { %v5157_v36 = vadd.f32 %v5156_v10, %v3374_v25  ;;  %v5420_v17 = vmul.f32 %v3374_v25, %v3374_v25  ;;  %3412 = vmatmul.bf16.gmra.mxu1 %v6481_v42  ;;  %v2979_v60 = vpop.f32.mrf.mxu2  ;;  %v3628_v24 = vpop.f32.mrf.mxu3 }
 0x396   : > { %v9140_v59 = vadd.f32 %v3628_v24, %v2979_v60 }
 0x397   : > { %v5675_v35 = vadd.f32 %v5674_v46, %v5420_v17  ;;  %v6485_v46 = vor.u32 %v7247_v58, %v6484_v54 }
 0x398   : > { %10133 = vst [vmem:[#allocation36_spill] sm:$0xff] %v9140_v59 }
 0x399   : > { %v2726_v62 = vpop.f32.mrf.mxu0 }
 0x39a   : > { %v3375_v10 = vpop.f32.mrf.mxu1 }
 0x39b   : > { %v3376_v51 = vadd.f32 %v3375_v10, %v2726_v62  ;;  %v6892_v62 = vld [vmem:[%s8457_s30 + $0x6a0] sm:$0xf]  ;;  %v7349_v10 = vld [vmem:[%s8457_s30 + $0x6a4] sm:$0xf0] }
 0x39d   : > { %v7642_v37 = vpack.c.bf16 %v3376_v51, %v3374_v25  ;;  %v5158_v42 = vadd.f32 %v5157_v36, %v3376_v51  ;;  %v5421_v57 = vmul.f32 %v3376_v51, %v3376_v51  ;;  %v2981_v25 = vpop.f32.mrf.mxu2  ;;  %v3630_v36 = vpop.f32.mrf.mxu3  ;;  %v7348_v51 = vld [vmem:[%s8457_s30 + $0x6a4] sm:$0xf] }
 0x39e   : > { %v9142_v63 = vadd.f32 %v3630_v36, %v2981_v25  ;;  %v7249_v25 = vld [vmem:[%s8457_s30 + $0x384] sm:$0xf0]  ;;  %v7248_v36 = vld [vmem:[%s8457_s30 + $0x384] sm:$0xf] }
 0x39f   : > { %8094 = vst [vmem:[%s8508_s10 + $0x170] sm:$0xff] %v7642_v37   ;;  %v5676_v17 = vadd.f32 %v5675_v35, %v5421_v57  ;;  %v6893_v35 = vor.u32 %v7349_v10, %v6892_v62  ;;  %v6894_v37 = vld [vmem:[%s8457_s30 + $0x6a8] sm:$0xf0] }
 0x3a0   : > { %10134 = vst [vmem:[#allocation37_spill] sm:$0xff] %v9142_v63  ;;  %v7897_v60 = vpack.c.bf16 %v9142_v63, %v9140_v59  ;;  %v6897_v24 = vor.u32 %v7348_v51, %v6894_v37  ;;  %v6494_v62 = vld [vmem:[%s8457_s30 + $0x388] sm:$0xf0] }
 0x3a1   : > { %v2729_v31 = vpop.f32.mrf.mxu0  ;;  %3023 = vmatmul.bf16.gmra.mxu2 %v6893_v35  ;;  %v6497_v10 = vor.u32 %v7248_v36, %v6494_v62 }
 0x3a2   : > { %v3378_v3 = vpop.f32.mrf.mxu1  ;;  %8145 = vst [vmem:[%s8508_s10 + $0x308] sm:$0xff] %v7897_v60   ;;  %3672 = vmatmul.bf16.gmra.mxu3 %v6897_v24 }
 0x3a3   : > { %v3379_v45 = vadd.f32 %v3378_v3, %v2729_v31  ;;  %v6492_v3 = vld [vmem:[%s8457_s30 + $0x380] sm:$0xf] }
 0x3a4   : > { %2768 = vmatmul.bf16.gmra.mxu0 %v6485_v46 }
 0x3a5   : > { %v5159_v53 = vadd.f32 %v5158_v42, %v3379_v45  ;;  %v5422_v39 = vmul.f32 %v3379_v45, %v3379_v45  ;;  %3417 = vmatmul.bf16.gmra.mxu1 %v6489_v61  ;;  %v2984_v32 = vpop.f32.mrf.mxu2  ;;  %v3633_v49 = vpop.f32.mrf.mxu3 }
 0x3a6   : > { %v9156_v37 = vadd.f32 %v3633_v49, %v2984_v32 }
 0x3a7   : > { %v5677_v57 = vadd.f32 %v5676_v17, %v5422_v39  ;;  %v6493_v17 = vor.u32 %v7249_v25, %v6492_v3 }
 0x3a8   : > { %10135 = vst [vmem:[#allocation38_spill] sm:$0xff] %v9156_v37 }
 0x3a9   : > { %v2731_v54 = vpop.f32.mrf.mxu0 }
 0x3aa   : > { %v3380_v42 = vpop.f32.mrf.mxu1 }
 0x3ab   : > { %v3381_v58 = vadd.f32 %v3380_v42, %v2731_v54  ;;  %v6900_v54 = vld [vmem:[%s8457_s30 + $0x6b0] sm:$0xf]  ;;  %v7351_v42 = vld [vmem:[%s8457_s30 + $0x6b4] sm:$0xf0] }
 0x3ad   : > { %v7647_v46 = vpack.c.bf16 %v3381_v58, %v3379_v45  ;;  %v5160_v61 = vadd.f32 %v5159_v53, %v3381_v58  ;;  %v5423_v31 = vmul.f32 %v3381_v58, %v3381_v58  ;;  %v2986_v45 = vpop.f32.mrf.mxu2  ;;  %v3635_v53 = vpop.f32.mrf.mxu3  ;;  %v7350_v58 = vld [vmem:[%s8457_s30 + $0x6b4] sm:$0xf] }
 0x3ae   : > { %v9158_v24 = vadd.f32 %v3635_v53, %v2986_v45  ;;  %v7251_v45 = vld [vmem:[%s8457_s30 + $0x394] sm:$0xf0]  ;;  %v7250_v53 = vld [vmem:[%s8457_s30 + $0x394] sm:$0xf] }
 0x3af   : > { %8095 = vst [vmem:[%s8508_s10 + $0x178] sm:$0xff] %v7647_v46   ;;  %v5678_v39 = vadd.f32 %v5677_v57, %v5423_v31  ;;  %v6901_v57 = vor.u32 %v7351_v42, %v6900_v54  ;;  %v6902_v46 = vld [vmem:[%s8457_s30 + $0x6b8] sm:$0xf0] }
 0x3b0   : > { %10136 = vst [vmem:[#allocation39_spill] sm:$0xff] %v9158_v24  ;;  %v7902_v32 = vpack.c.bf16 %v9158_v24, %v9156_v37  ;;  %v6905_v49 = vor.u32 %v7350_v58, %v6902_v46  ;;  %v6502_v54 = vld [vmem:[%s8457_s30 + $0x398] sm:$0xf0] }
 0x3b1   : > { %v2734_v51 = vpop.f32.mrf.mxu0  ;;  %3028 = vmatmul.bf16.gmra.mxu2 %v6901_v57  ;;  %v6505_v42 = vor.u32 %v7250_v53, %v6502_v54 }
 0x3b2   : > { %v3383_v35 = vpop.f32.mrf.mxu1  ;;  %8146 = vst [vmem:[%s8508_s10 + $0x310] sm:$0xff] %v7902_v32   ;;  %3677 = vmatmul.bf16.gmra.mxu3 %v6905_v49 }
 0x3b3   : > { %v3384_v60 = vadd.f32 %v3383_v35, %v2734_v51  ;;  %v6500_v35 = vld [vmem:[%s8457_s30 + $0x390] sm:$0xf] }
 0x3b4   : > { %2773 = vmatmul.bf16.gmra.mxu0 %v6493_v17 }
 0x3b5   : > { %v5161_v63 = vadd.f32 %v5160_v61, %v3384_v60  ;;  %v5424_v59 = vmul.f32 %v3384_v60, %v3384_v60  ;;  %3422 = vmatmul.bf16.gmra.mxu1 %v6497_v10  ;;  %v2989_v36 = vpop.f32.mrf.mxu2  ;;  %v3638_v62 = vpop.f32.mrf.mxu3 }
 0x3b6   : > { %v9172_v46 = vadd.f32 %v3638_v62, %v2989_v36 }
 0x3b7   : > { %v5679_v31 = vadd.f32 %v5678_v39, %v5424_v59  ;;  %v6501_v39 = vor.u32 %v7251_v45, %v6500_v35 }
 0x3b8   : > { %10137 = vst [vmem:[#allocation40_spill] sm:$0xff] %v9172_v46 }
 0x3b9   : > { %v2736_v3 = vpop.f32.mrf.mxu0 }
 0x3ba   : > { %v3385_v61 = vpop.f32.mrf.mxu1 }
 0x3bb   : > { %v3386_v25 = vadd.f32 %v3385_v61, %v2736_v3  ;;  %v6908_v3 = vld [vmem:[%s8457_s30 + $0x6c0] sm:$0xf]  ;;  %v7353_v61 = vld [vmem:[%s8457_s30 + $0x6c4] sm:$0xf0] }
 0x3bd   : > { %v7652_v17 = vpack.c.bf16 %v3386_v25, %v3384_v60  ;;  %v5162_v10 = vadd.f32 %v5161_v63, %v3386_v25  ;;  %v5425_v51 = vmul.f32 %v3386_v25, %v3386_v25  ;;  %v2991_v60 = vpop.f32.mrf.mxu2  ;;  %v3640_v63 = vpop.f32.mrf.mxu3  ;;  %v7352_v25 = vld [vmem:[%s8457_s30 + $0x6c4] sm:$0xf] }
 0x3be   : > { %v9174_v49 = vadd.f32 %v3640_v63, %v2991_v60  ;;  %v7253_v60 = vld [vmem:[%s8457_s30 + $0x3a4] sm:$0xf0]  ;;  %v7252_v63 = vld [vmem:[%s8457_s30 + $0x3a4] sm:$0xf] }
 0x3bf   : > { %8096 = vst [vmem:[%s8508_s10 + $0x180] sm:$0xff] %v7652_v17   ;;  %v5680_v59 = vadd.f32 %v5679_v31, %v5425_v51  ;;  %v6909_v31 = vor.u32 %v7353_v61, %v6908_v3  ;;  %v6910_v17 = vld [vmem:[%s8457_s30 + $0x6c8] sm:$0xf0] }
 0x3c0   : > { %10138 = vst [vmem:[#allocation41_spill] sm:$0xff] %v9174_v49  ;;  %v7907_v36 = vpack.c.bf16 %v9174_v49, %v9172_v46  ;;  %v6913_v62 = vor.u32 %v7352_v25, %v6910_v17  ;;  %v6510_v3 = vld [vmem:[%s8457_s30 + $0x3a8] sm:$0xf0] }
 0x3c1   : > { %v2739_v58 = vpop.f32.mrf.mxu0  ;;  %3033 = vmatmul.bf16.gmra.mxu2 %v6909_v31  ;;  %v6513_v61 = vor.u32 %v7252_v63, %v6510_v3 }
 0x3c2   : > { %v3388_v57 = vpop.f32.mrf.mxu1  ;;  %8147 = vst [vmem:[%s8508_s10 + $0x318] sm:$0xff] %v7907_v36   ;;  %3682 = vmatmul.bf16.gmra.mxu3 %v6913_v62 }
 0x3c3   : > { %v3389_v32 = vadd.f32 %v3388_v57, %v2739_v58  ;;  %v6508_v57 = vld [vmem:[%s8457_s30 + $0x3a0] sm:$0xf] }
 0x3c4   : > { %2778 = vmatmul.bf16.gmra.mxu0 %v6501_v39 }
 0x3c5   : > { %v5163_v24 = vadd.f32 %v5162_v10, %v3389_v32  ;;  %v5426_v37 = vmul.f32 %v3389_v32, %v3389_v32  ;;  %3427 = vmatmul.bf16.gmra.mxu1 %v6505_v42  ;;  %v2994_v53 = vpop.f32.mrf.mxu2  ;;  %v3643_v54 = vpop.f32.mrf.mxu3 }
 0x3c6   : > { %v9188_v17 = vadd.f32 %v3643_v54, %v2994_v53 }
 0x3c7   : > { %v5681_v51 = vadd.f32 %v5680_v59, %v5426_v37  ;;  %v6509_v59 = vor.u32 %v7253_v60, %v6508_v57 }
 0x3c8   : > { %10139 = vst [vmem:[#allocation42_spill] sm:$0xff] %v9188_v17 }
 0x3c9   : > { %v2741_v35 = vpop.f32.mrf.mxu0 }
 0x3ca   : > { %v3390_v10 = vpop.f32.mrf.mxu1 }
 0x3cb   : > { %v3391_v45 = vadd.f32 %v3390_v10, %v2741_v35  ;;  %v6916_v35 = vld [vmem:[%s8457_s30 + $0x6d0] sm:$0xf]  ;;  %v7355_v10 = vld [vmem:[%s8457_s30 + $0x6d4] sm:$0xf0] }
 0x3cd   : > { %v7657_v39 = vpack.c.bf16 %v3391_v45, %v3389_v32  ;;  %v5164_v42 = vadd.f32 %v5163_v24, %v3391_v45  ;;  %v5427_v58 = vmul.f32 %v3391_v45, %v3391_v45  ;;  %v2996_v32 = vpop.f32.mrf.mxu2  ;;  %v3645_v24 = vpop.f32.mrf.mxu3  ;;  %v7354_v45 = vld [vmem:[%s8457_s30 + $0x6d4] sm:$0xf] }
 0x3ce   : > { %v9190_v62 = vadd.f32 %v3645_v24, %v2996_v32  ;;  %v7255_v32 = vld [vmem:[%s8457_s30 + $0x3b4] sm:$0xf0]  ;;  %v7254_v24 = vld [vmem:[%s8457_s30 + $0x3b4] sm:$0xf] }
 0x3cf   : > { %8097 = vst [vmem:[%s8508_s10 + $0x188] sm:$0xff] %v7657_v39   ;;  %v5682_v37 = vadd.f32 %v5681_v51, %v5427_v58  ;;  %v6917_v51 = vor.u32 %v7355_v10, %v6916_v35  ;;  %v6918_v39 = vld [vmem:[%s8457_s30 + $0x6d8] sm:$0xf0] }
 0x3d0   : > { %10140 = vst [vmem:[#allocation43_spill] sm:$0xff] %v9190_v62  ;;  %v7912_v53 = vpack.c.bf16 %v9190_v62, %v9188_v17  ;;  %v6921_v54 = vor.u32 %v7354_v45, %v6918_v39  ;;  %v6518_v35 = vld [vmem:[%s8457_s30 + $0x3b8] sm:$0xf0] }
 0x3d1   : > { %v2744_v25 = vpop.f32.mrf.mxu0  ;;  %3038 = vmatmul.bf16.gmra.mxu2 %v6917_v51  ;;  %v6521_v10 = vor.u32 %v7254_v24, %v6518_v35 }
 0x3d2   : > { %v3393_v31 = vpop.f32.mrf.mxu1  ;;  %8148 = vst [vmem:[%s8508_s10 + $0x320] sm:$0xff] %v7912_v53   ;;  %3687 = vmatmul.bf16.gmra.mxu3 %v6921_v54 }
 0x3d3   : > { %v3394_v36 = vadd.f32 %v3393_v31, %v2744_v25  ;;  %v6516_v31 = vld [vmem:[%s8457_s30 + $0x3b0] sm:$0xf] }
 0x3d4   : > { %2783 = vmatmul.bf16.gmra.mxu0 %v6509_v59 }
 0x3d5   : > { %v5165_v49 = vadd.f32 %v5164_v42, %v3394_v36  ;;  %v5428_v46 = vmul.f32 %v3394_v36, %v3394_v36  ;;  %3432 = vmatmul.bf16.gmra.mxu1 %v6513_v61  ;;  %v2999_v63 = vpop.f32.mrf.mxu2  ;;  %v3648_v3 = vpop.f32.mrf.mxu3 }
 0x3d6   : > { %v9204_v39 = vadd.f32 %v3648_v3, %v2999_v63 }
 0x3d7   : > { %v5683_v58 = vadd.f32 %v5682_v37, %v5428_v46  ;;  %v6517_v37 = vor.u32 %v7255_v32, %v6516_v31 }
 0x3d8   : > { %10141 = vst [vmem:[#allocation44_spill] sm:$0xff] %v9204_v39 }
 0x3d9   : > { %v2746_v57 = vpop.f32.mrf.mxu0 }
 0x3da   : > { %v3395_v42 = vpop.f32.mrf.mxu1 }
 0x3db   : > { %v3396_v60 = vadd.f32 %v3395_v42, %v2746_v57  ;;  %v6924_v57 = vld [vmem:[%s8457_s30 + $0x6e0] sm:$0xf]  ;;  %v7357_v42 = vld [vmem:[%s8457_s30 + $0x6e4] sm:$0xf0] }
 0x3dd   : > { %v7662_v59 = vpack.c.bf16 %v3396_v60, %v3394_v36  ;;  %v5166_v61 = vadd.f32 %v5165_v49, %v3396_v60  ;;  %v5429_v25 = vmul.f32 %v3396_v60, %v3396_v60  ;;  %v3001_v36 = vpop.f32.mrf.mxu2  ;;  %v3650_v49 = vpop.f32.mrf.mxu3  ;;  %v7356_v60 = vld [vmem:[%s8457_s30 + $0x6e4] sm:$0xf] }
 0x3de   : > { %v9206_v54 = vadd.f32 %v3650_v49, %v3001_v36  ;;  %v7257_v36 = vld [vmem:[%s8457_s30 + $0x3c4] sm:$0xf0]  ;;  %v7256_v49 = vld [vmem:[%s8457_s30 + $0x3c4] sm:$0xf] }
 0x3df   : > { %8098 = vst [vmem:[%s8508_s10 + $0x190] sm:$0xff] %v7662_v59   ;;  %v5684_v46 = vadd.f32 %v5683_v58, %v5429_v25  ;;  %v6925_v58 = vor.u32 %v7357_v42, %v6924_v57  ;;  %v6926_v59 = vld [vmem:[%s8457_s30 + $0x6e8] sm:$0xf0] }
 0x3e0   : > { %10142 = vst [vmem:[#allocation45_spill] sm:$0xff] %v9206_v54  ;;  %v7917_v63 = vpack.c.bf16 %v9206_v54, %v9204_v39  ;;  %v6929_v3 = vor.u32 %v7356_v60, %v6926_v59  ;;  %v6526_v57 = vld [vmem:[%s8457_s30 + $0x3c8] sm:$0xf0] }
 0x3e1   : > { %v2749_v45 = vpop.f32.mrf.mxu0  ;;  %3043 = vmatmul.bf16.gmra.mxu2 %v6925_v58  ;;  %v6529_v42 = vor.u32 %v7256_v49, %v6526_v57 }
 0x3e2   : > { %v3398_v51 = vpop.f32.mrf.mxu1  ;;  %8149 = vst [vmem:[%s8508_s10 + $0x328] sm:$0xff] %v7917_v63   ;;  %3692 = vmatmul.bf16.gmra.mxu3 %v6929_v3 }
 0x3e3   : > { %v3399_v53 = vadd.f32 %v3398_v51, %v2749_v45  ;;  %v6524_v51 = vld [vmem:[%s8457_s30 + $0x3c0] sm:$0xf] }
 0x3e4   : > { %2788 = vmatmul.bf16.gmra.mxu0 %v6517_v37 }
 0x3e5   : > { %v5167_v62 = vadd.f32 %v5166_v61, %v3399_v53  ;;  %v5430_v17 = vmul.f32 %v3399_v53, %v3399_v53  ;;  %3437 = vmatmul.bf16.gmra.mxu1 %v6521_v10  ;;  %v3004_v24 = vpop.f32.mrf.mxu2  ;;  %v3653_v35 = vpop.f32.mrf.mxu3 }
 0x3e6   : > { %v9220_v59 = vadd.f32 %v3653_v35, %v3004_v24 }
 0x3e7   : > { %v5685_v25 = vadd.f32 %v5684_v46, %v5430_v17  ;;  %v6525_v46 = vor.u32 %v7257_v36, %v6524_v51 }
 0x3e8   : > { %10143 = vst [vmem:[#allocation46_spill] sm:$0xff] %v9220_v59 }
 0x3e9   : > { %v2751_v31 = vpop.f32.mrf.mxu0 }
 0x3ea   : > { %v3400_v61 = vpop.f32.mrf.mxu1 }
 0x3eb   : > { %v3401_v32 = vadd.f32 %v3400_v61, %v2751_v31  ;;  %v6932_v31 = vld [vmem:[%s8457_s30 + $0x6f0] sm:$0xf]  ;;  %v7359_v61 = vld [vmem:[%s8457_s30 + $0x6f4] sm:$0xf0] }
 0x3ed   : > { %v7667_v37 = vpack.c.bf16 %v3401_v32, %v3399_v53  ;;  %v5168_v10 = vadd.f32 %v5167_v62, %v3401_v32  ;;  %v5431_v45 = vmul.f32 %v3401_v32, %v3401_v32  ;;  %v3006_v53 = vpop.f32.mrf.mxu2  ;;  %v3655_v62 = vpop.f32.mrf.mxu3  ;;  %v7358_v32 = vld [vmem:[%s8457_s30 + $0x6f4] sm:$0xf] }
 0x3ee   : > { %v9222_v3 = vadd.f32 %v3655_v62, %v3006_v53  ;;  %v7259_v53 = vld [vmem:[%s8457_s30 + $0x3d4] sm:$0xf0]  ;;  %v7258_v62 = vld [vmem:[%s8457_s30 + $0x3d4] sm:$0xf] }
 0x3ef   : > { %8099 = vst [vmem:[%s8508_s10 + $0x198] sm:$0xff] %v7667_v37   ;;  %v5686_v17 = vadd.f32 %v5685_v25, %v5431_v45  ;;  %v6933_v25 = vor.u32 %v7359_v61, %v6932_v31  ;;  %v6934_v37 = vld [vmem:[%s8457_s30 + $0x6f8] sm:$0xf0] }
 0x3f0   : > { %10144 = vst [vmem:[#allocation47_spill] sm:$0xff] %v9222_v3  ;;  %v7922_v24 = vpack.c.bf16 %v9222_v3, %v9220_v59  ;;  %v6937_v35 = vor.u32 %v7358_v32, %v6934_v37  ;;  %v6534_v31 = vld [vmem:[%s8457_s30 + $0x3d8] sm:$0xf0] }
 0x3f1   : > { %v2754_v60 = vpop.f32.mrf.mxu0  ;;  %3048 = vmatmul.bf16.gmra.mxu2 %v6933_v25  ;;  %v6537_v61 = vor.u32 %v7258_v62, %v6534_v31 }
 0x3f2   : > { %v3403_v58 = vpop.f32.mrf.mxu1  ;;  %8150 = vst [vmem:[%s8508_s10 + $0x330] sm:$0xff] %v7922_v24   ;;  %3697 = vmatmul.bf16.gmra.mxu3 %v6937_v35 }
 0x3f3   : > { %v3404_v63 = vadd.f32 %v3403_v58, %v2754_v60  ;;  %v6532_v58 = vld [vmem:[%s8457_s30 + $0x3d0] sm:$0xf] }
 0x3f4   : > { %2793 = vmatmul.bf16.gmra.mxu0 %v6525_v46 }
 0x3f5   : > { %v5169_v54 = vadd.f32 %v5168_v10, %v3404_v63  ;;  %v5432_v39 = vmul.f32 %v3404_v63, %v3404_v63  ;;  %3442 = vmatmul.bf16.gmra.mxu1 %v6529_v42  ;;  %v3009_v49 = vpop.f32.mrf.mxu2  ;;  %v3658_v57 = vpop.f32.mrf.mxu3 }
 0x3f6   : > { %v9236_v37 = vadd.f32 %v3658_v57, %v3009_v49 }
 0x3f7   : > { %v5687_v45 = vadd.f32 %v5686_v17, %v5432_v39  ;;  %v6533_v17 = vor.u32 %v7259_v53, %v6532_v58 }
 0x3f8   : > { %10145 = vst [vmem:[#allocation48_spill] sm:$0xff] %v9236_v37 }
 0x3f9   : > { %v2756_v51 = vpop.f32.mrf.mxu0 }
 0x3fa   : > { %v3405_v10 = vpop.f32.mrf.mxu1 }
 0x3fb   : > { %v3406_v36 = vadd.f32 %v3405_v10, %v2756_v51  ;;  %v6940_v51 = vld [vmem:[%s8457_s30 + $0x700] sm:$0xf]  ;;  %v7361_v10 = vld [vmem:[%s8457_s30 + $0x704] sm:$0xf0] }
 0x3fd   : > { %v7672_v46 = vpack.c.bf16 %v3406_v36, %v3404_v63  ;;  %v5170_v42 = vadd.f32 %v5169_v54, %v3406_v36  ;;  %v5433_v60 = vmul.f32 %v3406_v36, %v3406_v36  ;;  %v3011_v63 = vpop.f32.mrf.mxu2  ;;  %v3660_v54 = vpop.f32.mrf.mxu3  ;;  %v7360_v36 = vld [vmem:[%s8457_s30 + $0x704] sm:$0xf] }
 0x3fe   : > { %v9238_v35 = vadd.f32 %v3660_v54, %v3011_v63  ;;  %v7261_v63 = vld [vmem:[%s8457_s30 + $0x3e4] sm:$0xf0]  ;;  %v7260_v54 = vld [vmem:[%s8457_s30 + $0x3e4] sm:$0xf] }
 0x3ff   : > { %8100 = vst [vmem:[%s8508_s10 + $0x1a0] sm:$0xff] %v7672_v46   ;;  %v5688_v39 = vadd.f32 %v5687_v45, %v5433_v60  ;;  %v6941_v45 = vor.u32 %v7361_v10, %v6940_v51  ;;  %v6942_v46 = vld [vmem:[%s8457_s30 + $0x708] sm:$0xf0] }
 0x400   : > { %10146 = vst [vmem:[#allocation49_spill] sm:$0xff] %v9238_v35  ;;  %v7927_v49 = vpack.c.bf16 %v9238_v35, %v9236_v37  ;;  %v6945_v57 = vor.u32 %v7360_v36, %v6942_v46  ;;  %v6542_v51 = vld [vmem:[%s8457_s30 + $0x3e8] sm:$0xf0] }
 0x401   : > { %v2759_v32 = vpop.f32.mrf.mxu0  ;;  %3053 = vmatmul.bf16.gmra.mxu2 %v6941_v45  ;;  %v6545_v10 = vor.u32 %v7260_v54, %v6542_v51 }
 0x402   : > { %v3408_v25 = vpop.f32.mrf.mxu1  ;;  %8151 = vst [vmem:[%s8508_s10 + $0x338] sm:$0xff] %v7927_v49   ;;  %3702 = vmatmul.bf16.gmra.mxu3 %v6945_v57 }
 0x403   : > { %v3409_v24 = vadd.f32 %v3408_v25, %v2759_v32  ;;  %v6540_v25 = vld [vmem:[%s8457_s30 + $0x3e0] sm:$0xf] }
 0x404   : > { %2798 = vmatmul.bf16.gmra.mxu0 %v6533_v17 }
 0x405   : > { %v5171_v3 = vadd.f32 %v5170_v42, %v3409_v24  ;;  %v5434_v59 = vmul.f32 %v3409_v24, %v3409_v24  ;;  %3447 = vmatmul.bf16.gmra.mxu1 %v6537_v61  ;;  %v3014_v62 = vpop.f32.mrf.mxu2  ;;  %v3663_v31 = vpop.f32.mrf.mxu3 }
 0x406   : > { %v9252_v46 = vadd.f32 %v3663_v31, %v3014_v62 }
 0x407   : > { %v5689_v60 = vadd.f32 %v5688_v39, %v5434_v59  ;;  %v6541_v39 = vor.u32 %v7261_v63, %v6540_v25 }
 0x408   : > { %10147 = vst [vmem:[#allocation50_spill] sm:$0xff] %v9252_v46 }
 0x409   : > { %v2761_v58 = vpop.f32.mrf.mxu0 }
 0x40a   : > { %v3410_v42 = vpop.f32.mrf.mxu1 }
 0x40b   : > { %v3411_v53 = vadd.f32 %v3410_v42, %v2761_v58  ;;  %v6948_v58 = vld [vmem:[%s8457_s30 + $0x710] sm:$0xf]  ;;  %v7363_v42 = vld [vmem:[%s8457_s30 + $0x714] sm:$0xf0] }
 0x40d   : > { %v7677_v17 = vpack.c.bf16 %v3411_v53, %v3409_v24  ;;  %v5172_v61 = vadd.f32 %v5171_v3, %v3411_v53  ;;  %v5435_v32 = vmul.f32 %v3411_v53, %v3411_v53  ;;  %v3016_v24 = vpop.f32.mrf.mxu2  ;;  %v3665_v3 = vpop.f32.mrf.mxu3  ;;  %v7362_v53 = vld [vmem:[%s8457_s30 + $0x714] sm:$0xf] }
 0x40e   : > { %v9254_v57 = vadd.f32 %v3665_v3, %v3016_v24  ;;  %v7263_v24 = vld [vmem:[%s8457_s30 + $0x3f4] sm:$0xf0]  ;;  %v7262_v3 = vld [vmem:[%s8457_s30 + $0x3f4] sm:$0xf] }
 0x40f   : > { %8101 = vst [vmem:[%s8508_s10 + $0x1a8] sm:$0xff] %v7677_v17   ;;  %v5690_v59 = vadd.f32 %v5689_v60, %v5435_v32  ;;  %v6949_v60 = vor.u32 %v7363_v42, %v6948_v58  ;;  %v6950_v17 = vld [vmem:[%s8457_s30 + $0x718] sm:$0xf0] }
 0x410   : > { %10148 = vst [vmem:[#allocation51_spill] sm:$0xff] %v9254_v57  ;;  %v7932_v62 = vpack.c.bf16 %v9254_v57, %v9252_v46  ;;  %v6953_v31 = vor.u32 %v7362_v53, %v6950_v17  ;;  %v6550_v58 = vld [vmem:[%s8457_s30 + $0x3f8] sm:$0xf0] }
 0x411   : > { %v2764_v36 = vpop.f32.mrf.mxu0  ;;  %3058 = vmatmul.bf16.gmra.mxu2 %v6949_v60  ;;  %v6553_v42 = vor.u32 %v7262_v3, %v6550_v58 }
 0x412   : > { %v3413_v45 = vpop.f32.mrf.mxu1  ;;  %8152 = vst [vmem:[%s8508_s10 + $0x340] sm:$0xff] %v7932_v62   ;;  %3707 = vmatmul.bf16.gmra.mxu3 %v6953_v31 }
 0x413   : > { %v3414_v49 = vadd.f32 %v3413_v45, %v2764_v36  ;;  %v6548_v45 = vld [vmem:[%s8457_s30 + $0x3f0] sm:$0xf] }
 0x414   : > { %2803 = vmatmul.bf16.gmra.mxu0 %v6541_v39 }
 0x415   : > { %v5173_v35 = vadd.f32 %v5172_v61, %v3414_v49  ;;  %v5436_v37 = vmul.f32 %v3414_v49, %v3414_v49  ;;  %3452 = vmatmul.bf16.gmra.mxu1 %v6545_v10  ;;  %v3019_v54 = vpop.f32.mrf.mxu2  ;;  %v3668_v51 = vpop.f32.mrf.mxu3 }
 0x416   : > { %v9268_v17 = vadd.f32 %v3668_v51, %v3019_v54 }
 0x417   : > { %v5691_v32 = vadd.f32 %v5690_v59, %v5436_v37  ;;  %v6549_v59 = vor.u32 %v7263_v24, %v6548_v45 }
 0x418   : > { %10149 = vst [vmem:[#allocation52_spill] sm:$0xff] %v9268_v17 }
 0x419   : > { %v2766_v25 = vpop.f32.mrf.mxu0 }
 0x41a   : > { %v3415_v61 = vpop.f32.mrf.mxu1 }
 0x41b   : > { %v3416_v63 = vadd.f32 %v3415_v61, %v2766_v25  ;;  %v6956_v25 = vld [vmem:[%s8457_s30 + $0x720] sm:$0xf]  ;;  %v7365_v61 = vld [vmem:[%s8457_s30 + $0x724] sm:$0xf0] }
 0x41d   : > { %v7682_v39 = vpack.c.bf16 %v3416_v63, %v3414_v49  ;;  %v5174_v10 = vadd.f32 %v5173_v35, %v3416_v63  ;;  %v5437_v36 = vmul.f32 %v3416_v63, %v3416_v63  ;;  %v3021_v49 = vpop.f32.mrf.mxu2  ;;  %v3670_v35 = vpop.f32.mrf.mxu3  ;;  %v7364_v63 = vld [vmem:[%s8457_s30 + $0x724] sm:$0xf] }
 0x41e   : > { %v9270_v31 = vadd.f32 %v3670_v35, %v3021_v49 }
 0x41f   : > { %8102 = vst [vmem:[%s8508_s10 + $0x1b0] sm:$0xff] %v7682_v39   ;;  %v5692_v37 = vadd.f32 %v5691_v32, %v5437_v36  ;;  %v6957_v32 = vor.u32 %v7365_v61, %v6956_v25  ;;  %v6958_v39 = vld [vmem:[%s8457_s30 + $0x728] sm:$0xf0] }
 0x420   : > { %10150 = vst [vmem:[#allocation53_spill] sm:$0xff] %v9270_v31  ;;  %v7937_v54 = vpack.c.bf16 %v9270_v31, %v9268_v17  ;;  %v6961_v51 = vor.u32 %v7364_v63, %v6958_v39  ;;  %v7367_v39 = vld [vmem:[%s8457_s30 + $0x734] sm:$0xf0] }
 0x421   : > { %v2769_v53 = vpop.f32.mrf.mxu0  ;;  %3063 = vmatmul.bf16.gmra.mxu2 %v6957_v32  ;;  %v6964_v32 = vld [vmem:[%s8457_s30 + $0x730] sm:$0xf] }
 0x422   : > { %v3418_v60 = vpop.f32.mrf.mxu1  ;;  %8153 = vst [vmem:[%s8508_s10 + $0x348] sm:$0xff] %v7937_v54   ;;  %3712 = vmatmul.bf16.gmra.mxu3 %v6961_v51  ;;  %v7366_v54 = vld [vmem:[%s8457_s30 + $0x734] sm:$0xf] }
 0x423   : > { %v3419_v62 = vadd.f32 %v3418_v60, %v2769_v53 }
 0x424   : > { %2808 = vmatmul.bf16.gmra.mxu0 %v6549_v59 }
 0x425   : > { %v5175_v57 = vadd.f32 %v5174_v10, %v3419_v62  ;;  %v5438_v46 = vmul.f32 %v3419_v62, %v3419_v62  ;;  %3457 = vmatmul.bf16.gmra.mxu1 %v6553_v42  ;;  %v3024_v10 = vpop.f32.mrf.mxu2  ;;  %v3673_v58 = vpop.f32.mrf.mxu3 }
 0x427   : > { %v5693_v36 = vadd.f32 %v5692_v37, %v5438_v46  ;;  %v9280_v46 = vadd.f32 %v3673_v58, %v3024_v10 }
 0x429   : > { %v2771_v45 = vpop.f32.mrf.mxu0  ;;  %10151 = vst [vmem:[#allocation54_spill] sm:$0xff] %v9280_v46 }
 0x42a   : > { %v3420_v24 = vpop.f32.mrf.mxu1 }
 0x42b   : > { %v3421_v3 = vadd.f32 %v3420_v24, %v2771_v45  ;;  %v6966_v45 = vld [vmem:[%s8457_s30 + $0x738] sm:$0xf0] }
 0x42c   : > { %v6969_v24 = vor.u32 %v7366_v54, %v6966_v45 }
 0x42d   : > { %v7687_v59 = vpack.c.bf16 %v3421_v3, %v3419_v62  ;;  %v5176_v42 = vadd.f32 %v5175_v57, %v3421_v3  ;;  %v5439_v53 = vmul.f32 %v3421_v3, %v3421_v3  ;;  %v3026_v25 = vpop.f32.mrf.mxu2  ;;  %v3675_v61 = vpop.f32.mrf.mxu3  ;;  %v6965_v57 = vor.u32 %v7367_v39, %v6964_v32 }
 0x42e   : > { %v9282_v63 = vadd.f32 %v3675_v61, %v3026_v25 }
 0x42f   : > { %8103 = vst [vmem:[%s8508_s10 + $0x1b8] sm:$0xff] %v7687_v59   ;;  %v5694_v60 = vadd.f32 %v5693_v36, %v5439_v53 }
 0x430   : > { %10152 = vst [vmem:[#allocation55_spill] sm:$0xff] %v9282_v63  ;;  %v7942_v36 = vpack.c.bf16 %v9282_v63, %v9280_v46 }
 0x431   : > { %v2774_v49 = vpop.f32.mrf.mxu0  ;;  %3068 = vmatmul.bf16.gmra.mxu2 %v6965_v57 }
 0x432   : > { %v3423_v35 = vpop.f32.mrf.mxu1  ;;  %8154 = vst [vmem:[%s8508_s10 + $0x350] sm:$0xff] %v7942_v36   ;;  %3717 = vmatmul.bf16.gmra.mxu3 %v6969_v24  ;;  %v6972_v36 = vld [vmem:[%s8457_s30 + $0x740] sm:$0xf]  ;;  %v7369_v24 = vld [vmem:[%s8457_s30 + $0x744] sm:$0xf0] }
 0x433   : > { %v3424_v37 = vadd.f32 %v3423_v35, %v2774_v49 }
 0x435   : > { %v5177_v51 = vadd.f32 %v5176_v42, %v3424_v37  ;;  %v5440_v62 = vmul.f32 %v3424_v37, %v3424_v37  ;;  %v3029_v53 = vpop.f32.mrf.mxu2  ;;  %v3678_v42 = vpop.f32.mrf.mxu3 }
 0x437   : > { %v5695_v3 = vadd.f32 %v5694_v60, %v5440_v62  ;;  %v9292_v60 = vadd.f32 %v3678_v42, %v3029_v53 }
 0x439   : > { %v2776_v10 = vpop.f32.mrf.mxu0  ;;  %10153 = vst [vmem:[#allocation56_spill] sm:$0xff] %v9292_v60 }
 0x43a   : > { %v3425_v58 = vpop.f32.mrf.mxu1 }
 0x43b   : > { %v3426_v59 = vadd.f32 %v3425_v58, %v2776_v10  ;;  %v7368_v10 = vld [vmem:[%s8457_s30 + $0x744] sm:$0xf] }
 0x43d   : > { %v7692_v49 = vpack.c.bf16 %v3426_v59, %v3424_v37  ;;  %v5178_v35 = vadd.f32 %v5177_v51, %v3426_v59  ;;  %v5441_v25 = vmul.f32 %v3426_v59, %v3426_v59  ;;  %v3031_v62 = vpop.f32.mrf.mxu2  ;;  %v3680_v57 = vpop.f32.mrf.mxu3  ;;  %v6973_v51 = vor.u32 %v7369_v24, %v6972_v36  ;;  %v6974_v59 = vld [vmem:[%s8457_s30 + $0x748] sm:$0xf0] }
 0x43e   : > { %v9294_v45 = vadd.f32 %v3680_v57, %v3031_v62 }
 0x43f   : > { %8104 = vst [vmem:[%s8508_s10 + $0x1c0] sm:$0xff] %v7692_v49   ;;  %v5696_v61 = vadd.f32 %v5695_v3, %v5441_v25  ;;  %v6977_v49 = vor.u32 %v7368_v10, %v6974_v59 }
 0x440   : > { %10154 = vst [vmem:[#allocation57_spill] sm:$0xff] %v9294_v45  ;;  %v7947_v3 = vpack.c.bf16 %v9294_v45, %v9292_v60 }
 0x441   : > { %v2779_v32 = vpop.f32.mrf.mxu0  ;;  %3073 = vmatmul.bf16.gmra.mxu2 %v6973_v51 }
 0x442   : > { %v3428_v39 = vpop.f32.mrf.mxu1  ;;  %8155 = vst [vmem:[%s8508_s10 + $0x358] sm:$0xff] %v7947_v3   ;;  %3722 = vmatmul.bf16.gmra.mxu3 %v6977_v49  ;;  %v6980_v49 = vld [vmem:[%s8457_s30 + $0x750] sm:$0xf] }
 0x443   : > { %v3429_v54 = vadd.f32 %v3428_v39, %v2779_v32 }
 0x445   : > { %v5179_v58 = vadd.f32 %v5178_v35, %v3429_v54  ;;  %v5442_v37 = vmul.f32 %v3429_v54, %v3429_v54  ;;  %v3034_v39 = vpop.f32.mrf.mxu2  ;;  %v3683_v35 = vpop.f32.mrf.mxu3 }
 0x447   : > { %v5697_v53 = vadd.f32 %v5696_v61, %v5442_v37  ;;  %v9308_v37 = vadd.f32 %v3683_v35, %v3034_v39 }
 0x449   : > { %v2781_v42 = vpop.f32.mrf.mxu0  ;;  %10155 = vst [vmem:[#allocation58_spill] sm:$0xff] %v9308_v37 }
 0x44a   : > { %v3430_v25 = vpop.f32.mrf.mxu1 }
 0x44b   : > { %v3431_v32 = vadd.f32 %v3430_v25, %v2781_v42  ;;  %v7371_v42 = vld [vmem:[%s8457_s30 + $0x754] sm:$0xf0]  ;;  %v7370_v25 = vld [vmem:[%s8457_s30 + $0x754] sm:$0xf] }
 0x44d   : > { %v7697_v62 = vpack.c.bf16 %v3431_v32, %v3429_v54  ;;  %v9303_v57 = vadd.f32 %v5179_v58, %v3431_v32  ;;  %v5443_v36 = vmul.f32 %v3431_v32, %v3431_v32  ;;  %v3036_v51 = vpop.f32.mrf.mxu2  ;;  %v3685_v59 = vpop.f32.mrf.mxu3  ;;  %v6981_v54 = vor.u32 %v7371_v42, %v6980_v49  ;;  %v6982_v58 = vld [vmem:[%s8457_s30 + $0x758] sm:$0xf0] }
 0x44e   : > { %v9310_v3 = vadd.f32 %v3685_v59, %v3036_v51 }
 0x44f   : > { %8105 = vst [vmem:[%s8508_s10 + $0x1c8] sm:$0xff] %v7697_v62   ;;  %v9306_v24 = vadd.f32 %v5697_v53, %v5443_v36  ;;  %v6985_v62 = vor.u32 %v7370_v25, %v6982_v58 }
 0x450   : > { %10156 = vst [vmem:[#allocation59_spill] sm:$0xff] %v9310_v3  ;;  %v7952_v32 = vpack.c.bf16 %v9310_v3, %v9308_v37  ;;  %v6990_v3 = vld [vmem:[%s8457_s30 + $0x768] sm:$0xf0] }
 0x451   : > { %v2784_v61 = vpop.f32.mrf.mxu0  ;;  %3078 = vmatmul.bf16.gmra.mxu2 %v6981_v54 }
 0x452   : > { %v3433_v10 = vpop.f32.mrf.mxu1  ;;  %8156 = vst [vmem:[%s8508_s10 + $0x360] sm:$0xff] %v7952_v32   ;;  %3727 = vmatmul.bf16.gmra.mxu3 %v6985_v62 }
 0x453   : > { %v9319_v35 = vadd.f32 %v3433_v10, %v2784_v61  ;;  %v6988_v61 = vld [vmem:[%s8457_s30 + $0x760] sm:$0xf]  ;;  %v7373_v10 = vld [vmem:[%s8457_s30 + $0x764] sm:$0xf0] }
 0x455   : > { %v3039_v51 = vpop.f32.mrf.mxu2  ;;  %v3688_v59 = vpop.f32.mrf.mxu3 }
 0x456   : > { %v9326_v54 = vadd.f32 %v3688_v59, %v3039_v51 }
 0x458   : > { %10157 = vst [vmem:[#allocation60_spill] sm:$0xff] %v9326_v54 }
 0x459   : > { %v2786_v53 = vpop.f32.mrf.mxu0 }
 0x45a   : > { %v3435_v39 = vpop.f32.mrf.mxu1 }
 0x45b   : > { %v9321_v36 = vadd.f32 %v3435_v39, %v2786_v53  ;;  %v7372_v53 = vld [vmem:[%s8457_s30 + $0x764] sm:$0xf]  ;;  %v6989_v39 = vor.u32 %v7373_v10, %v6988_v61 }
 0x45c   : > { %v6993_v45 = vor.u32 %v7372_v53, %v6990_v3 }
 0x45d   : > { %v7702_v49 = vpack.c.bf16 %v9321_v36, %v9319_v35  ;;  %v3041_v58 = vpop.f32.mrf.mxu2  ;;  %v3690_v32 = vpop.f32.mrf.mxu3 }
 0x45e   : > { %v9328_v62 = vadd.f32 %v3690_v32, %v3041_v58 }
 0x45f   : > { %8106 = vst [vmem:[%s8508_s10 + $0x1d0] sm:$0xff] %v7702_v49  }
 0x460   : > { %10158 = vst [vmem:[#allocation61_spill] sm:$0xff] %v9328_v62  ;;  %v7957_v37 = vpack.c.bf16 %v9328_v62, %v9326_v54  ;;  %v6998_v54 = vld [vmem:[%s8457_s30 + $0x778] sm:$0xf0] }
 0x461   : > { %v2789_v42 = vpop.f32.mrf.mxu0  ;;  %3083 = vmatmul.bf16.gmra.mxu2 %v6989_v39 }
 0x462   : > { %v3438_v25 = vpop.f32.mrf.mxu1  ;;  %8157 = vst [vmem:[%s8508_s10 + $0x368] sm:$0xff] %v7957_v37   ;;  %3732 = vmatmul.bf16.gmra.mxu3 %v6993_v45 }
 0x463   : > { %v9337_v49 = vadd.f32 %v3438_v25, %v2789_v42  ;;  %v6996_v42 = vld [vmem:[%s8457_s30 + $0x770] sm:$0xf]  ;;  %v7375_v25 = vld [vmem:[%s8457_s30 + $0x774] sm:$0xf0] }
 0x465   : > { %v3044_v32 = vpop.f32.mrf.mxu2  ;;  %v3693_v61 = vpop.f32.mrf.mxu3 }
 0x466   : > { %v9344_v53 = vadd.f32 %v3693_v61, %v3044_v32 }
 0x468   : > { %10159 = vst [vmem:[#allocation62_spill] sm:$0xff] %v9344_v53 }
 0x469   : > { %v2791_v51 = vpop.f32.mrf.mxu0 }
 0x46a   : > { %v3440_v59 = vpop.f32.mrf.mxu1 }
 0x46b   : > { %v9339_v58 = vadd.f32 %v3440_v59, %v2791_v51  ;;  %v7374_v51 = vld [vmem:[%s8457_s30 + $0x774] sm:$0xf]  ;;  %v6997_v59 = vor.u32 %v7375_v25, %v6996_v42 }
 0x46c   : > { %v7001_v63 = vor.u32 %v7374_v51, %v6998_v54 }
 0x46d   : > { %v7707_v10 = vpack.c.bf16 %v9339_v58, %v9337_v49  ;;  %v3046_v45 = vpop.f32.mrf.mxu2  ;;  %v3695_v39 = vpop.f32.mrf.mxu3 }
 0x46e   : > { %v9346_v62 = vadd.f32 %v3695_v39, %v3046_v45 }
 0x46f   : > { %8107 = vst [vmem:[%s8508_s10 + $0x1d8] sm:$0xff] %v7707_v10  }
 0x470   : > { %10160 = vst [vmem:[#allocation63_spill] sm:$0xff] %v9346_v62  ;;  %v7962_v60 = vpack.c.bf16 %v9346_v62, %v9344_v53  ;;  %v7006_v53 = vld [vmem:[%s8457_s30 + $0x788] sm:$0xf0] }
 0x471   : > { %v2794_v3 = vpop.f32.mrf.mxu0  ;;  %3088 = vmatmul.bf16.gmra.mxu2 %v6997_v59 }
 0x472   : > { %v3443_v37 = vpop.f32.mrf.mxu1  ;;  %8158 = vst [vmem:[%s8508_s10 + $0x370] sm:$0xff] %v7962_v60   ;;  %3737 = vmatmul.bf16.gmra.mxu3 %v7001_v63 }
 0x473   : > { %v9355_v10 = vadd.f32 %v3443_v37, %v2794_v3  ;;  %v7004_v3 = vld [vmem:[%s8457_s30 + $0x780] sm:$0xf]  ;;  %v7377_v37 = vld [vmem:[%s8457_s30 + $0x784] sm:$0xf0] }
 0x475   : > { %v3049_v39 = vpop.f32.mrf.mxu2  ;;  %v3698_v42 = vpop.f32.mrf.mxu3 }
 0x476   : > { %v9362_v51 = vadd.f32 %v3698_v42, %v3049_v39 }
 0x478   : > { %10161 = vst [vmem:[#allocation64_spill] sm:$0xff] %v9362_v51 }
 0x479   : > { %v2796_v32 = vpop.f32.mrf.mxu0 }
 0x47a   : > { %v3445_v61 = vpop.f32.mrf.mxu1 }
 0x47b   : > { %v9357_v45 = vadd.f32 %v3445_v61, %v2796_v32  ;;  %v7376_v32 = vld [vmem:[%s8457_s30 + $0x784] sm:$0xf]  ;;  %v7005_v61 = vor.u32 %v7377_v37, %v7004_v3 }
 0x47c   : > { %v7009_v31 = vor.u32 %v7376_v32, %v7006_v53 }
 0x47d   : > { %v7712_v25 = vpack.c.bf16 %v9357_v45, %v9355_v10  ;;  %v3051_v63 = vpop.f32.mrf.mxu2  ;;  %v3700_v59 = vpop.f32.mrf.mxu3 }
 0x47e   : > { %v9364_v62 = vadd.f32 %v3700_v59, %v3051_v63 }
 0x47f   : > { %8108 = vst [vmem:[%s8508_s10 + $0x1e0] sm:$0xff] %v7712_v25  }
 0x480   : > { %10162 = vst [vmem:[#allocation65_spill] sm:$0xff] %v9364_v62  ;;  %v7967_v46 = vpack.c.bf16 %v9364_v62, %v9362_v51  ;;  %v5181_v62 = vadd.f32 %v9303_v57, %v9319_v35 }
 0x481   : > { %v2799_v54 = vpop.f32.mrf.mxu0  ;;  %3093 = vmatmul.bf16.gmra.mxu2 %v7005_v61  ;;  %v7012_v61 = vld [vmem:[%s8457_s30 + $0x790] sm:$0xf] }
 0x482   : > { %v3448_v60 = vpop.f32.mrf.mxu1  ;;  %8159 = vst [vmem:[%s8508_s10 + $0x378] sm:$0xff] %v7967_v46   ;;  %3742 = vmatmul.bf16.gmra.mxu3 %v7009_v31  ;;  %v5444_v31 = vmul.f32 %v9319_v35, %v9319_v35 }
 0x483   : > { %v3449_v25 = vadd.f32 %v3448_v60, %v2799_v54  ;;  %v7379_v54 = vld [vmem:[%s8457_s30 + $0x794] sm:$0xf0]  ;;  %v7378_v60 = vld [vmem:[%s8457_s30 + $0x794] sm:$0xf] }
 0x484   : > { %v5699_v51 = vadd.f32 %v9306_v24, %v5444_v31 }
 0x485   : > { %v3054_v59 = vpop.f32.mrf.mxu2  ;;  %v3703_v17 = vpop.f32.mrf.mxu3 }
 0x486   : > { %v9374_v28 = vadd.f32 %v3703_v17, %v3054_v59 }
 0x488   : > { %10163 = vst [vmem:[#allocation66_spill] sm:$0xff] %v9374_v28 }
 0x489   : > { %v2801_v39 = vpop.f32.mrf.mxu0 }
 0x48a   : > { %v3450_v42 = vpop.f32.mrf.mxu1 }
 0x48b   : > { %v3451_v63 = vadd.f32 %v3450_v42, %v2801_v39  ;;  %v7013_v39 = vor.u32 %v7379_v54, %v7012_v61  ;;  %v7014_v42 = vld [vmem:[%s8457_s30 + $0x798] sm:$0xf0]  ;;  %v5447_v54 = vmul.f32 %v9339_v58, %v9339_v58 }
 0x48c   : > { %v7017_v59 = vor.u32 %v7378_v60, %v7014_v42 }
 0x48d   : > { %v7717_v33 = vpack.c.bf16 %v3451_v63, %v3449_v25  ;;  %v3056_v53 = vpop.f32.mrf.mxu2  ;;  %v3705_v46 = vpop.f32.mrf.mxu3 }
 0x48e   : > { %v9378_v32 = vadd.f32 %v3705_v46, %v3056_v53  ;;  %v5446_v53 = vmul.f32 %v9337_v49, %v9337_v49  ;;  %v5182_v46 = vadd.f32 %v5181_v62, %v9321_v36 }
 0x48f   : > { %8109 = vst [vmem:[%s8508_s10 + $0x1e8] sm:$0xff] %v7717_v33   ;;  %v5445_v33 = vmul.f32 %v9321_v36, %v9321_v36 }
 0x490   : > { %10164 = vst [vmem:[#allocation67_spill] sm:$0xff] %v9378_v32  ;;  %v7972_v17 = vpack.c.bf16 %v9378_v32, %v9374_v28  ;;  %v5183_v42 = vadd.f32 %v5182_v46, %v9337_v49 }
 0x491   : > { %v2804_v3 = vpop.f32.mrf.mxu0  ;;  %3098 = vmatmul.bf16.gmra.mxu2 %v7013_v39  ;;  %v5700_v61 = vadd.f32 %v5699_v51, %v5445_v33  ;;  %v5449_v51 = vmul.f32 %v9357_v45, %v9357_v45 }
 0x492   : > { %v3453_v37 = vpop.f32.mrf.mxu1  ;;  %8160 = vst [vmem:[%s8508_s10 + $0x380] sm:$0xff] %v7972_v17   ;;  %3747 = vmatmul.bf16.gmra.mxu3 %v7017_v59  ;;  %v5448_v17 = vmul.f32 %v9355_v10, %v9355_v10  ;;  %v5184_v59 = vadd.f32 %v5183_v42, %v9339_v58 }
 0x493   : > { %v3454_v57 = vadd.f32 %v3453_v37, %v2804_v3  ;;  %v5701_v31 = vadd.f32 %v5700_v61, %v5446_v53  ;;  %v5450_v3 = vmul.f32 %v3449_v25, %v3449_v25  ;;  %v5451_v61 = vmul.f32 %v3451_v63, %v3451_v63 }
 0x494   : > { %v5185_v33 = vadd.f32 %v5184_v59, %v9355_v10  ;;  %v7020_v59 = vld [vmem:[%s8457_s30 + $0x7a0] sm:$0xf] }
 0x495   : > { %v3059_v39 = vpop.f32.mrf.mxu2  ;;  %v3708_v24 = vpop.f32.mrf.mxu3  ;;  %v5702_v62 = vadd.f32 %v5701_v31, %v5447_v54  ;;  %v5452_v28 = vmul.f32 %v3454_v57, %v3454_v57 }
 0x496   : > { %v5186_v37 = vadd.f32 %v5185_v33, %v9357_v45  ;;  %v9406_v54 = vadd.f32 %v3708_v24, %v3059_v39  ;;  %v7022_v33 = vld [vmem:[%s8457_s30 + $0x7a8] sm:$0xf0] }
 0x497   : > { %v5703_v49 = vadd.f32 %v5702_v62, %v5448_v17  ;;  %v7380_v17 = vld [vmem:[%s8457_s30 + $0x7a4] sm:$0xf] }
 0x498   : > { %v5187_v58 = vadd.f32 %v5186_v37, %v3449_v25 }
 0x499   : > { %v2806_v32 = vpop.f32.mrf.mxu0 }
 0x49a   : > { %v3455_v60 = vpop.f32.mrf.mxu1  ;;  %v5188_v62 = vadd.f32 %v5187_v58, %v3451_v63 }
 0x49b   : > { %v3456_v35 = vadd.f32 %v3455_v60, %v2806_v32  ;;  %v5704_v32 = vadd.f32 %v5703_v49, %v5449_v51  ;;  %v7025_v49 = vor.u32 %v7380_v17, %v7022_v33 }
 0x49c   : > { %v5189_v24 = vadd.f32 %v5188_v62, %v3454_v57 }
 0x49d   : > { %v7722_v36 = vpack.c.bf16 %v3456_v35, %v3454_v57  ;;  %v3061_v60 = vpop.f32.mrf.mxu2  ;;  %v3710_v42 = vpop.f32.mrf.mxu3  ;;  %v5705_v31 = vadd.f32 %v5704_v32, %v5450_v3  ;;  %v5453_v37 = vmul.f32 %v3456_v35, %v3456_v35 }
 0x49e   : > { %v9408_v10 = vadd.f32 %v3710_v42, %v3061_v60  ;;  %v5190_v32 = vadd.f32 %v5189_v24, %v3456_v35  ;;  %v7383_v24 = vld [vmem:[%s8457_s30 + $0x7b4] sm:$0xf0] }
 0x49f   : > { %8110 = vst [vmem:[%s8508_s10 + $0x1f0] sm:$0xff] %v7722_v36   ;;  %v7381_v36 = vld [vmem:[%s8457_s30 + $0x7a4] sm:$0xf0]  ;;  %v5706_v39 = vadd.f32 %v5705_v31, %v5451_v61  ;;  %v5456_v61 = vmul.f32 %v8612_v8, %v8612_v8  ;;  %v5457_v31 = vmul.f32 %v8614_v12, %v8614_v12 }
 0x4a0   : > { %10165 = vst [vmem:[#allocation68_spill] sm:$0xff] %v9408_v10  ;;  %v7021_v51 = vor.u32 %v7381_v36, %v7020_v59  ;;  %v7977_v25 = vpack.c.bf16 %v9408_v10, %v9406_v54 }
 0x4a1   : > { %v2809_v53 = vpop.f32.mrf.mxu0  ;;  %v5707_v3 = vadd.f32 %v5706_v39, %v5452_v28 }
 0x4a2   : > { %v3458_v46 = vpop.f32.mrf.mxu1  ;;  %3103 = vmatmul.bf16.gmra.mxu2 %v7021_v51  ;;  %8161 = vst [vmem:[%s8508_s10 + $0x388] sm:$0xff] %v7977_v25   ;;  %3752 = vmatmul.bf16.gmra.mxu3 %v7025_v49 }
 0x4a3   : > { %v3459_v45 = vadd.f32 %v3458_v46, %v2809_v53  ;;  %v5708_v58 = vadd.f32 %v5707_v3, %v5453_v37  ;;  %v7382_v37 = vld [vmem:[%s8457_s30 + $0x7b4] sm:$0xf] }
 0x4a5   : > { %v5454_v60 = vmul.f32 %v3459_v45, %v3459_v45  ;;  %v5191_v53 = vadd.f32 %v5190_v32, %v3459_v45  ;;  %v3064_v59 = vpop.f32.mrf.mxu2  ;;  %v3713_v36 = vpop.f32.mrf.mxu3 }
 0x4a6   : > { %v9427_v49 = vadd.f32 %v3713_v36, %v3064_v59  ;;  %v5461_v59 = vmul.f32 %v8646_v14, %v8646_v14 }
 0x4a7   : > { %v5709_v21 = vadd.f32 %v5708_v58, %v5454_v60  ;;  %v5460_v58 = vmul.f32 %v8644_v9, %v8644_v9 }
 0x4a9   : > { %v2811_v42 = vpop.f32.mrf.mxu0 }
 0x4aa   : > { %v3460_v63 = vpop.f32.mrf.mxu1 }
 0x4ab   : > { %v3461_v46 = vadd.f32 %v3460_v63, %v2811_v42  ;;  %v7030_v42 = vld [vmem:[%s8457_s30 + $0x7b8] sm:$0xf0] }
 0x4ac   : > { %v7033_v63 = vor.u32 %v7382_v37, %v7030_v42 }
 0x4ad   : > { %v7727_v10 = vpack.c.bf16 %v3461_v46, %v3459_v45  ;;  %v5192_v17 = vadd.f32 %v5191_v53, %v3461_v46  ;;  %v5455_v57 = vmul.f32 %v3461_v46, %v3461_v46  ;;  %v5458_v45 = vmul.f32 %v8628_v40, %v8628_v40  ;;  %v3066_v39 = vpop.f32.mrf.mxu2 }
 0x4af   : > { %8111 = vst [vmem:[%s8508_s10 + $0x1f8] sm:$0xff] %v7727_v10   ;;  %v5193_v28 = vadd.f32 %v5192_v17, %v8612_v8  ;;  %v5710_v35 = vadd.f32 %v5709_v21, %v5455_v57  ;;  %v3715_v10 = vpop.f32.mrf.mxu3  ;;  %v7028_v21 = vld [vmem:[%s8457_s30 + $0x7b0] sm:$0xf]  ;;  %v5462_v17 = vmul.f32 %v8660_v43, %v8660_v43 }
 0x4b0   : > { %v9429_v8 = vadd.f32 %v3715_v10, %v3066_v39  ;;  %v7029_v60 = vor.u32 %v7383_v24, %v7028_v21  ;;  %v5466_v39 = vmul.f32 %v8692_v52, %v8692_v52 }
 0x4b1   : > { %v5194_v62 = vadd.f32 %v5193_v28, %v8614_v12  ;;  %v5711_v51 = vadd.f32 %v5710_v35, %v5456_v61  ;;  %v5459_v12 = vmul.f32 %v8630_v44, %v8630_v44 }
 0x4b2   : > { %3108 = vmatmul.bf16.gmra.mxu2 %v7029_v60  ;;  %3757 = vmatmul.bf16.gmra.mxu3 %v7033_v63  ;;  %v7038_v63 = vld [vmem:[%s8457_s30 + $0x7c8] sm:$0xf0] }
 0x4b3   : > { %v5195_v33 = vadd.f32 %v5194_v62, %v8628_v40  ;;  %v5712_v25 = vadd.f32 %v5711_v51, %v5457_v31  ;;  %v7982_v40 = vpack.c.bf16 %v9429_v8, %v9427_v49 }
 0x4b5   : > { %v5196_v3 = vadd.f32 %v5195_v33, %v8630_v44  ;;  %v5713_v32 = vadd.f32 %v5712_v25, %v5458_v45  ;;  %8162 = vst [vmem:[%s8508_s10 + $0x390] sm:$0xff] %v7982_v40   ;;  %v3069_v28 = vpop.f32.mrf.mxu2 }
 0x4b7   : > { %v5197_v53 = vadd.f32 %v5196_v3, %v8644_v9  ;;  %v5714_v46 = vadd.f32 %v5713_v32, %v5459_v12  ;;  %v3718_v35 = vpop.f32.mrf.mxu3  ;;  %v5463_v9 = vmul.f32 %v8662_v48, %v8662_v48  ;;  %v7036_v12 = vld [vmem:[%s8457_s30 + $0x7c0] sm:$0xf]  ;;  %v7385_v3 = vld [vmem:[%s8457_s30 + $0x7c4] sm:$0xf0]  ;;  %v7384_v32 = vld [vmem:[%s8457_s30 + $0x7c4] sm:$0xf] }
 0x4b8   : > { %v9462_v21 = vadd.f32 %v3718_v35, %v3069_v28  ;;  %v7037_v40 = vor.u32 %v7385_v3, %v7036_v12 }
 0x4b9   : > { %v5198_v44 = vadd.f32 %v5197_v53, %v8646_v14  ;;  %v5715_v36 = vadd.f32 %v5714_v46, %v5460_v58  ;;  %v5464_v14 = vmul.f32 %v8676_v16, %v8676_v16  ;;  %v7041_v58 = vor.u32 %v7384_v32, %v7038_v63 }
 0x4ba   : > { %v5468_v53 = vmul.f32 %v8708_v26, %v8708_v26 }
 0x4bb   : > { %v5199_v57 = vadd.f32 %v5198_v44, %v8660_v43  ;;  %v5716_v61 = vadd.f32 %v5715_v36, %v5461_v59  ;;  %v5465_v43 = vmul.f32 %v8678_v20, %v8678_v20  ;;  %v5469_v44 = vmul.f32 %v8710_v30, %v8710_v30 }
 0x4bd   : > { %v5200_v31 = vadd.f32 %v5199_v57, %v8662_v48  ;;  %v5717_v62 = vadd.f32 %v5716_v61, %v5462_v17  ;;  %v3071_v24 = vpop.f32.mrf.mxu2  ;;  %v5470_v17 = vmul.f32 %v8724_v0, %v8724_v0 }
 0x4bf   : > { %v5201_v51 = vadd.f32 %v5200_v31, %v8676_v16  ;;  %v5718_v45 = vadd.f32 %v5717_v62, %v5463_v9  ;;  %v3720_v37 = vpop.f32.mrf.mxu3 }
 0x4c0   : > { %v9464_v16 = vadd.f32 %v3720_v37, %v3071_v24  ;;  %v7387_v24 = vld [vmem:[%s8457_s30 + $0x7d4] sm:$0xf0]  ;;  %v7386_v37 = vld [vmem:[%s8457_s30 + $0x7d4] sm:$0xf] }
 0x4c1   : > { %v5202_v33 = vadd.f32 %v5201_v51, %v8678_v20  ;;  %v5719_v25 = vadd.f32 %v5718_v45, %v5464_v14  ;;  %v5467_v20 = vmul.f32 %v8694_v56, %v8694_v56 }
 0x4c2   : > { %3113 = vmatmul.bf16.gmra.mxu2 %v7037_v40  ;;  %3762 = vmatmul.bf16.gmra.mxu3 %v7041_v58 }
 0x4c3   : > { %v5203_v48 = vadd.f32 %v5202_v33, %v8692_v52  ;;  %v5720_v10 = vadd.f32 %v5719_v25, %v5465_v43  ;;  %v7987_v52 = vpack.c.bf16 %v9464_v16, %v9462_v21  ;;  %v5474_v43 = vmul.f32 %v8756_v22, %v8756_v22 }
 0x4c5   : > { %v5204_v60 = vadd.f32 %v5203_v48, %v8694_v56  ;;  %v5721_v42 = vadd.f32 %v5720_v10, %v5466_v39  ;;  %8163 = vst [vmem:[%s8508_s10 + $0x398] sm:$0xff] %v7987_v52   ;;  %v3074_v28 = vpop.f32.mrf.mxu2  ;;  %v7044_v10 = vld [vmem:[%s8457_s30 + $0x7d0] sm:$0xf]  ;;  %v5477_v52 = vmul.f32 %v8774_v6, %v8774_v6 }
 0x4c6   : > { %v7045_v32 = vor.u32 %v7387_v24, %v7044_v10 }
 0x4c7   : > { %v5205_v46 = vadd.f32 %v5204_v60, %v8708_v26  ;;  %v5722_v59 = vadd.f32 %v5721_v42, %v5467_v20  ;;  %v3723_v35 = vpop.f32.mrf.mxu3  ;;  %v5471_v26 = vmul.f32 %v8726_v4, %v8726_v4  ;;  %v7046_v20 = vld [vmem:[%s8457_s30 + $0x7d8] sm:$0xf0]  ;;  %v5476_v42 = vmul.f32 %v8772_v1, %v8772_v1 }
 0x4c8   : > { %v9497_v25 = vadd.f32 %v3723_v35, %v3074_v28  ;;  %v7049_v60 = vor.u32 %v7386_v37, %v7046_v20  ;;  %v5485_v37 = vmul.f32 %v8838_v19, %v8838_v19 }
 0x4c9   : > { %v5206_v56 = vadd.f32 %v5205_v46, %v8710_v30  ;;  %v5723_v36 = vadd.f32 %v5722_v59, %v5468_v53  ;;  %v5472_v30 = vmul.f32 %v8740_v41, %v8740_v41  ;;  %v5478_v53 = vmul.f32 %v8788_v50, %v8788_v50 }
 0x4cb   : > { %v5207_v57 = vadd.f32 %v5206_v56, %v8724_v0  ;;  %v5724_v61 = vadd.f32 %v5723_v36, %v5469_v44  ;;  %v5473_v0 = vmul.f32 %v8742_v47, %v8742_v47 }
 0x4cd   : > { %v5208_v9 = vadd.f32 %v5207_v57, %v8726_v4  ;;  %v5725_v31 = vadd.f32 %v5724_v61, %v5470_v17  ;;  %v3076_v39 = vpop.f32.mrf.mxu2 }
 0x4cf   : > { %v5209_v62 = vadd.f32 %v5208_v9, %v8740_v41  ;;  %v5726_v14 = vadd.f32 %v5725_v31, %v5471_v26  ;;  %v3725_v48 = vpop.f32.mrf.mxu3  ;;  %v5482_v26 = vmul.f32 %v8820_v23, %v8820_v23 }
 0x4d0   : > { %v9499_v41 = vadd.f32 %v3725_v48, %v3076_v39  ;;  %v5484_v48 = vmul.f32 %v8836_v13, %v8836_v13 }
 0x4d1   : > { %v5210_v51 = vadd.f32 %v5209_v62, %v8742_v47  ;;  %v5727_v45 = vadd.f32 %v5726_v14, %v5472_v30  ;;  %v5475_v47 = vmul.f32 %v8758_v27, %v8758_v27  ;;  %v7052_v14 = vld [vmem:[%s8457_s30 + $0x7e0] sm:$0xf] }
 0x4d2   : > { %3118 = vmatmul.bf16.gmra.mxu2 %v7045_v32  ;;  %3767 = vmatmul.bf16.gmra.mxu3 %v7049_v60 }
 0x4d3   : > { %v5211_v4 = vadd.f32 %v5210_v51, %v8756_v22  ;;  %v5728_v33 = vadd.f32 %v5727_v45, %v5473_v0  ;;  %v7992_v22 = vpack.c.bf16 %v9499_v41, %v9497_v25  ;;  %v7389_v0 = vld [vmem:[%s8457_s30 + $0x7e4] sm:$0xf0]  ;;  %v7388_v51 = vld [vmem:[%s8457_s30 + $0x7e4] sm:$0xf] }
 0x4d5   : > { %v5212_v12 = vadd.f32 %v5211_v4, %v8758_v27  ;;  %v5729_v3 = vadd.f32 %v5728_v33, %v5474_v43  ;;  %8164 = vst [vmem:[%s8508_s10 + $0x3a0] sm:$0xff] %v7992_v22   ;;  %v3079_v44 = vpop.f32.mrf.mxu2  ;;  %v7053_v4 = vor.u32 %v7389_v0, %v7052_v14  ;;  %v7054_v33 = vld [vmem:[%s8457_s30 + $0x7e8] sm:$0xf0]  ;;  %v10168_v14 = vld [vmem:[#allocation8_spill] sm:$0xff] }
 0x4d6   : > { %v7057_v39 = vor.u32 %v7388_v51, %v7054_v33  ;;  %v5494_v0 = vmul.f32 %v10168_v14, %v10168_v14 }
 0x4d7   : > { %v5213_v40 = vadd.f32 %v5212_v12, %v8772_v1  ;;  %v5730_v63 = vadd.f32 %v5729_v3, %v5475_v47  ;;  %v3728_v56 = vpop.f32.mrf.mxu3  ;;  %v5479_v1 = vmul.f32 %v8790_v55, %v8790_v55  ;;  %v5486_v12 = vmul.f32 %v8852_v5, %v8852_v5 }
 0x4d8   : > { %v9532_v31 = vadd.f32 %v3728_v56, %v3079_v44  ;;  %v7060_v56 = vld [vmem:[%s8457_s30 + $0x7f0] sm:$0xf] }
 0x4d9   : > { %v5214_v27 = vadd.f32 %v5213_v40, %v8774_v6  ;;  %v5731_v58 = vadd.f32 %v5730_v63, %v5476_v42  ;;  %v5480_v6 = vmul.f32 %v8804_v34, %v8804_v34 }
 0x4db   : > { %v5215_v46 = vadd.f32 %v5214_v27, %v8788_v50  ;;  %v5732_v59 = vadd.f32 %v5731_v58, %v5477_v52  ;;  %v5481_v50 = vmul.f32 %v8806_v38, %v8806_v38  ;;  %v5490_v58 = vmul.f32 %v8884_v7, %v8884_v7 }
 0x4dd   : > { %v5216_v36 = vadd.f32 %v5215_v46, %v8790_v55  ;;  %v5733_v17 = vadd.f32 %v5732_v59, %v5478_v53  ;;  %v3081_v30 = vpop.f32.mrf.mxu2 }
 0x4df   : > { %v5217_v57 = vadd.f32 %v5216_v36, %v8804_v34  ;;  %v5734_v61 = vadd.f32 %v5733_v17, %v5479_v1  ;;  %v3730_v62 = vpop.f32.mrf.mxu3  ;;  %v7391_v1 = vld [vmem:[%s8457_s30 + $0x7f4] sm:$0xf0]  ;;  %v7390_v36 = vld [vmem:[%s8457_s30 + $0x7f4] sm:$0xf] }
 0x4e0   : > { %v9534_v34 = vadd.f32 %v3730_v62, %v3081_v30 }
 0x4e1   : > { %v5218_v28 = vadd.f32 %v5217_v57, %v8806_v38  ;;  %v5735_v35 = vadd.f32 %v5734_v61, %v5480_v6  ;;  %v5483_v38 = vmul.f32 %v8822_v29, %v8822_v29  ;;  %v7061_v57 = vor.u32 %v7391_v1, %v7060_v56  ;;  %v7062_v61 = vld [vmem:[%s8457_s30 + $0x7f8] sm:$0xf0]  ;;  %v10175_v56 = vld [vmem:[#allocation15_spill] sm:$0xff]  ;;  %s8265_s30 = scalar_lea.hbm %s8264_s29, 1024 }
 0x4e2   : > { %3123 = vmatmul.bf16.gmra.mxu2 %v7053_v4  ;;  %3772 = vmatmul.bf16.gmra.mxu3 %v7057_v39  ;;  %v10169_v4 = vld [vmem:[#allocation9_spill] sm:$0xff]  ;;  %v5501_v1 = vmul.f32 %v10175_v56, %v10175_v56  ;;  %p8266_p12 = scmp.ne.s32.totalorder %s8264_s29, %s8265_s30  ;;  %p8271_p2 = scmp.lt.s32.totalorder %s8269_s6, %s8265_s30 }
 0x4e3   : > { %v5219_v55 = vadd.f32 %v5218_v28, %v8820_v23  ;;  %v5736_v9 = vadd.f32 %v5735_v35, %v5481_v50  ;;  %v7997_v23 = vpack.c.bf16 %v9534_v34, %v9532_v31  ;;  %v7065_v50 = vor.u32 %v7390_v36, %v7062_v61  ;;  %v10166_v28 = vld [vmem:[#allocation6_spill] sm:$0xff] }
 0x4e4   : > { %v5492_v35 = vmul.f32 %v10166_v28, %v10166_v28  ;;  %v5495_v33 = vmul.f32 %v10169_v4, %v10169_v4  ;;  %p8267_p13 = pnand %p8266_p12, %p8396_p4  ;;  %p8272_p3 = por %p8271_p2, %p8270_p1 }
 0x4e5   : > { %v5220_v45 = vadd.f32 %v5219_v55, %v8822_v29  ;;  %v5737_v43 = vadd.f32 %v5736_v9, %v5482_v26  ;;  %8165 = vst [vmem:[%s8508_s10 + $0x3a8] sm:$0xff] %v7997_v23   ;;  %v3084_v20 = vpop.f32.mrf.mxu2  ;;  %v10167_v9 = vld [vmem:[#allocation7_spill] sm:$0xff] }
 0x4e6   : > { %v5493_v30 = vmul.f32 %v10167_v9, %v10167_v9  ;;  %p8268_p0 = pneg %p8267_p13 }
 0x4e7   : > { %v5221_v10 = vadd.f32 %v5220_v45, %v8836_v13  ;;  %v5738_v24 = vadd.f32 %v5737_v43, %v5483_v38  ;;  %v3733_v22 = vpop.f32.mrf.mxu3  ;;  %v5487_v13 = vmul.f32 %v8854_v15, %v8854_v15 }
 0x4e8   : > { %v9567_v46 = vadd.f32 %v3733_v22, %v3084_v20  ;;  %p8273_p5 = pnand %p8272_p3, %p8268_p0 }
 0x4e9   : > { %v5222_v29 = vadd.f32 %v5221_v10, %v8838_v19  ;;  %v5739_v47 = vadd.f32 %v5738_v24, %v5484_v48  ;;  %v5488_v19 = vmul.f32 %v8868_v2, %v8868_v2  ;;  %v10170_v48 = vld [vmem:[#allocation10_spill] sm:$0xff] }
 0x4ea   : > { %v5496_v10 = vmul.f32 %v10170_v48, %v10170_v48 }
 0x4eb   : > { %v5223_v3 = vadd.f32 %v5222_v29, %v8852_v5  ;;  %v5740_v32 = vadd.f32 %v5739_v47, %v5485_v37  ;;  %v5489_v5 = vmul.f32 %v8870_v11, %v8870_v11  ;;  %v10171_v29 = vld [vmem:[#allocation11_spill] sm:$0xff] }
 0x4ec   : > { %v5497_v47 = vmul.f32 %v10171_v29, %v10171_v29 }
 0x4ed   : > { %v5224_v60 = vadd.f32 %v5223_v3, %v8854_v15  ;;  %v5741_v42 = vadd.f32 %v5740_v32, %v5486_v12  ;;  %v3086_v59 = vpop.f32.mrf.mxu2  ;;  %v10172_v32 = vld [vmem:[#allocation12_spill] sm:$0xff] }
 0x4ee   : > { %v5498_v20 = vmul.f32 %v10172_v32, %v10172_v32 }
 0x4ef   : > { %v5225_v40 = vadd.f32 %v5224_v60, %v8868_v2  ;;  %v5742_v63 = vadd.f32 %v5741_v42, %v5487_v13  ;;  %v3735_v44 = vpop.f32.mrf.mxu3 }
 0x4f0   : > { %v9569_v2 = vadd.f32 %v3735_v44, %v3086_v59 }
 0x4f1   : > { %v5226_v52 = vadd.f32 %v5225_v40, %v8870_v11  ;;  %v5743_v27 = vadd.f32 %v5742_v63, %v5488_v19  ;;  %v5491_v11 = vmul.f32 %v8886_v18, %v8886_v18  ;;  %v10173_v63 = vld [vmem:[#allocation13_spill] sm:$0xff] }
 0x4f2   : > { %3128 = vmatmul.bf16.gmra.mxu2 %v7061_v57  ;;  %3777 = vmatmul.bf16.gmra.mxu3 %v7065_v50 }
 0x4f3   : > { %v5227_v15 = vadd.f32 %v5226_v52, %v8884_v7  ;;  %v5744_v53 = vadd.f32 %v5743_v27, %v5489_v5  ;;  %v8002_v7 = vpack.c.bf16 %v9569_v2, %v9567_v46  ;;  %v5499_v5 = vmul.f32 %v10173_v63, %v10173_v63 }
 0x4f5   : > { %v5228_v17 = vadd.f32 %v5227_v15, %v8886_v18  ;;  %v5745_v6 = vadd.f32 %v5744_v53, %v5490_v58  ;;  %8166 = vst [vmem:[%s8508_s10 + $0x3b0] sm:$0xff] %v8002_v7   ;;  %v3089_v45 = vpop.f32.mrf.mxu2  ;;  %v10174_v15 = vld [vmem:[#allocation14_spill] sm:$0xff] }
 0x4f6   : > { %v5500_v53 = vmul.f32 %v10174_v15, %v10174_v15 }
 0x4f7   : > { %v5229_v26 = vadd.f32 %v5228_v17, %v10166_v28  ;;  %v5746_v55 = vadd.f32 %v5745_v6, %v5491_v11  ;;  %v3738_v43 = vpop.f32.mrf.mxu3  ;;  %v10176_v17 = vld [vmem:[#allocation16_spill] sm:$0xff]  ;;  %v10177_v28 = vld [vmem:[#allocation17_spill] sm:$0xff] }
 0x4f8   : > { %v9602_v60 = vadd.f32 %v3738_v43, %v3089_v45  ;;  %v5502_v6 = vmul.f32 %v10176_v17, %v10176_v17  ;;  %v10180_v45 = vld [vmem:[#allocation20_spill] sm:$0xff] }
 0x4f9   : > { %v5230_v18 = vadd.f32 %v5229_v26, %v10167_v9  ;;  %v5747_v62 = vadd.f32 %v5746_v55, %v5492_v35  ;;  %v5503_v35 = vmul.f32 %v10177_v28, %v10177_v28  ;;  %v10178_v9 = vld [vmem:[#allocation18_spill] sm:$0xff]  ;;  %v5506_v43 = vmul.f32 %v10180_v45, %v10180_v45 }
 0x4fb   : > { %v5231_v51 = vadd.f32 %v5230_v18, %v10168_v14  ;;  %v5748_v38 = vadd.f32 %v5747_v62, %v5493_v30  ;;  %v5504_v30 = vmul.f32 %v10178_v9, %v10178_v9  ;;  %v10179_v14 = vld [vmem:[#allocation19_spill] sm:$0xff] }
 0x4fd   : > { %v5232_v23 = vadd.f32 %v5231_v51, %v10169_v4  ;;  %v5749_v39 = vadd.f32 %v5748_v38, %v5494_v0  ;;  %v3091_v42 = vpop.f32.mrf.mxu2  ;;  %v5505_v0 = vmul.f32 %v10179_v14, %v10179_v14 }
 0x4ff   : > { %v5233_v24 = vadd.f32 %v5232_v23, %v10170_v48  ;;  %v5750_v37 = vadd.f32 %v5749_v39, %v5495_v33  ;;  %v3740_v19 = vpop.f32.mrf.mxu3 }
 0x500   : > { %v9604_v40 = vadd.f32 %v3740_v19, %v3091_v42 }
 0x501   : > { %v5234_v12 = vadd.f32 %v5233_v24, %v10171_v29  ;;  %v5751_v3 = vadd.f32 %v5750_v37, %v5496_v10  ;;  %v10181_v24 = vld [vmem:[#allocation21_spill] sm:$0xff] }
 0x502   : > { %v8007_v58 = vpack.c.bf16 %v9604_v40, %v9602_v60  ;;  %v5507_v37 = vmul.f32 %v10181_v24, %v10181_v24 }
 0x503   : > { %v5235_v22 = vadd.f32 %v5234_v12, %v10172_v32  ;;  %v5752_v13 = vadd.f32 %v5751_v3, %v5497_v47  ;;  %v10182_v3 = vld [vmem:[#allocation22_spill] sm:$0xff] }
 0x504   : > { %8167 = vst [vmem:[%s8508_s10 + $0x3b8] sm:$0xff] %v8007_v58   ;;  %v5508_v32 = vmul.f32 %v10182_v3, %v10182_v3 }
 0x505   : > { %v5236_v52 = vadd.f32 %v5235_v22, %v10173_v63  ;;  %v5753_v27 = vadd.f32 %v5752_v13, %v5498_v20  ;;  %v3094_v7 = vpop.f32.mrf.mxu2  ;;  %v10183_v13 = vld [vmem:[#allocation23_spill] sm:$0xff] }
 0x506   : > { %v5509_v42 = vmul.f32 %v10183_v13, %v10183_v13 }
 0x507   : > { %v5237_v59 = vadd.f32 %v5236_v52, %v10174_v15  ;;  %v5754_v44 = vadd.f32 %v5753_v27, %v5499_v5  ;;  %v3743_v50 = vpop.f32.mrf.mxu3  ;;  %v10184_v5 = vld [vmem:[#allocation24_spill] sm:$0xff] }
 0x508   : > { %v9633_v23 = vadd.f32 %v3743_v50, %v3094_v7  ;;  %v5510_v52 = vmul.f32 %v10184_v5, %v10184_v5 }
 0x509   : > { %v5238_v36 = vadd.f32 %v5237_v59, %v10175_v56  ;;  %v5755_v11 = vadd.f32 %v5754_v44, %v5500_v53  ;;  %v10185_v59 = vld [vmem:[#allocation25_spill] sm:$0xff] }
 0x50a   : > { %v5511_v44 = vmul.f32 %v10185_v59, %v10185_v59 }
 0x50b   : > { %v5239_v57 = vadd.f32 %v5238_v36, %v10176_v17  ;;  %v5756_v61 = vadd.f32 %v5755_v11, %v5501_v1  ;;  %v10186_v36 = vld [vmem:[#allocation26_spill] sm:$0xff] }
 0x50c   : > { %v5512_v11 = vmul.f32 %v10186_v36, %v10186_v36 }
 0x50d   : > { %v5240_v26 = vadd.f32 %v5239_v57, %v10177_v28  ;;  %v5757_v55 = vadd.f32 %v5756_v61, %v5502_v6  ;;  %v3096_v39 = vpop.f32.mrf.mxu2  ;;  %v10187_v57 = vld [vmem:[#allocation27_spill] sm:$0xff]  ;;  %v10188_v28 = vld [vmem:[#allocation28_spill] sm:$0xff] }
 0x50e   : > { %v5513_v61 = vmul.f32 %v10187_v57, %v10187_v57 }
 0x50f   : > { %v5758_v18 = vadd.f32 %v5757_v55, %v5503_v35  ;;  %v5241_v62 = vadd.f32 %v5240_v26, %v10178_v9  ;;  %v3745_v48 = vpop.f32.mrf.mxu3  ;;  %v5514_v35 = vmul.f32 %v10188_v28, %v10188_v28 }
 0x510   : > { %v9635_v10 = vadd.f32 %v3745_v48, %v3096_v39  ;;  %v10191_v48 = vld [vmem:[#allocation31_spill] sm:$0xff] }
 0x511   : > { %v5242_v51 = vadd.f32 %v5241_v62, %v10179_v14  ;;  %v5759_v38 = vadd.f32 %v5758_v18, %v5504_v30  ;;  %v10189_v14 = vld [vmem:[#allocation29_spill] sm:$0xff] }
 0x512   : > { %v8012_v12 = vpack.c.bf16 %v9635_v10, %v9633_v23 }
 0x513   : > { %v5243_v4 = vadd.f32 %v5242_v51, %v10180_v45  ;;  %v5760_v33 = vadd.f32 %v5759_v38, %v5505_v0  ;;  %v5515_v0 = vmul.f32 %v10189_v14, %v10189_v14 }
 0x514   : > { %8168 = vst [vmem:[%s8508_s10 + $0x3c0] sm:$0xff] %v8012_v12  }
 0x515   : > { %v5244_v29 = vadd.f32 %v5243_v4, %v10181_v24  ;;  %v5761_v47 = vadd.f32 %v5760_v33, %v5506_v43  ;;  %v3099_v15 = vpop.f32.mrf.mxu2  ;;  %v10190_v43 = vld [vmem:[#allocation30_spill] sm:$0xff]  ;;  %v5517_v24 = vmul.f32 %v10191_v48, %v10191_v48 }
 0x516   : > { %v5516_v4 = vmul.f32 %v10190_v43, %v10190_v43 }
 0x517   : > { %v5245_v20 = vadd.f32 %v5244_v29, %v10182_v3  ;;  %v5762_v22 = vadd.f32 %v5761_v47, %v5507_v37  ;;  %v3748_v53 = vpop.f32.mrf.mxu3  ;;  %v10192_v47 = vld [vmem:[#allocation32_spill] sm:$0xff] }
 0x518   : > { %v9664_v9 = vadd.f32 %v3748_v53, %v3099_v15  ;;  %v5518_v12 = vmul.f32 %v10192_v47, %v10192_v47  ;;  %v10195_v15 = vld [vmem:[#allocation35_spill] sm:$0xff] }
 0x519   : > { %v5246_v19 = vadd.f32 %v5245_v20, %v10183_v13  ;;  %v5763_v63 = vadd.f32 %v5762_v22, %v5508_v32  ;;  %v10193_v13 = vld [vmem:[#allocation33_spill] sm:$0xff]  ;;  %v5521_v53 = vmul.f32 %v10195_v15, %v10195_v15 }
 0x51b   : > { %v5247_v27 = vadd.f32 %v5246_v19, %v10184_v5  ;;  %v5764_v58 = vadd.f32 %v5763_v63, %v5509_v42  ;;  %v5519_v42 = vmul.f32 %v10193_v13, %v10193_v13  ;;  %v10194_v5 = vld [vmem:[#allocation34_spill] sm:$0xff] }
 0x51d   : > { %v5248_v56 = vadd.f32 %v5247_v27, %v10185_v59  ;;  %v5765_v1 = vadd.f32 %v5764_v58, %v5510_v52  ;;  %v3101_v30 = vpop.f32.mrf.mxu2  ;;  %v5520_v52 = vmul.f32 %v10194_v5, %v10194_v5 }
 0x51f   : > { %v5249_v17 = vadd.f32 %v5248_v56, %v10186_v36  ;;  %v5766_v6 = vadd.f32 %v5765_v1, %v5511_v44  ;;  %v3750_v18 = vpop.f32.mrf.mxu3  ;;  %v10196_v56 = vld [vmem:[#allocation36_spill] sm:$0xff] }
 0x520   : > { %v9666_v62 = vadd.f32 %v3750_v18, %v3101_v30  ;;  %v5522_v1 = vmul.f32 %v10196_v56, %v10196_v56 }
 0x521   : > { %v5250_v7 = vadd.f32 %v5249_v17, %v10187_v57  ;;  %v5767_v50 = vadd.f32 %v5766_v6, %v5512_v11 }
 0x522   : > { %v8017_v45 = vpack.c.bf16 %v9666_v62, %v9664_v9 }
 0x523   : > { %v5251_v26 = vadd.f32 %v5250_v7, %v10188_v28  ;;  %v5768_v55 = vadd.f32 %v5767_v50, %v5513_v61  ;;  %v10197_v7 = vld [vmem:[#allocation37_spill] sm:$0xff] }
 0x524   : > { %8169 = vst [vmem:[%s8508_s10 + $0x3c8] sm:$0xff] %v8017_v45   ;;  %v5523_v50 = vmul.f32 %v10197_v7, %v10197_v7 }
 0x525   : > { %v5252_v51 = vadd.f32 %v5251_v26, %v10189_v14  ;;  %v5769_v38 = vadd.f32 %v5768_v55, %v5514_v35  ;;  %v3104_v20 = vpop.f32.mrf.mxu2  ;;  %v10198_v55 = vld [vmem:[#allocation38_spill] sm:$0xff] }
 0x526   : > { %v5524_v30 = vmul.f32 %v10198_v55, %v10198_v55 }
 0x527   : > { %v5253_v33 = vadd.f32 %v5252_v51, %v10190_v43  ;;  %v5770_v39 = vadd.f32 %v5769_v38, %v5515_v0  ;;  %v3753_v22 = vpop.f32.mrf.mxu3  ;;  %v10199_v0 = vld [vmem:[#allocation39_spill] sm:$0xff]  ;;  %v10200_v43 = vld [vmem:[#allocation40_spill] sm:$0xff] }
 0x528   : > { %v9695_v17 = vadd.f32 %v3753_v22, %v3104_v20  ;;  %v5525_v51 = vmul.f32 %v10199_v0, %v10199_v0 }
 0x529   : > { %v5254_v37 = vadd.f32 %v5253_v33, %v10191_v48  ;;  %v5771_v29 = vadd.f32 %v5770_v39, %v5516_v4  ;;  %v5526_v4 = vmul.f32 %v10200_v43, %v10200_v43 }
 0x52b   : > { %v5255_v3 = vadd.f32 %v5254_v37, %v10192_v47  ;;  %v5772_v32 = vadd.f32 %v5771_v29, %v5517_v24  ;;  %v10201_v37 = vld [vmem:[#allocation41_spill] sm:$0xff] }
 0x52c   : > { %v5527_v29 = vmul.f32 %v10201_v37, %v10201_v37 }
 0x52d   : > { %v5256_v19 = vadd.f32 %v5255_v3, %v10193_v13  ;;  %v5773_v63 = vadd.f32 %v5772_v32, %v5518_v12  ;;  %v3106_v6 = vpop.f32.mrf.mxu2  ;;  %v10202_v3 = vld [vmem:[#allocation42_spill] sm:$0xff]  ;;  %v10203_v13 = vld [vmem:[#allocation43_spill] sm:$0xff] }
 0x52e   : > { %v5528_v32 = vmul.f32 %v10202_v3, %v10202_v3 }
 0x52f   : > { %v5257_v27 = vadd.f32 %v5256_v19, %v10194_v5  ;;  %v5774_v58 = vadd.f32 %v5773_v63, %v5519_v42  ;;  %v3755_v57 = vpop.f32.mrf.mxu3  ;;  %v5529_v42 = vmul.f32 %v10203_v13, %v10203_v13  ;;  %v10204_v5 = vld [vmem:[#allocation44_spill] sm:$0xff] }
 0x530   : > { %v9697_v61 = vadd.f32 %v3755_v57, %v3106_v6  ;;  %v10206_v57 = vld [vmem:[#allocation46_spill] sm:$0xff] }
 0x531   : > { %v5258_v59 = vadd.f32 %v5257_v27, %v10195_v15  ;;  %v5775_v44 = vadd.f32 %v5774_v58, %v5520_v52  ;;  %v5530_v52 = vmul.f32 %v10204_v5, %v10204_v5 }
 0x532   : > { %v8022_v26 = vpack.c.bf16 %v9697_v61, %v9695_v17 }
 0x533   : > { %v5259_v36 = vadd.f32 %v5258_v59, %v10196_v56  ;;  %v5776_v11 = vadd.f32 %v5775_v44, %v5521_v53  ;;  %v10205_v56 = vld [vmem:[#allocation45_spill] sm:$0xff] }
 0x534   : > { %8170 = vst [vmem:[%s8508_s10 + $0x3d0] sm:$0xff] %v8022_v26  }
 0x535   : > { %v5260_v28 = vadd.f32 %v5259_v36, %v10197_v7  ;;  %v5777_v35 = vadd.f32 %v5776_v11, %v5522_v1  ;;  %v3109_v48 = vpop.f32.mrf.mxu2  ;;  %v5531_v1 = vmul.f32 %v10205_v56, %v10205_v56  ;;  %v5532_v7 = vmul.f32 %v10206_v57, %v10206_v57 }
 0x537   : > { %v5261_v18 = vadd.f32 %v5260_v28, %v10198_v55  ;;  %v5778_v14 = vadd.f32 %v5777_v35, %v5523_v50  ;;  %v3758_v24 = vpop.f32.mrf.mxu3  ;;  %v10207_v35 = vld [vmem:[#allocation47_spill] sm:$0xff] }
 0x538   : > { %v9726_v15 = vadd.f32 %v3758_v24, %v3109_v48  ;;  %v5533_v26 = vmul.f32 %v10207_v35, %v10207_v35  ;;  %v10210_v48 = vld [vmem:[#allocation50_spill] sm:$0xff] }
 0x539   : > { %v5262_v38 = vadd.f32 %v5261_v18, %v10199_v0  ;;  %v5779_v45 = vadd.f32 %v5778_v14, %v5524_v30  ;;  %v10208_v18 = vld [vmem:[#allocation48_spill] sm:$0xff]  ;;  %v5536_v24 = vmul.f32 %v10210_v48, %v10210_v48 }
 0x53a   : > { %v5534_v14 = vmul.f32 %v10208_v18, %v10208_v18 }
 0x53b   : > { %v5263_v33 = vadd.f32 %v5262_v38, %v10200_v43  ;;  %v5780_v39 = vadd.f32 %v5779_v45, %v5525_v51  ;;  %v10209_v43 = vld [vmem:[#allocation49_spill] sm:$0xff] }
 0x53d   : > { %v5264_v47 = vadd.f32 %v5263_v33, %v10201_v37  ;;  %v5781_v12 = vadd.f32 %v5780_v39, %v5526_v4  ;;  %v3111_v53 = vpop.f32.mrf.mxu2  ;;  %v5535_v4 = vmul.f32 %v10209_v43, %v10209_v43 }
 0x53f   : > { %v5265_v20 = vadd.f32 %v5264_v47, %v10202_v3  ;;  %v5782_v22 = vadd.f32 %v5781_v12, %v5527_v29  ;;  %v3760_v59 = vpop.f32.mrf.mxu3  ;;  %v10211_v47 = vld [vmem:[#allocation51_spill] sm:$0xff] }
 0x540   : > { %v9728_v44 = vadd.f32 %v3760_v59, %v3111_v53  ;;  %v5537_v12 = vmul.f32 %v10211_v47, %v10211_v47 }
 0x541   : > { %v5266_v19 = vadd.f32 %v5265_v20, %v10203_v13  ;;  %v5783_v63 = vadd.f32 %v5782_v22, %v5528_v32  ;;  %v10212_v20 = vld [vmem:[#allocation52_spill] sm:$0xff] }
 0x542   : > { %v8027_v6 = vpack.c.bf16 %v9728_v44, %v9726_v15  ;;  %v5538_v22 = vmul.f32 %v10212_v20, %v10212_v20 }
 0x543   : > { %v5267_v27 = vadd.f32 %v5266_v19, %v10204_v5  ;;  %v5784_v58 = vadd.f32 %v5783_v63, %v5529_v42 }
 0x544   : > { %8171 = vst [vmem:[%s8508_s10 + $0x3d8] sm:$0xff] %v8027_v6  }
 0x545   : > { %v5268_v36 = vadd.f32 %v5267_v27, %v10205_v56  ;;  %v5785_v11 = vadd.f32 %v5784_v58, %v5530_v52  ;;  %v3114_v38 = vpop.f32.mrf.mxu2  ;;  %v10213_v27 = vld [vmem:[#allocation53_spill] sm:$0xff] }
 0x546   : > { %v5539_v58 = vmul.f32 %v10213_v27, %v10213_v27 }
 0x547   : > { %v5269_v50 = vadd.f32 %v5268_v36, %v10206_v57  ;;  %v5786_v28 = vadd.f32 %v5785_v11, %v5531_v1  ;;  %v3763_v45 = vpop.f32.mrf.mxu3  ;;  %v10214_v1 = vld [vmem:[#allocation54_spill] sm:$0xff]  ;;  %v10215_v57 = vld [vmem:[#allocation55_spill] sm:$0xff] }
 0x548   : > { %v9757_v19 = vadd.f32 %v3763_v45, %v3114_v38  ;;  %v5540_v36 = vmul.f32 %v10214_v1, %v10214_v1 }
 0x549   : > { %v5270_v55 = vadd.f32 %v5269_v50, %v10207_v35  ;;  %v5787_v30 = vadd.f32 %v5786_v28, %v5532_v7  ;;  %v5541_v7 = vmul.f32 %v10215_v57, %v10215_v57  ;;  %v10216_v35 = vld [vmem:[#allocation56_spill] sm:$0xff] }
 0x54b   : > { %v5271_v0 = vadd.f32 %v5270_v55, %v10208_v18  ;;  %v5788_v51 = vadd.f32 %v5787_v30, %v5533_v26  ;;  %v5542_v26 = vmul.f32 %v10216_v35, %v10216_v35 }
 0x54d   : > { %v5272_v33 = vadd.f32 %v5271_v0, %v10209_v43  ;;  %v5789_v39 = vadd.f32 %v5788_v51, %v5534_v14  ;;  %v3116_v63 = vpop.f32.mrf.mxu2  ;;  %v10217_v0 = vld [vmem:[#allocation57_spill] sm:$0xff]  ;;  %v10218_v43 = vld [vmem:[#allocation58_spill] sm:$0xff] }
 0x54e   : > { %v5543_v51 = vmul.f32 %v10217_v0, %v10217_v0 }
 0x54f   : > { %v5273_v37 = vadd.f32 %v5272_v33, %v10210_v48  ;;  %v5790_v29 = vadd.f32 %v5789_v39, %v5535_v4  ;;  %v3765_v5 = vpop.f32.mrf.mxu3  ;;  %v5544_v4 = vmul.f32 %v10218_v43, %v10218_v43  ;;  %v10219_v48 = vld [vmem:[#allocation59_spill] sm:$0xff] }
 0x550   : > { %v9759_v52 = vadd.f32 %v3765_v5, %v3116_v63  ;;  %v10221_v63 = vld [vmem:[#allocation61_spill] sm:$0xff] }
 0x551   : > { %v5274_v3 = vadd.f32 %v5273_v37, %v10211_v47  ;;  %v5791_v32 = vadd.f32 %v5790_v29, %v5536_v24  ;;  %v5545_v24 = vmul.f32 %v10219_v48, %v10219_v48  ;;  %v10220_v47 = vld [vmem:[#allocation60_spill] sm:$0xff]  ;;  %v5547_v5 = vmul.f32 %v10221_v63, %v10221_v63 }
 0x552   : > { %v8032_v56 = vpack.c.bf16 %v9759_v52, %v9757_v19 }
 0x553   : > { %v5275_v13 = vadd.f32 %v5274_v3, %v10212_v20  ;;  %v5792_v42 = vadd.f32 %v5791_v32, %v5537_v12  ;;  %v5546_v12 = vmul.f32 %v10220_v47, %v10220_v47 }
 0x554   : > { %8172 = vst [vmem:[%s8508_s10 + $0x3e0] sm:$0xff] %v8032_v56  }
 0x555   : > { %v5276_v53 = vadd.f32 %v5275_v13, %v10213_v27  ;;  %v5793_v59 = vadd.f32 %v5792_v42, %v5538_v22  ;;  %v3119_v18 = vpop.f32.mrf.mxu2 }
 0x557   : > { %v5277_v11 = vadd.f32 %v5276_v53, %v10214_v1  ;;  %v5794_v6 = vadd.f32 %v5793_v59, %v5539_v58  ;;  %v3768_v14 = vpop.f32.mrf.mxu3  ;;  %v10222_v59 = vld [vmem:[#allocation62_spill] sm:$0xff] }
 0x558   : > { %v9788_v20 = vadd.f32 %v3768_v14, %v3119_v18  ;;  %v5548_v56 = vmul.f32 %v10222_v59, %v10222_v59  ;;  %v10225_v18 = vld [vmem:[#allocation65_spill] sm:$0xff] }
 0x559   : > { %v5278_v50 = vadd.f32 %v5277_v11, %v10215_v57  ;;  %v5795_v28 = vadd.f32 %v5794_v6, %v5540_v36  ;;  %v10223_v11 = vld [vmem:[#allocation63_spill] sm:$0xff]  ;;  %v5551_v14 = vmul.f32 %v10225_v18, %v10225_v18 }
 0x55a   : > { %v5549_v6 = vmul.f32 %v10223_v11, %v10223_v11 }
 0x55b   : > { %v5279_v55 = vadd.f32 %v5278_v50, %v10216_v35  ;;  %v5796_v30 = vadd.f32 %v5795_v28, %v5541_v7  ;;  %v10224_v50 = vld [vmem:[#allocation64_spill] sm:$0xff] }
 0x55c   : > { %v5550_v28 = vmul.f32 %v10224_v50, %v10224_v50 }
 0x55d   : > { %v5280_v38 = vadd.f32 %v5279_v55, %v10217_v0  ;;  %v5797_v45 = vadd.f32 %v5796_v30, %v5542_v26  ;;  %v3121_v22 = vpop.f32.mrf.mxu2 }
 0x55f   : > { %v5281_v33 = vadd.f32 %v5280_v38, %v10218_v43  ;;  %v5798_v39 = vadd.f32 %v5797_v45, %v5543_v51  ;;  %v3770_v13 = vpop.f32.mrf.mxu3  ;;  %v10226_v38 = vld [vmem:[#allocation66_spill] sm:$0xff] }
 0x560   : > { %v9790_v42 = vadd.f32 %v3770_v13, %v3121_v22  ;;  %v5552_v43 = vmul.f32 %v10226_v38, %v10226_v38 }
 0x561   : > { %v5282_v37 = vadd.f32 %v5281_v33, %v10219_v48  ;;  %v5799_v29 = vadd.f32 %v5798_v39, %v5544_v4  ;;  %v10227_v39 = vld [vmem:[#allocation67_spill] sm:$0xff] }
 0x562   : > { %v8037_v53 = vpack.c.bf16 %v9790_v42, %v9788_v20 }
 0x563   : > { %v5283_v3 = vadd.f32 %v5282_v37, %v10220_v47  ;;  %v5800_v32 = vadd.f32 %v5799_v29, %v5545_v24  ;;  %v5553_v24 = vmul.f32 %v10227_v39, %v10227_v39  ;;  %v5554_v47 = vmul.f32 %v9406_v54, %v9406_v54 }
 0x564   : > { %8173 = vst [vmem:[%s8508_s10 + $0x3e8] sm:$0xff] %v8037_v53  }
 0x565   : > { %v5284_v27 = vadd.f32 %v5283_v3, %v10221_v63  ;;  %v5801_v58 = vadd.f32 %v5800_v32, %v5546_v12  ;;  %v3124_v55 = vpop.f32.mrf.mxu2  ;;  %v10228_v63 = vld [vmem:[#allocation68_spill] sm:$0xff] }
 0x567   : > { %v5285_v1 = vadd.f32 %v5284_v27, %v10222_v59  ;;  %v5802_v36 = vadd.f32 %v5801_v58, %v5547_v5  ;;  %v3773_v30 = vpop.f32.mrf.mxu3  ;;  %v5555_v27 = vmul.f32 %v10228_v63, %v10228_v63 }
 0x568   : > { %v9819_v12 = vadd.f32 %v3773_v30, %v3124_v55 }
 0x569   : > { %v5286_v57 = vadd.f32 %v5285_v1, %v10223_v11  ;;  %v5803_v7 = vadd.f32 %v5802_v36, %v5548_v56  ;;  %v5557_v36 = vmul.f32 %v9429_v8, %v9429_v8 }
 0x56b   : > { %v5287_v35 = vadd.f32 %v5286_v57, %v10224_v50  ;;  %v5804_v26 = vadd.f32 %v5803_v7, %v5549_v6  ;;  %v5558_v57 = vmul.f32 %v9462_v21, %v9462_v21 }
 0x56d   : > { %v5288_v0 = vadd.f32 %v5287_v35, %v10225_v18  ;;  %v5805_v51 = vadd.f32 %v5804_v26, %v5550_v28  ;;  %v3126_v3 = vpop.f32.mrf.mxu2  ;;  %v5559_v35 = vmul.f32 %v9464_v16, %v9464_v16  ;;  %v5561_v18 = vmul.f32 %v9499_v41, %v9499_v41 }
 0x56f   : > { %v5289_v45 = vadd.f32 %v5288_v0, %v10226_v38  ;;  %v5806_v4 = vadd.f32 %v5805_v51, %v5551_v14  ;;  %v3775_v32 = vpop.f32.mrf.mxu3  ;;  %v5562_v0 = vmul.f32 %v9532_v31, %v9532_v31 }
 0x570   : > { %v9821_v22 = vadd.f32 %v3775_v32, %v3126_v3 }
 0x571   : > { %v5807_v33 = vadd.f32 %v5806_v4, %v5552_v43  ;;  %v5290_v48 = vadd.f32 %v5289_v45, %v10227_v39 }
 0x572   : > { %v8042_v58 = vpack.c.bf16 %v9821_v22, %v9819_v12 }
 0x573   : > { %v5808_v37 = vadd.f32 %v5807_v33, %v5553_v24  ;;  %v5291_v29 = vadd.f32 %v5290_v48, %v9406_v54  ;;  %v5556_v54 = vmul.f32 %v9427_v49, %v9427_v49  ;;  %v5564_v48 = vmul.f32 %v9567_v46, %v9567_v46 }
 0x574   : > { %8174 = vst [vmem:[%s8508_s10 + $0x3f0] sm:$0xff] %v8042_v58  }
 0x575   : > { %v5809_v13 = vadd.f32 %v5808_v37, %v5554_v47  ;;  %v5292_v5 = vadd.f32 %v5291_v29, %v10228_v63  ;;  %v3129_v7 = vpop.f32.mrf.mxu2 }
 0x577   : > { %v5810_v53 = vadd.f32 %v5809_v13, %v5555_v27  ;;  %v5293_v59 = vadd.f32 %v5292_v5, %v9427_v49  ;;  %v3778_v50 = vpop.f32.mrf.mxu3 }
 0x579   : > { %v5811_v56 = vadd.f32 %v5810_v53, %v5556_v54  ;;  %v5294_v1 = vadd.f32 %v5293_v59, %v9429_v8  ;;  %v5560_v8 = vmul.f32 %v9497_v25, %v9497_v25 }
 0x57b   : > { %v5812_v11 = vadd.f32 %v5811_v56, %v5557_v36  ;;  %v5295_v6 = vadd.f32 %v5294_v1, %v9462_v21 }
 0x57d   : > { %v5813_v28 = vadd.f32 %v5812_v11, %v5558_v57  ;;  %v5296_v49 = vadd.f32 %v5295_v6, %v9464_v16  ;;  %v3131_v51 = vpop.f32.mrf.mxu2 }
 0x57f   : > { %v5814_v26 = vadd.f32 %v5813_v28, %v5559_v35  ;;  %v5297_v55 = vadd.f32 %v5296_v49, %v9497_v25  ;;  %v9855_v25 = vadd.f32 %v3778_v50, %v3129_v7  ;;  %v3780_v38 = vpop.f32.mrf.mxu3 }
 0x580   : > { %v9857_v45 = vadd.f32 %v3780_v38, %v3131_v51 }
 0x581   : > { %v5815_v21 = vadd.f32 %v5814_v26, %v5560_v8  ;;  %v5298_v30 = vadd.f32 %v5297_v55, %v9499_v41  ;;  %v5563_v41 = vmul.f32 %v9534_v34, %v9534_v34 }
 0x583   : > { %v5816_v14 = vadd.f32 %v5815_v21, %v5561_v18  ;;  %v5299_v16 = vadd.f32 %v5298_v30, %v9532_v31  ;;  %v8047_v31 = vpack.c.bf16 %v9857_v45, %v9855_v25 }
 0x585   : > { %v5817_v43 = vadd.f32 %v5816_v14, %v5562_v0  ;;  %v5300_v4 = vadd.f32 %v5299_v16, %v9534_v34  ;;  %8175 = vst [vmem:[%s8508_s10 + $0x3f8] sm:$0xff] %v8047_v31   ;;  %v5565_v34 = vmul.f32 %v9569_v2, %v9569_v2 }
 0x587   : > { %v5818_v33 = vadd.f32 %v5817_v43, %v5563_v41  ;;  %v5301_v39 = vadd.f32 %v5300_v4, %v9567_v46 }
 0x589   : > { %v5819_v24 = vadd.f32 %v5818_v33, %v5564_v48  ;;  %v5302_v37 = vadd.f32 %v5301_v39, %v9569_v2 }
 0x58a   : > { %8276 = shalt.err (!%p8273_p5)
}
 0x58b   : > { %s8329_s8 = smov 64   ;;  %s8330_s10 = smov 4   ;;  %v5820_v46 = vadd.f32 %v5819_v24, %v5565_v34  ;;  %v5303_v2 = vadd.f32 %v5302_v37, %v9602_v60  ;;  %v5566_v29 = vmul.f32 %v9602_v60, %v9602_v60  ;;  %v5567_v32 = vmul.f32 %v9604_v40, %v9604_v40 }
 0x58c   : > { %8192 = dma.vmem_to_hbm [thread:$0]  (%p8396_p4), %s9862_s22, 16384, %s5875_s24, %s5847_s26, %s8329_s8, %s8329_s8, %s8330_s10   ;;  %v5568_v5 = vmul.f32 %v9633_v23, %v9633_v23  ;;  %v5569_v53 = vmul.f32 %v9635_v10, %v9635_v10  ;;  %v5570_v54 = vmul.f32 %v9664_v9, %v9664_v9  ;;  %v5571_v1 = vmul.f32 %v9666_v62, %v9666_v62 }
 0x58d   : > { %v5821_v47 = vadd.f32 %v5820_v46, %v5566_v29  ;;  %v5304_v3 = vadd.f32 %v5303_v2, %v9604_v40  ;;  %v5572_v11 = vmul.f32 %v9695_v17, %v9695_v17  ;;  %v5573_v57 = vmul.f32 %v9697_v61, %v9697_v61  ;;  %p293_p4 = scmp.lt.s32.totalorder %s8319_s18, 16 }
 0x58e   : > { %v5574_v50 = vmul.f32 %v9726_v15, %v9726_v15  ;;  %v5575_v49 = vmul.f32 %v9728_v44, %v9728_v44  ;;  %v5576_v26 = vmul.f32 %v9757_v19, %v9757_v19  ;;  %v5577_v8 = vmul.f32 %v9759_v52, %v9759_v52 }
 0x58f   : > { %v5822_v13 = vadd.f32 %v5821_v47, %v5567_v32  ;;  %v5305_v63 = vadd.f32 %v5304_v3, %v9633_v23  ;;  %v5578_v30 = vmul.f32 %v9788_v20, %v9788_v20  ;;  %v5579_v14 = vmul.f32 %v9790_v42, %v9790_v42  ;;  %s10239_s18 = smov (!%p293_p4, %s8319_s18), 16 }
 0x590   : > { %v5580_v0 = vmul.f32 %v9819_v12, %v9819_v12  ;;  %v5582_v4 = vmul.f32 %v9855_v25, %v9855_v25  ;;  %v5583_v31 = vmul.f32 %v9857_v45, %v9857_v45  ;;  %s298_s12 = scalar_lea.vmem %s9973_s3, %s10239_s18  ;;  %s304_s22 = scalar_lea.vmem %s9974_s4, %s10239_s18 }
 0x591   : > { %v5823_v27 = vadd.f32 %v5822_v13, %v5568_v5  ;;  %v5306_v58 = vadd.f32 %v5305_v63, %v9635_v10 }
 0x593   : > { %v5824_v59 = vadd.f32 %v5823_v27, %v5569_v53  ;;  %v5307_v60 = vadd.f32 %v5306_v58, %v9664_v9 }
 0x595   : > { %v5825_v56 = vadd.f32 %v5824_v59, %v5570_v54  ;;  %v5308_v40 = vadd.f32 %v5307_v60, %v9666_v62 }
 0x597   : > { %v5826_v36 = vadd.f32 %v5825_v56, %v5571_v1  ;;  %v5309_v23 = vadd.f32 %v5308_v40, %v9695_v17 }
 0x599   : > { %v5827_v6 = vadd.f32 %v5826_v36, %v5572_v11  ;;  %v5310_v10 = vadd.f32 %v5309_v23, %v9697_v61 }
 0x59b   : > { %v5828_v7 = vadd.f32 %v5827_v6, %v5573_v57  ;;  %v5311_v9 = vadd.f32 %v5310_v10, %v9726_v15 }
 0x59d   : > { %v5829_v28 = vadd.f32 %v5828_v7, %v5574_v50  ;;  %v5312_v62 = vadd.f32 %v5311_v9, %v9728_v44 }
 0x59f   : > { %v5830_v35 = vadd.f32 %v5829_v28, %v5575_v49  ;;  %v5313_v17 = vadd.f32 %v5312_v62, %v9757_v19 }
 0x5a1   : > { %v5831_v55 = vadd.f32 %v5830_v35, %v5576_v26  ;;  %v5314_v61 = vadd.f32 %v5313_v17, %v9759_v52 }
 0x5a3   : > { %v5832_v21 = vadd.f32 %v5831_v55, %v5577_v8  ;;  %v5315_v15 = vadd.f32 %v5314_v61, %v9788_v20  ;;  %v5581_v20 = vmul.f32 %v9821_v22, %v9821_v22 }
 0x5a5   : > { %v5833_v18 = vadd.f32 %v5832_v21, %v5578_v30  ;;  %v5316_v44 = vadd.f32 %v5315_v15, %v9790_v42 }
 0x5a7   : > { %v5834_v19 = vadd.f32 %v5833_v18, %v5579_v14  ;;  %v5317_v16 = vadd.f32 %v5316_v44, %v9819_v12 }
 0x5a9   : > { %v5835_v52 = vadd.f32 %v5834_v19, %v5580_v0  ;;  %v5318_v51 = vadd.f32 %v5317_v16, %v9821_v22 }
 0x5ab   : > { %v5836_v38 = vadd.f32 %v5835_v52, %v5581_v20  ;;  %v5319_v43 = vadd.f32 %v5318_v51, %v9855_v25 }
 0x5ad   : > { %v5837_v42 = vadd.f32 %v5836_v38, %v5582_v4  ;;  %v5320_v41 = vadd.f32 %v5319_v43, %v9857_v45 }
 0x5af   : > { %v5321_v12 = vrot.slane %v5320_v41, 4  ;;  %v5838_v33 = vadd.f32 %v5837_v42, %v5583_v31 }
 0x5b1   : > { %v5322_v39 = vadd.f32 %v5321_v12, %v5320_v41  ;;  %v5839_v48 = vrot.slane %v5838_v33, 4 }
 0x5b3   : > { %v5323_v24 = vrot.slane %v5322_v39, 2  ;;  %v5840_v37 = vadd.f32 %v5839_v48, %v5838_v33 }
 0x5b5   : > { %v5324_v22 = vadd.f32 %v5323_v24, %v5322_v39  ;;  %v5841_v34 = vrot.slane %v5840_v37, 2 }
 0x5b7   : > { %v5325_v46 = vrot.slane %v5324_v22, 1  ;;  %v5842_v2 = vadd.f32 %v5841_v34, %v5840_v37 }
 0x5b9   : > { %v5326_v25 = vadd.f32 %v5325_v46, %v5324_v22  ;;  %v5843_v29 = vrot.slane %v5842_v2, 1 }
 0x5bb   : > { %5327 = vst [vmem:[%s298_s12] sm:$0x1] %v5326_v25  ;;  %v5844_v45 = vadd.f32 %v5843_v29, %v5842_v2 }
 0x5bd   : > { %5845 = vst [vmem:[%s304_s22] sm:$0x1] %v5844_v45 }
 0x5be PF: > { %p8198_p6 = scmp.ge.s32.totalorder %s8327_s20, 2  ;;  %s5895_s24 = sand.u32 1, %s8307_s15  }
 0x5bf   : > { %s5896_s26 = scalar_lea.sflag [#allocation4], %s5895_s24 }
 0x5c0   : > { %p8195_p7 = pnand %p8198_p6, %p8403_p8 }
 0x5c2   : > { %p8196_p9 = pneg %p8195_p7 }
 0x5c4   : > { %8302 = dma.done.wait (%p8196_p9), %s5896_s26, 16384  }
 0x5c5   : > { %8304 = vsyncadd (%p8196_p9), %s5896_s26, 4294950912  ;;  %s18_s20 = sadd.s32 1, %s8327_s20   ;;  %s10229_s15 = smov %s8311_s16 }
 0x5c6   : > { %p15_p10 = scmp.ge.s32.totalorder %s18_s20, 19   ;;  %s10230_s16 = smov %s8315_s17 }
 0x5c7   : > { %s10231_s17 = smov %s8409_s28  ;;  %s10232_s18 = smov %s8323_s19 }
 0x5c8   : > { %s10233_s19 = smov %s10235_s23  ;;  %17 = sbr.rel (!%p15_p10) target bundleno = 4 (0x4), region = 98 }
 0x5cd   :  { %5920 = vsyncpa [#allocation4], 1 }
 0x5ce   :  { %5922 = vsyncpa [#allocation4 + $0x1], 1 }

</bundles_post_ra>
